<compile_context>
chip_gen: v7x
topology: tpu7x:2x2x1
jax: 0.10.0
libtpu: 0.0.40
codegen_flags: <defaults>
</compile_context>

<pallas_src>
import functools

import jax
import jax.numpy as jnp
from jax.experimental import pallas as pl
from jax.experimental.pallas import tpu as pltpu

_SQRT1_2 = 0.7071067811865476
_MAX_LANE_BLOCK = 32768          # lane-axis tile cap (review: 16K-32K lanes)


def _default_vmem_limit():
    """Scoped-VMEM limit from hardware info: ~3/4 of physical, capped at 96 MiB."""
    cap = 0
    try:
        cap = int(getattr(pltpu.get_tpu_info(), "vmem_capacity_bytes", 0))
    except Exception:
        cap = 0
    if cap <= 0:
        cap = 64 * 1024 * 1024                    # conservative (v7x physical)
    return max(32 * 1024 * 1024, min(cap * 3 // 4, 96 * 1024 * 1024))


_VMEM_LIMIT = _default_vmem_limit()


def _rows(r):
    return ((r + 7) // 8) * 8                     # sublane padding (f32 tile rows)


def _nbytes(dt):
    return jnp.dtype(dt).itemsize


def _plan_lanes(m, bytes_per_lane):
    """Choose (m_eff, lane_tile) for a lane axis of length m.

    bytes_per_lane: total bytes contributed by ONE lane column across all
    blocked streams of the kernel (sublane-padded rows * itemsize).  The tile
    is sized so double-buffered blocks stay well inside the scoped VMEM limit;
    if m is too large for one block and not 128-divisible, it is rounded up so
    the caller zero-pads the lane axis (kernels here are per-pixel, so zero
    lanes are harmless and get sliced off afterwards).
    """
    budget = _VMEM_LIMIT // 3                     # headroom: weights, scratch, pipeline
    cap = budget // max(bytes_per_lane, 1) // 2   # /2: double-buffered blocks
    cap = max(128, min(_MAX_LANE_BLOCK, cap // 128 * 128))
    if m <= cap:
        m_eff, tn = m, m                          # single full-extent block
    elif m % 128 == 0:
        tn = 128
        for t in range(cap, 127, -128):           # largest 128-mult divisor <= cap
            if m % t == 0:
                tn = t
                break
        m_eff = m
    else:
        m_eff = ((m + cap - 1) // cap) * cap      # lane-pad to a tile multiple
        tn = cap
    assert tn * bytes_per_lane * 2 <= _VMEM_LIMIT, (
        "per-step VMEM blocks exceed limit", tn, bytes_per_lane, _VMEM_LIMIT)
    return m_eff, tn


def _pad_lanes(x, m_eff):
    m = x.shape[-1]
    if m_eff == m:
        return x
    return jnp.pad(x, [(0, 0)] * (x.ndim - 1) + [(0, m_eff - m)])


def _erf(x):
    # fp32 erf (rational approximation, |err| < 1.2e-7) built from exp+arith
    # only, so it lowers on Mosaic and matches torch's exact (erf) GELU.
    z = jnp.abs(x)
    t = 1.0 / (1.0 + 0.5 * z)
    poly = (-1.26551223 + t * (1.00002368 + t * (0.37409196 + t * (0.09678418 +
            t * (-0.18628806 + t * (0.27886807 + t * (-1.13520398 + t * (1.48851587 +
            t * (-0.82215223 + t * 0.17087277)))))))))
    erfc_z = t * jnp.exp(-z * z + poly)
    return jnp.where(x >= 0.0, 1.0 - erfc_z, erfc_z - 1.0)


def _gelu(x):
    # exact (erf-based) GELU, same semantics as torch.nn.functional.gelu default
    return 0.5 * x * (1.0 + _erf(x * _SQRT1_2))


# ----------------------------- Pallas kernels ------------------------------

def _cf_linear_kernel(x_ref, w_ref, b_ref, o_ref, *, act, mxu_dtype):
    # x: (1, Cin, TN), w: (Cout, Cin), b: (Cout, 1) -> o: (1, Cout, TN)
    x = x_ref[0].astype(mxu_dtype)
    w = w_ref[...].astype(mxu_dtype)
    y = jnp.dot(w, x, preferred_element_type=jnp.float32) + b_ref[...]
    if act:
        y = _gelu(y)
    o_ref[0] = y.astype(o_ref.dtype)


def _conv_res_gelu_kernel(x1_ref, h_ref, w_ref, b_ref, o_ref, *, act, mxu_dtype):
    # fused: o = gelu?(x1 + W @ h + b)   (channels-first, lane-dense H*W axis)
    h = h_ref[0].astype(mxu_dtype)
    w = w_ref[...].astype(mxu_dtype)
    y = jnp.dot(w, h, preferred_element_type=jnp.float32) + b_ref[...]
    y = x1_ref[0].astype(jnp.float32) + y
    if act:
        y = _gelu(y)
    o_ref[0] = y.astype(o_ref.dtype)


def _head_kernel(h_ref, w1_ref, b1_ref, w2_ref, b2_ref, o_ref, *, mxu_dtype):
    # fused fc1 + GELU + fc2; the 32-wide intermediate never leaves VMEM/vregs.
    h = h_ref[0].astype(mxu_dtype)
    t = jnp.dot(w1_ref[...].astype(mxu_dtype), h,
                preferred_element_type=jnp.float32) + b1_ref[...]
    t = _gelu(t)
    o = jnp.dot(w2_ref[...].astype(mxu_dtype), t.astype(mxu_dtype),
                preferred_element_type=jnp.float32) + b2_ref[...]
    o_ref[0] = o.astype(o_ref.dtype)


def _spectral_mix_kernel(xr_ref, xi_ref, wr_ref, wi_ref, or_ref, oi_ref):
    # Complex per-mode channel mixing with a Cin-accumulation loop:
    #   out[o, k] = sum_i x[i, k] * w[i, o, k]   (complex, plain 4-product)
    # Live data per step is two (Cout, TK) accumulators + one (Cout, TK)
    # weight slice -- no (Cout, Cin, TK) temporaries (v7x VMEM / vreg spill).
    xr = xr_ref[0]                                    # (Cin, TK)
    xi = xi_ref[0]
    cin = wr_ref.shape[0]
    cout, tk = or_ref.shape[1], or_ref.shape[2]
    acc_r = jnp.zeros((cout, tk), jnp.float32)
    acc_i = jnp.zeros((cout, tk), jnp.float32)
    for i in range(cin):                              # small, static: unrolled
        wr_i = wr_ref[i]                              # (Cout, TK)
        wi_i = wi_ref[i]
        xr_i = xr[i:i + 1, :]                         # (1, TK), broadcast over Cout
        xi_i = xi[i:i + 1, :]
        acc_r = acc_r + wr_i * xr_i - wi_i * xi_i
        acc_i = acc_i + wr_i * xi_i + wi_i * xr_i
    or_ref[0] = acc_r.astype(or_ref.dtype)
    oi_ref[0] = acc_i.astype(oi_ref.dtype)


# ----------------------------- Pallas wrappers ------------------------------

def cf_linear(h, w, b, *, act=False, mxu_dtype=jnp.float32,
              out_dtype=jnp.float32, use_pallas=True):
    """Channel-first linear: y[b, o, m] = sum_c w[o, c] * h[b, c, m] + b[o]."""
    if not use_pallas:   # pure-JAX reference path
        y = jnp.einsum('oc,bcm->bom', w, h.astype(jnp.float32)) + b[None, :, None]
        return jax.nn.gelu(y, approximate=False) if act else y
    bsz, cin, m = h.shape
    cout = w.shape[0]
    bpl = _nbytes(h.dtype) * _rows(cin) + _nbytes(out_dtype) * _rows(cout)
    m_eff, tn = _plan_lanes(m, bpl)
    h = _pad_lanes(h, m_eff)
    out = pl.pallas_call(
        functools.partial(_cf_linear_kernel, act=act, mxu_dtype=mxu_dtype),
        out_shape=jax.ShapeDtypeStruct((bsz, cout, m_eff), out_dtype),
        grid=(bsz, m_eff // tn),
        in_specs=[
            pl.BlockSpec((1, cin, tn), lambda i, j: (i, 0, j)),
            pl.BlockSpec((cout, cin), lambda i, j: (0, 0)),
            pl.BlockSpec((cout, 1), lambda i, j: (0, 0)),
        ],
        out_specs=pl.BlockSpec((1, cout, tn), lambda i, j: (i, 0, j)),
        compiler_params=pltpu.CompilerParams(
            dimension_semantics=("parallel", "parallel"),
            vmem_limit_bytes=_VMEM_LIMIT),
    )(h, w, b.reshape(cout, 1))
    return out if m_eff == m else out[:, :, :m]


def conv_res_gelu(x1, h, w, b, *, act, mxu_dtype=jnp.float32,
                  out_dtype=jnp.float32, use_pallas=True):
    """Fused layer update: gelu?(x1 + conv1x1(h)) in (B, C, H*W) layout."""
    if not use_pallas:
        y = x1 + jnp.einsum('oc,bcm->bom', w, h.astype(jnp.float32)) + b[None, :, None]
        return jax.nn.gelu(y, approximate=False) if act else y
    bsz, cin, m = h.shape
    cout = w.shape[0]
    bpl = (_nbytes(x1.dtype) * _rows(cout) + _nbytes(h.dtype) * _rows(cin)
           + _nbytes(out_dtype) * _rows(cout))
    m_eff, tn = _plan_lanes(m, bpl)
    x1 = _pad_lanes(x1, m_eff)
    h = _pad_lanes(h, m_eff)
    out = pl.pallas_call(
        functools.partial(_conv_res_gelu_kernel, act=act, mxu_dtype=mxu_dtype),
        out_shape=jax.ShapeDtypeStruct((bsz, cout, m_eff), out_dtype),
        grid=(bsz, m_eff // tn),
        in_specs=[
            pl.BlockSpec((1, cout, tn), lambda i, j: (i, 0, j)),   # spectral out x1
            pl.BlockSpec((1, cin, tn), lambda i, j: (i, 0, j)),    # h
            pl.BlockSpec((cout, cin), lambda i, j: (0, 0)),
            pl.BlockSpec((cout, 1), lambda i, j: (0, 0)),
        ],
        out_specs=pl.BlockSpec((1, cout, tn), lambda i, j: (i, 0, j)),
        compiler_params=pltpu.CompilerParams(
            dimension_semantics=("parallel", "parallel"),
            vmem_limit_bytes=_VMEM_LIMIT),
    )(x1, h, w, b.reshape(cout, 1))
    return out if m_eff == m else out[:, :, :m]


def head_fc(h, w1, b1, w2, b2, *, mxu_dtype=jnp.float32, use_pallas=True):
    """Fused projection head: fc2(gelu(fc1(h))) in (B, C, H*W) layout."""
    if not use_pallas:
        t = jnp.einsum('oc,bcm->bom', w1, h.astype(jnp.float32)) + b1[None, :, None]
        t = jax.nn.gelu(t, approximate=False)
        return jnp.einsum('oc,bcm->bom', w2, t) + b2[None, :, None]
    bsz, cin, m = h.shape
    chid = w1.shape[0]
    cout = w2.shape[0]
    bpl = (_nbytes(h.dtype) * _rows(cin) + 4 * _rows(chid) + 4 * _rows(cout))
    m_eff, tn = _plan_lanes(m, bpl)
    h = _pad_lanes(h, m_eff)
    out = pl.pallas_call(
        functools.partial(_head_kernel, mxu_dtype=mxu_dtype),
        out_shape=jax.ShapeDtypeStruct((bsz, cout, m_eff), jnp.float32),
        grid=(bsz, m_eff // tn),
        in_specs=[
            pl.BlockSpec((1, cin, tn), lambda i, j: (i, 0, j)),
            pl.BlockSpec((chid, cin), lambda i, j: (0, 0)),
            pl.BlockSpec((chid, 1), lambda i, j: (0, 0)),
            pl.BlockSpec((cout, chid), lambda i, j: (0, 0)),
            pl.BlockSpec((cout, 1), lambda i, j: (0, 0)),
        ],
        out_specs=pl.BlockSpec((1, cout, tn), lambda i, j: (i, 0, j)),
        compiler_params=pltpu.CompilerParams(
            dimension_semantics=("parallel", "parallel"),
            vmem_limit_bytes=_VMEM_LIMIT),
    )(h, w1, b1.reshape(chid, 1), w2, b2.reshape(cout, 1))
    return out if m_eff == m else out[:, :, :m]


def spectral_mix(xr, xi, wr, wi, *, use_pallas=True):
    """Complex mode mixing, both FFT corners merged along the mode axis K2.
    xr/xi: (B, Cin, K2);  wr/wi: (Cin, Cout, K2)  ->  (B, Cout, K2) each."""
    if not use_pallas:
        o_r = jnp.einsum('bik,iok->bok', xr, wr) - jnp.einsum('bik,iok->bok', xi, wi)
        o_i = jnp.einsum('bik,iok->bok', xr, wi) + jnp.einsum('bik,iok->bok', xi, wr)
        return o_r, o_i
    bsz, cin, k2 = xr.shape
    cout = wr.shape[1]
    bpl = 4 * (2 * _rows(cin)              # xr, xi blocks
               + 2 * cin * _rows(cout)     # wr, wi blocks
               + 4 * _rows(cout))          # outputs + f32 accumulators
    k2_eff, tk = _plan_lanes(k2, bpl)
    xr = _pad_lanes(xr, k2_eff)
    xi = _pad_lanes(xi, k2_eff)
    wr = _pad_lanes(wr, k2_eff)
    wi = _pad_lanes(wi, k2_eff)
    sds = jax.ShapeDtypeStruct((bsz, cout, k2_eff), jnp.float32)
    spec_x = pl.BlockSpec((1, cin, tk), lambda i, j: (i, 0, j))
    spec_w = pl.BlockSpec((cin, cout, tk), lambda i, j: (0, 0, j))
    spec_o = pl.BlockSpec((1, cout, tk), lambda i, j: (i, 0, j))
    o_r, o_i = pl.pallas_call(
        _spectral_mix_kernel,
        out_shape=(sds, sds),
        grid=(bsz, k2_eff // tk),
        in_specs=[spec_x, spec_x, spec_w, spec_w],
        out_specs=(spec_o, spec_o),
        compiler_params=pltpu.CompilerParams(
            dimension_semantics=("parallel", "parallel"),
            vmem_limit_bytes=_VMEM_LIMIT),
    )(xr, xi, wr, wi)
    if k2_eff != k2:
        o_r, o_i = o_r[:, :, :k2], o_i[:, :, :k2]
    return o_r, o_i


# ----------------------------- model pieces ---------------------------------

def spectral_conv2d(h, w_r, w_i, modes1, modes2, *, use_pallas=True):
    """SpectralConv2d_fast.forward on NCHW real input h.
    w_r/w_i stored as (Cin, Cout, 2*modes1*modes2) (corner1 ‖ corner2)."""
    bsz, cin, hh, ww = h.shape
    cout = w_r.shape[1]
    wh = ww // 2 + 1
    # guard: the two written corner regions must not overlap
    assert 2 * modes1 <= hh and modes2 <= wh, (modes1, modes2, hh, wh)
    # TODO(synk): rfft2 / irfft2 computed with XLA (jnp.fft), not Pallas.
    x_ft = jnp.fft.rfft2(h.astype(jnp.float32))               # (B, Ci, H, W//2+1)
    k = modes1 * modes2
    b1 = x_ft[:, :, :modes1, :modes2].reshape(bsz, cin, k)
    b2 = x_ft[:, :, hh - modes1:, :modes2].reshape(bsz, cin, k)
    xc = jnp.concatenate([b1, b2], axis=-1)                   # (B, Ci, 2k)  (small)
    o_r, o_i = spectral_mix(jnp.real(xc), jnp.imag(xc), w_r, w_i,
                            use_pallas=use_pallas)            # (B, Co, 2k)
    o1 = jax.lax.complex(o_r[:, :, :k], o_i[:, :, :k]).reshape(bsz, cout, modes1, modes2)
    o2 = jax.lax.complex(o_r[:, :, k:], o_i[:, :, k:]).reshape(bsz, cout, modes1, modes2)
    out_ft = jnp.zeros((bsz, cout, hh, wh), dtype=jnp.complex64)
    out_ft = out_ft.at[:, :, :modes1, :modes2].set(o1)
    out_ft = out_ft.at[:, :, hh - modes1:, :modes2].set(o2)
    return jnp.fft.irfft2(out_ft, s=(hh, ww))                 # (B, Co, H, W) real


def fno2d_forward(params, x, grid, bc, modes1, modes2, *,
                  mxu_dtype=jnp.float32, act_dtype=jnp.float32, use_pallas=True):
    # x: (B, Nx, Ny, 10*C), grid: (B, Nx, Ny, 2)
    bsz, nx, ny, _ = x.shape
    h = jnp.concatenate([x, grid], axis=-1)                    # (B, Nx, Ny, 10C+2)
    # single transpose into channels-first (the reference also does one permute)
    h = jnp.transpose(h, (0, 3, 1, 2)).reshape(bsz, -1, nx * ny)
    h = cf_linear(h, params["fc0_w"], params["fc0_b"], act=False,
                  mxu_dtype=mxu_dtype, out_dtype=act_dtype,
                  use_pallas=use_pallas)                       # (B, width, Nx*Ny)
    width = params["fc0_w"].shape[0]
    h = h.reshape(bsz, width, nx, ny)                          # NCHW

    # --- BC padding: one zero-pad + 4 small edge writes (was 2 full concats)
    mult = width // bc.shape[1]
    bc_w = jnp.tile(bc[0], (mult, 1)).astype(h.dtype)          # (width, 4)
    h = jnp.pad(h, ((0, 0), (0, 0), (1, 1), (1, 1)))           # (B, W, Nx+2, Ny+2)
    h = h.at[:, :, 1:-1, 0].set(bc_w[None, :, 0:1])            # left column
    h = h.at[:, :, 1:-1, -1].set(bc_w[None, :, 1:2])           # right column
    h = h.at[:, :, 0, :].set(bc_w[None, :, 2:3])               # top row (incl. corners)
    h = h.at[:, :, -1, :].set(bc_w[None, :, 3:4])              # bottom row (incl. corners)
    nx2, ny2 = nx + 2, ny + 2
    m2 = nx2 * ny2

    for l in range(4):
        x1 = spectral_conv2d(h, params[f"sc{l}_w_r"], params[f"sc{l}_w_i"],
                             modes1, modes2, use_pallas=use_pallas)
        # fused residual add (+ GELU for layers 0..2) inside the conv1x1 kernel
        h = conv_res_gelu(x1.reshape(bsz, width, m2),
                          h.reshape(bsz, width, m2),
                          params[f"w{l}_w"], params[f"w{l}_b"],
                          act=(l < 3), mxu_dtype=mxu_dtype, out_dtype=act_dtype,
                          use_pallas=use_pallas).reshape(bsz, width, nx2, ny2)

    # Projection head is per-pixel: run it on the full padded field and crop
    # only the tiny num_channels-wide output (saves a width-wide crop copy).
    h = head_fc(h.reshape(bsz, width, m2),
                params["fc1_w"], params["fc1_b"],
                params["fc2_w"], params["fc2_b"],
                mxu_dtype=mxu_dtype, use_pallas=use_pallas)    # (B, C, m2) f32
    nc = params["fc2_w"].shape[0]
    h = h.reshape(bsz, nc, nx2, ny2)[:, :, 1:-1, 1:-1]         # crop bc padding
    h = jnp.transpose(h, (0, 2, 3, 1))                         # (B, Nx, Ny, C)
    return h[:, :, :, None, :]                                 # unsqueeze(-2)


# ----------------------------- init / driver --------------------------------

def init_params(key, num_channels, width, modes1, modes2):
    in0 = 10 * num_channels + 2
    keys = iter(jax.random.split(key, 64))

    def uni(shape, lo, hi):
        return jax.random.uniform(next(keys), shape, jnp.float32, lo, hi)

    p = {}
    # linear / conv weights stored (out, in): directly usable as W @ x (channel-first)
    p["fc0_w"] = uni((width, in0), -1.0, 1.0) / jnp.sqrt(float(in0))
    p["fc0_b"] = uni((width,), -0.1, 0.1)
    sc_scale = 1.0 / (width * width)
    k = modes1 * modes2
    for l in range(4):
        # torch layout (Cin, Cout, m1, m2) per corner; reshuffle to
        # (Cin, Cout, 2*m1*m2) hoisted here, out of the forward.
        parts_r, parts_i = [], []
        for _ in range(2):                     # corner 1 (weights1), corner 2 (weights2)
            wr = sc_scale * uni((width, width, modes1, modes2), 0.0, 1.0)
            wi = sc_scale * uni((width, width, modes1, modes2), 0.0, 1.0)
            parts_r.append(wr.reshape(width, width, k))
            parts_i.append(wi.reshape(width, width, k))
        p[f"sc{l}_w_r"] = jnp.concatenate(parts_r, axis=-1)     # (Cin, Cout, 2k)
        p[f"sc{l}_w_i"] = jnp.concatenate(parts_i, axis=-1)
        p[f"w{l}_w"] = uni((width, width), -1.0, 1.0) / jnp.sqrt(float(width))
        p[f"w{l}_b"] = uni((width,), -0.1, 0.1)
    p["fc1_w"] = uni((32, width), -1.0, 1.0) / jnp.sqrt(float(width))
    p["fc1_b"] = uni((32,), -0.1, 0.1)
    p["fc2_w"] = uni((num_channels, 32), -1.0, 1.0) / jnp.sqrt(32.0)
    p["fc2_b"] = uni((num_channels,), -0.1, 0.1)
    return p


if __name__ == "__main__":
    B, Nx, Ny = 2, 16, 16
    num_channels = 2
    width, modes1, modes2 = 10, 4, 4
    bc_channels = 5                      # width % bc_channels == 0  -> mult = 2

    key = jax.random.PRNGKey(0)
    kp, kx, kb = jax.random.split(key, 3)

    params = init_params(kp, num_channels, width, modes1, modes2)
    bc = jax.random.uniform(kb, (1, bc_channels, 4), jnp.float32, -1.0, 1.0)

    x = jax.random.normal(kx, (B, Nx, Ny, 10 * num_channels), jnp.float32)
    gx = jnp.linspace(0.0, 1.0, Nx)
    gy = jnp.linspace(0.0, 1.0, Ny)
    grid = jnp.stack(jnp.meshgrid(gx, gy, indexing="ij"), axis=-1)      # (Nx,Ny,2)
    grid = jnp.broadcast_to(grid[None], (B, Nx, Ny, 2)).astype(jnp.float32)

    # NOTE: on v6e/v7x, act_dtype=jnp.bfloat16 halves activation HBM traffic;
    # keep f32 here and validate at production sizes before flipping.
    fwd = jax.jit(lambda p, a, g, b: fno2d_forward(p, a, g, b, modes1, modes2))
    out = jax.block_until_ready(fwd(params, x, grid, bc))
    assert out.shape == (B, Nx, Ny, 1, num_channels), out.shape
    assert out.dtype == jnp.float32

    # pure-JAX reference path (same glue, jnp math instead of Pallas kernels)
    ref = fno2d_forward(params, x, grid, bc, modes1, modes2, use_pallas=False)
    ref = jax.block_until_ready(ref)
    max_abs = float(jnp.max(jnp.abs(out - ref)))
    max_ref = float(jnp.max(jnp.abs(ref)))
    assert max_abs <= 1e-4 + 1e-3 * max_ref, (max_abs, max_ref)

    print("KERNEL_OK")
</pallas_src>

<mosaic_0001>
module attributes {stable_mosaic.version = 11 : i64} {
  func.func @_cf_linear_kernel(%arg0: i32, %arg1: i32, %arg2: memref<1x22x256xf32, #tpu.memory_space<vmem>>, %arg3: memref<10x22xf32, #tpu.memory_space<vmem>>, %arg4: memref<10x1xf32, #tpu.memory_space<vmem>>, %arg5: memref<1x10x256xf32, #tpu.memory_space<vmem>>) attributes {dimension_semantics = [#tpu.dimension_semantics<parallel>, #tpu.dimension_semantics<parallel>], iteration_bounds = array<i64: 2, 1>, scalar_prefetch = 0 : i64, scratch_operands = 0 : i64, tpu.core_type = #tpu.core_type<tc>, window_params = [{transform_indices = @transform_0, window_bounds = array<i64: 1, 22, 256>}, {pipeline_mode = #tpu.pipeline_mode<synchronous>, transform_indices = @transform_1, window_bounds = array<i64: 10, 22>}, {pipeline_mode = #tpu.pipeline_mode<synchronous>, transform_indices = @transform_2, window_bounds = array<i64: 10, 1>}, {transform_indices = @transform_3, window_bounds = array<i64: 1, 10, 256>}]} {
    %c0 = arith.constant 0 : index
    %c0_0 = arith.constant 0 : index
    %c0_1 = arith.constant 0 : index
    %0 = vector.load %arg2[%c0, %c0_0, %c0_1] : memref<1x22x256xf32, #tpu.memory_space<vmem>>, vector<1x22x256xf32>
    %1 = vector.shape_cast %0 : vector<1x22x256xf32> to vector<22x256xf32>
    %c0_2 = arith.constant 0 : index
    %c0_3 = arith.constant 0 : index
    %2 = vector.load %arg3[%c0_2, %c0_3] : memref<10x22xf32, #tpu.memory_space<vmem>>, vector<10x22xf32>
    %cst = arith.constant dense<0.000000e+00> : vector<10x256xf32>
    %3 = tpu.matmul %2, %1, %cst {dimension_numbers = #tpu.dot_dimension_numbers<[1], [0], [0], [1], [0, 0, 1, 1], [], []>} : vector<10x22xf32>, vector<22x256xf32>, vector<10x256xf32> -> vector<10x256xf32>
    %c0_4 = arith.constant 0 : index
    %c0_5 = arith.constant 0 : index
    %4 = vector.load %arg4[%c0_4, %c0_5] : memref<10x1xf32, #tpu.memory_space<vmem>>, vector<10x1xf32>
    %5 = vector.broadcast %4 : vector<10x1xf32> to vector<10x256xf32>
    %6 = arith.addf %3, %5 : vector<10x256xf32>
    %c0_6 = arith.constant 0 : index
    %c0_7 = arith.constant 0 : index
    %c0_8 = arith.constant 0 : index
    %7 = vector.load %arg5[%c0_6, %c0_7, %c0_8] : memref<1x10x256xf32, #tpu.memory_space<vmem>>, vector<1x10x256xf32>
    %8 = vector.shape_cast %7 : vector<1x10x256xf32> to vector<10x256xf32>
    %9 = vector.shape_cast %6 : vector<10x256xf32> to vector<1x10x256xf32>
    tpu.vector_store %arg5[%c0_6, %c0_7, %c0_8], %9 {strides = array<i32>} : memref<1x10x256xf32, #tpu.memory_space<vmem>>, vector<1x10x256xf32>,
    return
  }
  func.func @transform_0(%arg0: i32, %arg1: i32) -> (i32, i32, i32) {
    %c0_i32 = arith.constant 0 : i32
    %c0_i32_0 = arith.constant 0 : i32
    return %arg0, %c0_i32, %arg1 : i32, i32, i32
  }
  func.func @transform_1(%arg0: i32, %arg1: i32) -> (i32, i32) {
    %c0_i32 = arith.constant 0 : i32
    %c0_i32_0 = arith.constant 0 : i32
    %c0_i32_1 = arith.constant 0 : i32
    return %c0_i32, %c0_i32_0 : i32, i32
  }
  func.func @transform_2(%arg0: i32, %arg1: i32) -> (i32, i32) {
    %c0_i32 = arith.constant 0 : i32
    %c0_i32_0 = arith.constant 0 : i32
    %c0_i32_1 = arith.constant 0 : i32
    return %c0_i32, %c0_i32_0 : i32, i32
  }
  func.func @transform_3(%arg0: i32, %arg1: i32) -> (i32, i32, i32) {
    %c0_i32 = arith.constant 0 : i32
    %c0_i32_0 = arith.constant 0 : i32
    return %arg0, %c0_i32, %arg1 : i32, i32, i32
  }
}

module attributes {stable_mosaic.version = 11 : i64} {
  func.func @_spectral_mix_kernel(%arg0: i32, %arg1: i32, %arg2: memref<1x10x32xf32, #tpu.memory_space<vmem>>, %arg3: memref<1x10x32xf32, #tpu.memory_space<vmem>>, %arg4: memref<10x10x32xf32, #tpu.memory_space<vmem>>, %arg5: memref<10x10x32xf32, #tpu.memory_space<vmem>>, %arg6: memref<1x10x32xf32, #tpu.memory_space<vmem>>, %arg7: memref<1x10x32xf32, #tpu.memory_space<vmem>>) attributes {dimension_semantics = [#tpu.dimension_semantics<parallel>, #tpu.dimension_semantics<parallel>], iteration_bounds = array<i64: 2, 1>, scalar_prefetch = 0 : i64, scratch_operands = 0 : i64, tpu.core_type = #tpu.core_type<tc>, window_params = [{transform_indices = @transform_0, window_bounds = array<i64: 1, 10, 32>}, {transform_indices = @transform_1, window_bounds = array<i64: 1, 10, 32>}, {transform_indices = @transform_2, window_bounds = array<i64: 10, 10, 32>}, {transform_indices = @transform_3, window_bounds = array<i64: 10, 10, 32>}, {transform_indices = @transform_4, window_bounds = array<i64: 1, 10, 32>}, {transform_indices = @transform_5, window_bounds = array<i64: 1, 10, 32>}]} {
    %c0 = arith.constant 0 : index
    %c0_0 = arith.constant 0 : index
    %c0_1 = arith.constant 0 : index
    %0 = vector.load %arg2[%c0, %c0_0, %c0_1] : memref<1x10x32xf32, #tpu.memory_space<vmem>>, vector<1x10x32xf32>
    %1 = vector.shape_cast %0 : vector<1x10x32xf32> to vector<10x32xf32>
    %c0_2 = arith.constant 0 : index
    %c0_3 = arith.constant 0 : index
    %c0_4 = arith.constant 0 : index
    %2 = vector.load %arg3[%c0_2, %c0_3, %c0_4] : memref<1x10x32xf32, #tpu.memory_space<vmem>>, vector<1x10x32xf32>
    %3 = vector.shape_cast %2 : vector<1x10x32xf32> to vector<10x32xf32>
    %cst = arith.constant 0.000000e+00 : f32
    %4 = vector.broadcast %cst : f32 to vector<10x32xf32>
    %cst_5 = arith.constant 0.000000e+00 : f32
    %5 = vector.broadcast %cst_5 : f32 to vector<10x32xf32>
    %c0_6 = arith.constant 0 : index
    %c0_7 = arith.constant 0 : index
    %c0_8 = arith.constant 0 : index
    %6 = vector.load %arg4[%c0_6, %c0_7, %c0_8] : memref<10x10x32xf32, #tpu.memory_space<vmem>>, vector<1x10x32xf32>
    %7 = vector.shape_cast %6 : vector<1x10x32xf32> to vector<10x32xf32>
    %c0_9 = arith.constant 0 : index
    %c0_10 = arith.constant 0 : index
    %c0_11 = arith.constant 0 : index
    %8 = vector.load %arg5[%c0_9, %c0_10, %c0_11] : memref<10x10x32xf32, #tpu.memory_space<vmem>>, vector<1x10x32xf32>
    %9 = vector.shape_cast %8 : vector<1x10x32xf32> to vector<10x32xf32>
    %10 = vector.extract_strided_slice %1 {offsets = [0, 0], sizes = [1, 32], strides = [1, 1]} : vector<10x32xf32> to vector<1x32xf32>
    %11 = vector.extract_strided_slice %3 {offsets = [0, 0], sizes = [1, 32], strides = [1, 1]} : vector<10x32xf32> to vector<1x32xf32>
    %12 = vector.broadcast %10 : vector<1x32xf32> to vector<10x32xf32>
    %13 = arith.mulf %7, %12 : vector<10x32xf32>
    %14 = arith.addf %4, %13 : vector<10x32xf32>
    %15 = vector.broadcast %11 : vector<1x32xf32> to vector<10x32xf32>
    %16 = arith.mulf %9, %15 : vector<10x32xf32>
    %17 = arith.subf %14, %16 : vector<10x32xf32>
    %18 = vector.broadcast %11 : vector<1x32xf32> to vector<10x32xf32>
    %19 = arith.mulf %7, %18 : vector<10x32xf32>
    %20 = arith.addf %5, %19 : vector<10x32xf32>
    %21 = vector.broadcast %10 : vector<1x32xf32> to vector<10x32xf32>
    %22 = arith.mulf %9, %21 : vector<10x32xf32>
    %23 = arith.addf %20, %22 : vector<10x32xf32>
    %c1 = arith.constant 1 : index
    %c0_12 = arith.constant 0 : index
    %c0_13 = arith.constant 0 : index
    %24 = vector.load %arg4[%c1, %c0_12, %c0_13] : memref<10x10x32xf32, #tpu.memory_space<vmem>>, vector<1x10x32xf32>
    %25 = vector.shape_cast %24 : vector<1x10x32xf32> to vector<10x32xf32>
    %c1_14 = arith.constant 1 : index
    %c0_15 = arith.constant 0 : index
    %c0_16 = arith.constant 0 : index
    %26 = vector.load %arg5[%c1_14, %c0_15, %c0_16] : memref<10x10x32xf32, #tpu.memory_space<vmem>>, vector<1x10x32xf32>
    %27 = vector.shape_cast %26 : vector<1x10x32xf32> to vector<10x32xf32>
    %28 = vector.extract_strided_slice %1 {offsets = [1, 0], sizes = [1, 32], strides = [1, 1]} : vector<10x32xf32> to vector<1x32xf32>
    %29 = vector.extract_strided_slice %3 {offsets = [1, 0], sizes = [1, 32], strides = [1, 1]} : vector<10x32xf32> to vector<1x32xf32>
    %30 = vector.broadcast %28 : vector<1x32xf32> to vector<10x32xf32>
    %31 = arith.mulf %25, %30 : vector<10x32xf32>
    %32 = arith.addf %17, %31 : vector<10x32xf32>
    %33 = vector.broadcast %29 : vector<1x32xf32> to vector<10x32xf32>
    %34 = arith.mulf %27, %33 : vector<10x32xf32>
    %35 = arith.subf %32, %34 : vector<10x32xf32>
    %36 = vector.broadcast %29 : vector<1x32xf32> to vector<10x32xf32>
    %37 = arith.mulf %25, %36 : vector<10x32xf32>
    %38 = arith.addf %23, %37 : vector<10x32xf32>
    %39 = vector.broadcast %28 : vector<1x32xf32> to vector<10x32xf32>
    %40 = arith.mulf %27, %39 : vector<10x32xf32>
    %41 = arith.addf %38, %40 : vector<10x32xf32>
    %c2 = arith.constant 2 : index
    %c0_17 = arith.constant 0 : index
    %c0_18 = arith.constant 0 : index
    %42 = vector.load %arg4[%c2, %c0_17, %c0_18] : memref<10x10x32xf32, #tpu.memory_space<vmem>>, vector<1x10x32xf32>
    %43 = vector.shape_cast %42 : vector<1x10x32xf32> to vector<10x32xf32>
    %c2_19 = arith.constant 2 : index
    %c0_20 = arith.constant 0 : index
    %c0_21 = arith.constant 0 : index
    %44 = vector.load %arg5[%c2_19, %c0_20, %c0_21] : memref<10x10x32xf32, #tpu.memory_space<vmem>>, vector<1x10x32xf32>
    %45 = vector.shape_cast %44 : vector<1x10x32xf32> to vector<10x32xf32>
    %46 = vector.extract_strided_slice %1 {offsets = [2, 0], sizes = [1, 32], strides = [1, 1]} : vector<10x32xf32> to vector<1x32xf32>
    %47 = vector.extract_strided_slice %3 {offsets = [2, 0], sizes = [1, 32], strides = [1, 1]} : vector<10x32xf32> to vector<1x32xf32>
    %48 = vector.broadcast %46 : vector<1x32xf32> to vector<10x32xf32>
    %49 = arith.mulf %43, %48 : vector<10x32xf32>
    %50 = arith.addf %35, %49 : vector<10x32xf32>
    %51 = vector.broadcast %47 : vector<1x32xf32> to vector<10x32xf32>
    %52 = arith.mulf %45, %51 : vector<10x32xf32>
    %53 = arith.subf %50, %52 : vector<10x32xf32>
    %54 = vector.broadcast %47 : vector<1x32xf32> to vector<10x32xf32>
    %55 = arith.mulf %43, %54 : vector<10x32xf32>
    %56 = arith.addf %41, %55 : vector<10x32xf32>
    %57 = vector.broadcast %46 : vector<1x32xf32> to vector<10x32xf32>
    %58 = arith.mulf %45, %57 : vector<10x32xf32>
    %59 = arith.addf %56, %58 : vector<10x32xf32>
    %c3 = arith.constant 3 : index
    %c0_22 = arith.constant 0 : index
    %c0_23 = arith.constant 0 : index
    %60 = vector.load %arg4[%c3, %c0_22, %c0_23] : memref<10x10x32xf32, #tpu.memory_space<vmem>>, vector<1x10x32xf32>
    %61 = vector.shape_cast %60 : vector<1x10x32xf32> to vector<10x32xf32>
    %c3_24 = arith.constant 3 : index
    %c0_25 = arith.constant 0 : index
    %c0_26 = arith.constant 0 : index
    %62 = vector.load %arg5[%c3_24, %c0_25, %c0_26] : memref<10x10x32xf32, #tpu.memory_space<vmem>>, vector<1x10x32xf32>
    %63 = vector.shape_cast %62 : vector<1x10x32xf32> to vector<10x32xf32>
    %64 = vector.extract_strided_slice %1 {offsets = [3, 0], sizes = [1, 32], strides = [1, 1]} : vector<10x32xf32> to vector<1x32xf32>
    %65 = vector.extract_strided_slice %3 {offsets = [3, 0], sizes = [1, 32], strides = [1, 1]} : vector<10x32xf32> to vector<1x32xf32>
    %66 = vector.broadcast %64 : vector<1x32xf32> to vector<10x32xf32>
    %67 = arith.mulf %61, %66 : vector<10x32xf32>
    %68 = arith.addf %53, %67 : vector<10x32xf32>
    %69 = vector.broadcast %65 : vector<1x32xf32> to vector<10x32xf32>
    %70 = arith.mulf %63, %69 : vector<10x32xf32>
    %71 = arith.subf %68, %70 : vector<10x32xf32>
    %72 = vector.broadcast %65 : vector<1x32xf32> to vector<10x32xf32>
    %73 = arith.mulf %61, %72 : vector<10x32xf32>
    %74 = arith.addf %59, %73 : vector<10x32xf32>
    %75 = vector.broadcast %64 : vector<1x32xf32> to vector<10x32xf32>
    %76 = arith.mulf %63, %75 : vector<10x32xf32>
    %77 = arith.addf %74, %76 : vector<10x32xf32>
    %c4 = arith.constant 4 : index
    %c0_27 = arith.constant 0 : index
    %c0_28 = arith.constant 0 : index
    %78 = vector.load %arg4[%c4, %c0_27, %c0_28] : memref<10x10x32xf32, #tpu.memory_space<vmem>>, vector<1x10x32xf32>
    %79 = vector.shape_cast %78 : vector<1x10x32xf32> to vector<10x32xf32>
    %c4_29 = arith.constant 4 : index
    %c0_30 = arith.constant 0 : index
    %c0_31 = arith.constant 0 : index
    %80 = vector.load %arg5[%c4_29, %c0_30, %c0_31] : memref<10x10x32xf32, #tpu.memory_space<vmem>>, vector<1x10x32xf32>
    %81 = vector.shape_cast %80 : vector<1x10x32xf32> to vector<10x32xf32>
    %82 = vector.extract_strided_slice %1 {offsets = [4, 0], sizes = [1, 32], strides = [1, 1]} : vector<10x32xf32> to vector<1x32xf32>
    %83 = vector.extract_strided_slice %3 {offsets = [4, 0], sizes = [1, 32], strides = [1, 1]} : vector<10x32xf32> to vector<1x32xf32>
    %84 = vector.broadcast %82 : vector<1x32xf32> to vector<10x32xf32>
    %85 = arith.mulf %79, %84 : vector<10x32xf32>
    %86 = arith.addf %71, %85 : vector<10x32xf32>
    %87 = vector.broadcast %83 : vector<1x32xf32> to vector<10x32xf32>
    %88 = arith.mulf %81, %87 : vector<10x32xf32>
    %89 = arith.subf %86, %88 : vector<10x32xf32>
    %90 = vector.broadcast %83 : vector<1x32xf32> to vector<10x32xf32>
    %91 = arith.mulf %79, %90 : vector<10x32xf32>
    %92 = arith.addf %77, %91 : vector<10x32xf32>
    %93 = vector.broadcast %82 : vector<1x32xf32> to vector<10x32xf32>
    %94 = arith.mulf %81, %93 : vector<10x32xf32>
    %95 = arith.addf %92, %94 : vector<10x32xf32>
    %c5 = arith.constant 5 : index
    %c0_32 = arith.constant 0 : index
    %c0_33 = arith.constant 0 : index
    %96 = vector.load %arg4[%c5, %c0_32, %c0_33] : memref<10x10x32xf32, #tpu.memory_space<vmem>>, vector<1x10x32xf32>
    %97 = vector.shape_cast %96 : vector<1x10x32xf32> to vector<10x32xf32>
    %c5_34 = arith.constant 5 : index
    %c0_35 = arith.constant 0 : index
    %c0_36 = arith.constant 0 : index
    %98 = vector.load %arg5[%c5_34, %c0_35, %c0_36] : memref<10x10x32xf32, #tpu.memory_space<vmem>>, vector<1x10x32xf32>
    %99 = vector.shape_cast %98 : vector<1x10x32xf32> to vector<10x32xf32>
    %100 = vector.extract_strided_slice %1 {offsets = [5, 0], sizes = [1, 32], strides = [1, 1]} : vector<10x32xf32> to vector<1x32xf32>
    %101 = vector.extract_strided_slice %3 {offsets = [5, 0], sizes = [1, 32], strides = [1, 1]} : vector<10x32xf32> to vector<1x32xf32>
    %102 = vector.broadcast %100 : vector<1x32xf32> to vector<10x32xf32>
    %103 = arith.mulf %97, %102 : vector<10x32xf32>
    %104 = arith.addf %89, %103 : vector<10x32xf32>
    %105 = vector.broadcast %101 : vector<1x32xf32> to vector<10x32xf32>
    %106 = arith.mulf %99, %105 : vector<10x32xf32>
    %107 = arith.subf %104, %106 : vector<10x32xf32>
    %108 = vector.broadcast %101 : vector<1x32xf32> to vector<10x32xf32>
    %109 = arith.mulf %97, %108 : vector<10x32xf32>
    %110 = arith.addf %95, %109 : vector<10x32xf32>
    %111 = vector.broadcast %100 : vector<1x32xf32> to vector<10x32xf32>
    %112 = arith.mulf %99, %111 : vector<10x32xf32>
    %113 = arith.addf %110, %112 : vector<10x32xf32>
    %c6 = arith.constant 6 : index
    %c0_37 = arith.constant 0 : index
    %c0_38 = arith.constant 0 : index
    %114 = vector.load %arg4[%c6, %c0_37, %c0_38] : memref<10x10x32xf32, #tpu.memory_space<vmem>>, vector<1x10x32xf32>
    %115 = vector.shape_cast %114 : vector<1x10x32xf32> to vector<10x32xf32>
    %c6_39 = arith.constant 6 : index
    %c0_40 = arith.constant 0 : index
    %c0_41 = arith.constant 0 : index
    %116 = vector.load %arg5[%c6_39, %c0_40, %c0_41] : memref<10x10x32xf32, #tpu.memory_space<vmem>>, vector<1x10x32xf32>
    %117 = vector.shape_cast %116 : vector<1x10x32xf32> to vector<10x32xf32>
    %118 = vector.extract_strided_slice %1 {offsets = [6, 0], sizes = [1, 32], strides = [1, 1]} : vector<10x32xf32> to vector<1x32xf32>
    %119 = vector.extract_strided_slice %3 {offsets = [6, 0], sizes = [1, 32], strides = [1, 1]} : vector<10x32xf32> to vector<1x32xf32>
    %120 = vector.broadcast %118 : vector<1x32xf32> to vector<10x32xf32>
    %121 = arith.mulf %115, %120 : vector<10x32xf32>
    %122 = arith.addf %107, %121 : vector<10x32xf32>
    %123 = vector.broadcast %119 : vector<1x32xf32> to vector<10x32xf32>
    %124 = arith.mulf %117, %123 : vector<10x32xf32>
    %125 = arith.subf %122, %124 : vector<10x32xf32>
    %126 = vector.broadcast %119 : vector<1x32xf32> to vector<10x32xf32>
    %127 = arith.mulf %115, %126 : vector<10x32xf32>
    %128 = arith.addf %113, %127 : vector<10x32xf32>
    %129 = vector.broadcast %118 : vector<1x32xf32> to vector<10x32xf32>
    %130 = arith.mulf %117, %129 : vector<10x32xf32>
    %131 = arith.addf %128, %130 : vector<10x32xf32>
    %c7 = arith.constant 7 : index
    %c0_42 = arith.constant 0 : index
    %c0_43 = arith.constant 0 : index
    %132 = vector.load %arg4[%c7, %c0_42, %c0_43] : memref<10x10x32xf32, #tpu.memory_space<vmem>>, vector<1x10x32xf32>
    %133 = vector.shape_cast %132 : vector<1x10x32xf32> to vector<10x32xf32>
    %c7_44 = arith.constant 7 : index
    %c0_45 = arith.constant 0 : index
    %c0_46 = arith.constant 0 : index
    %134 = vector.load %arg5[%c7_44, %c0_45, %c0_46] : memref<10x10x32xf32, #tpu.memory_space<vmem>>, vector<1x10x32xf32>
    %135 = vector.shape_cast %134 : vector<1x10x32xf32> to vector<10x32xf32>
    %136 = vector.extract_strided_slice %1 {offsets = [7, 0], sizes = [1, 32], strides = [1, 1]} : vector<10x32xf32> to vector<1x32xf32>
    %137 = vector.extract_strided_slice %3 {offsets = [7, 0], sizes = [1, 32], strides = [1, 1]} : vector<10x32xf32> to vector<1x32xf32>
    %138 = vector.broadcast %136 : vector<1x32xf32> to vector<10x32xf32>
    %139 = arith.mulf %133, %138 : vector<10x32xf32>
    %140 = arith.addf %125, %139 : vector<10x32xf32>
    %141 = vector.broadcast %137 : vector<1x32xf32> to vector<10x32xf32>
    %142 = arith.mulf %135, %141 : vector<10x32xf32>
    %143 = arith.subf %140, %142 : vector<10x32xf32>
    %144 = vector.broadcast %137 : vector<1x32xf32> to vector<10x32xf32>
    %145 = arith.mulf %133, %144 : vector<10x32xf32>
    %146 = arith.addf %131, %145 : vector<10x32xf32>
    %147 = vector.broadcast %136 : vector<1x32xf32> to vector<10x32xf32>
    %148 = arith.mulf %135, %147 : vector<10x32xf32>
    %149 = arith.addf %146, %148 : vector<10x32xf32>
    %c8 = arith.constant 8 : index
    %c0_47 = arith.constant 0 : index
    %c0_48 = arith.constant 0 : index
    %150 = vector.load %arg4[%c8, %c0_47, %c0_48] : memref<10x10x32xf32, #tpu.memory_space<vmem>>, vector<1x10x32xf32>
    %151 = vector.shape_cast %150 : vector<1x10x32xf32> to vector<10x32xf32>
    %c8_49 = arith.constant 8 : index
    %c0_50 = arith.constant 0 : index
    %c0_51 = arith.constant 0 : index
    %152 = vector.load %arg5[%c8_49, %c0_50, %c0_51] : memref<10x10x32xf32, #tpu.memory_space<vmem>>, vector<1x10x32xf32>
    %153 = vector.shape_cast %152 : vector<1x10x32xf32> to vector<10x32xf32>
    %154 = vector.extract_strided_slice %1 {offsets = [8, 0], sizes = [1, 32], strides = [1, 1]} : vector<10x32xf32> to vector<1x32xf32>
    %155 = vector.extract_strided_slice %3 {offsets = [8, 0], sizes = [1, 32], strides = [1, 1]} : vector<10x32xf32> to vector<1x32xf32>
    %156 = vector.broadcast %154 : vector<1x32xf32> to vector<10x32xf32>
    %157 = arith.mulf %151, %156 : vector<10x32xf32>
    %158 = arith.addf %143, %157 : vector<10x32xf32>
    %159 = vector.broadcast %155 : vector<1x32xf32> to vector<10x32xf32>
    %160 = arith.mulf %153, %159 : vector<10x32xf32>
    %161 = arith.subf %158, %160 : vector<10x32xf32>
    %162 = vector.broadcast %155 : vector<1x32xf32> to vector<10x32xf32>
    %163 = arith.mulf %151, %162 : vector<10x32xf32>
    %164 = arith.addf %149, %163 : vector<10x32xf32>
    %165 = vector.broadcast %154 : vector<1x32xf32> to vector<10x32xf32>
    %166 = arith.mulf %153, %165 : vector<10x32xf32>
    %167 = arith.addf %164, %166 : vector<10x32xf32>
    %c9 = arith.constant 9 : index
    %c0_52 = arith.constant 0 : index
    %c0_53 = arith.constant 0 : index
    %168 = vector.load %arg4[%c9, %c0_52, %c0_53] : memref<10x10x32xf32, #tpu.memory_space<vmem>>, vector<1x10x32xf32>
    %169 = vector.shape_cast %168 : vector<1x10x32xf32> to vector<10x32xf32>
    %c9_54 = arith.constant 9 : index
    %c0_55 = arith.constant 0 : index
    %c0_56 = arith.constant 0 : index
    %170 = vector.load %arg5[%c9_54, %c0_55, %c0_56] : memref<10x10x32xf32, #tpu.memory_space<vmem>>, vector<1x10x32xf32>
    %171 = vector.shape_cast %170 : vector<1x10x32xf32> to vector<10x32xf32>
    %172 = vector.extract_strided_slice %1 {offsets = [9, 0], sizes = [1, 32], strides = [1, 1]} : vector<10x32xf32> to vector<1x32xf32>
    %173 = vector.extract_strided_slice %3 {offsets = [9, 0], sizes = [1, 32], strides = [1, 1]} : vector<10x32xf32> to vector<1x32xf32>
    %174 = vector.broadcast %172 : vector<1x32xf32> to vector<10x32xf32>
    %175 = arith.mulf %169, %174 : vector<10x32xf32>
    %176 = arith.addf %161, %175 : vector<10x32xf32>
    %177 = vector.broadcast %173 : vector<1x32xf32> to vector<10x32xf32>
    %178 = arith.mulf %171, %177 : vector<10x32xf32>
    %179 = arith.subf %176, %178 : vector<10x32xf32>
    %180 = vector.broadcast %173 : vector<1x32xf32> to vector<10x32xf32>
    %181 = arith.mulf %169, %180 : vector<10x32xf32>
    %182 = arith.addf %167, %181 : vector<10x32xf32>
    %183 = vector.broadcast %172 : vector<1x32xf32> to vector<10x32xf32>
    %184 = arith.mulf %171, %183 : vector<10x32xf32>
    %185 = arith.addf %182, %184 : vector<10x32xf32>
    %c0_57 = arith.constant 0 : index
    %c0_58 = arith.constant 0 : index
    %c0_59 = arith.constant 0 : index
    %186 = vector.load %arg6[%c0_57, %c0_58, %c0_59] : memref<1x10x32xf32, #tpu.memory_space<vmem>>, vector<1x10x32xf32>
    %187 = vector.shape_cast %186 : vector<1x10x32xf32> to vector<10x32xf32>
    %188 = vector.shape_cast %179 : vector<10x32xf32> to vector<1x10x32xf32>
    tpu.vector_store %arg6[%c0_57, %c0_58, %c0_59], %188 {strides = array<i32>} : memref<1x10x32xf32, #tpu.memory_space<vmem>>, vector<1x10x32xf32>,
    %c0_60 = arith.constant 0 : index
    %c0_61 = arith.constant 0 : index
    %c0_62 = arith.constant 0 : index
    %189 = vector.load %arg7[%c0_60, %c0_61, %c0_62] : memref<1x10x32xf32, #tpu.memory_space<vmem>>, vector<1x10x32xf32>
    %190 = vector.shape_cast %189 : vector<1x10x32xf32> to vector<10x32xf32>
    %191 = vector.shape_cast %185 : vector<10x32xf32> to vector<1x10x32xf32>
    tpu.vector_store %arg7[%c0_60, %c0_61, %c0_62], %191 {strides = array<i32>} : memref<1x10x32xf32, #tpu.memory_space<vmem>>, vector<1x10x32xf32>,
    return
  }
  func.func @transform_0(%arg0: i32, %arg1: i32) -> (i32, i32, i32) {
    %c0_i32 = arith.constant 0 : i32
    %c0_i32_0 = arith.constant 0 : i32
    return %arg0, %c0_i32, %arg1 : i32, i32, i32
  }
  func.func @transform_1(%arg0: i32, %arg1: i32) -> (i32, i32, i32) {
    %c0_i32 = arith.constant 0 : i32
    %c0_i32_0 = arith.constant 0 : i32
    return %arg0, %c0_i32, %arg1 : i32, i32, i32
  }
  func.func @transform_2(%arg0: i32, %arg1: i32) -> (i32, i32, i32) {
    %c0_i32 = arith.constant 0 : i32
    %c0_i32_0 = arith.constant 0 : i32
    %c0_i32_1 = arith.constant 0 : i32
    return %c0_i32, %c0_i32_0, %arg1 : i32, i32, i32
  }
  func.func @transform_3(%arg0: i32, %arg1: i32) -> (i32, i32, i32) {
    %c0_i32 = arith.constant 0 : i32
    %c0_i32_0 = arith.constant 0 : i32
    %c0_i32_1 = arith.constant 0 : i32
    return %c0_i32, %c0_i32_0, %arg1 : i32, i32, i32
  }
  func.func @transform_4(%arg0: i32, %arg1: i32) -> (i32, i32, i32) {
    %c0_i32 = arith.constant 0 : i32
    %c0_i32_0 = arith.constant 0 : i32
    return %arg0, %c0_i32, %arg1 : i32, i32, i32
  }
  func.func @transform_5(%arg0: i32, %arg1: i32) -> (i32, i32, i32) {
    %c0_i32 = arith.constant 0 : i32
    %c0_i32_0 = arith.constant 0 : i32
    return %arg0, %c0_i32, %arg1 : i32, i32, i32
  }
}

module attributes {stable_mosaic.version = 11 : i64} {
  func.func @_conv_res_gelu_kernel(%arg0: i32, %arg1: i32, %arg2: memref<1x10x324xf32, #tpu.memory_space<vmem>>, %arg3: memref<1x10x324xf32, #tpu.memory_space<vmem>>, %arg4: memref<10x10xf32, #tpu.memory_space<vmem>>, %arg5: memref<10x1xf32, #tpu.memory_space<vmem>>, %arg6: memref<1x10x324xf32, #tpu.memory_space<vmem>>) attributes {dimension_semantics = [#tpu.dimension_semantics<parallel>, #tpu.dimension_semantics<parallel>], iteration_bounds = array<i64: 2, 1>, scalar_prefetch = 0 : i64, scratch_operands = 0 : i64, tpu.core_type = #tpu.core_type<tc>, window_params = [{transform_indices = @transform_0, window_bounds = array<i64: 1, 10, 324>}, {transform_indices = @transform_1, window_bounds = array<i64: 1, 10, 324>}, {pipeline_mode = #tpu.pipeline_mode<synchronous>, transform_indices = @transform_2, window_bounds = array<i64: 10, 10>}, {pipeline_mode = #tpu.pipeline_mode<synchronous>, transform_indices = @transform_3, window_bounds = array<i64: 10, 1>}, {transform_indices = @transform_4, window_bounds = array<i64: 1, 10, 324>}]} {
    %c0 = arith.constant 0 : index
    %c0_0 = arith.constant 0 : index
    %c0_1 = arith.constant 0 : index
    %0 = vector.load %arg3[%c0, %c0_0, %c0_1] : memref<1x10x324xf32, #tpu.memory_space<vmem>>, vector<1x10x324xf32>
    %1 = vector.shape_cast %0 : vector<1x10x324xf32> to vector<10x324xf32>
    %c0_2 = arith.constant 0 : index
    %c0_3 = arith.constant 0 : index
    %2 = vector.load %arg4[%c0_2, %c0_3] : memref<10x10xf32, #tpu.memory_space<vmem>>, vector<10x10xf32>
    %cst = arith.constant dense<0.000000e+00> : vector<10x324xf32>
    %3 = tpu.matmul %2, %1, %cst {dimension_numbers = #tpu.dot_dimension_numbers<[1], [0], [0], [1], [0, 0, 1, 1], [], []>} : vector<10x10xf32>, vector<10x324xf32>, vector<10x324xf32> -> vector<10x324xf32>
    %c0_4 = arith.constant 0 : index
    %c0_5 = arith.constant 0 : index
    %4 = vector.load %arg5[%c0_4, %c0_5] : memref<10x1xf32, #tpu.memory_space<vmem>>, vector<10x1xf32>
    %5 = vector.broadcast %4 : vector<10x1xf32> to vector<10x324xf32>
    %6 = arith.addf %3, %5 : vector<10x324xf32>
    %c0_6 = arith.constant 0 : index
    %c0_7 = arith.constant 0 : index
    %c0_8 = arith.constant 0 : index
    %7 = vector.load %arg2[%c0_6, %c0_7, %c0_8] : memref<1x10x324xf32, #tpu.memory_space<vmem>>, vector<1x10x324xf32>
    %8 = vector.shape_cast %7 : vector<1x10x324xf32> to vector<10x324xf32>
    %9 = arith.addf %8, %6 : vector<10x324xf32>
    %cst_9 = arith.constant 5.000000e-01 : f32
    %10 = vector.broadcast %cst_9 : f32 to vector<10x324xf32>
    %11 = arith.mulf %10, %9 : vector<10x324xf32>
    %cst_10 = arith.constant 0.707106769 : f32
    %12 = vector.broadcast %cst_10 : f32 to vector<10x324xf32>
    %13 = arith.mulf %9, %12 : vector<10x324xf32>
    %14 = math.absf %13 : vector<10x324xf32>
    %cst_11 = arith.constant 5.000000e-01 : f32
    %15 = vector.broadcast %cst_11 : f32 to vector<10x324xf32>
    %16 = arith.mulf %15, %14 : vector<10x324xf32>
    %cst_12 = arith.constant 1.000000e+00 : f32
    %17 = vector.broadcast %cst_12 : f32 to vector<10x324xf32>
    %18 = arith.addf %17, %16 : vector<10x324xf32>
    %cst_13 = arith.constant 1.000000e+00 : f32
    %19 = vector.broadcast %cst_13 : f32 to vector<10x324xf32>
    %20 = arith.divf %19, %18 : vector<10x324xf32>
    %cst_14 = arith.constant 0.170872763 : f32
    %21 = vector.broadcast %cst_14 : f32 to vector<10x324xf32>
    %22 = arith.mulf %20, %21 : vector<10x324xf32>
    %cst_15 = arith.constant -0.822152256 : f32
    %23 = vector.broadcast %cst_15 : f32 to vector<10x324xf32>
    %24 = arith.addf %23, %22 : vector<10x324xf32>
    %25 = arith.mulf %20, %24 : vector<10x324xf32>
    %cst_16 = arith.constant 1.48851585 : f32
    %26 = vector.broadcast %cst_16 : f32 to vector<10x324xf32>
    %27 = arith.addf %26, %25 : vector<10x324xf32>
    %28 = arith.mulf %20, %27 : vector<10x324xf32>
    %cst_17 = arith.constant -1.13520396 : f32
    %29 = vector.broadcast %cst_17 : f32 to vector<10x324xf32>
    %30 = arith.addf %29, %28 : vector<10x324xf32>
    %31 = arith.mulf %20, %30 : vector<10x324xf32>
    %cst_18 = arith.constant 0.278868079 : f32
    %32 = vector.broadcast %cst_18 : f32 to vector<10x324xf32>
    %33 = arith.addf %32, %31 : vector<10x324xf32>
    %34 = arith.mulf %20, %33 : vector<10x324xf32>
    %cst_19 = arith.constant -0.186288059 : f32
    %35 = vector.broadcast %cst_19 : f32 to vector<10x324xf32>
    %36 = arith.addf %35, %34 : vector<10x324xf32>
    %37 = arith.mulf %20, %36 : vector<10x324xf32>
    %cst_20 = arith.constant 0.0967841818 : f32
    %38 = vector.broadcast %cst_20 : f32 to vector<10x324xf32>
    %39 = arith.addf %38, %37 : vector<10x324xf32>
    %40 = arith.mulf %20, %39 : vector<10x324xf32>
    %cst_21 = arith.constant 0.374091953 : f32
    %41 = vector.broadcast %cst_21 : f32 to vector<10x324xf32>
    %42 = arith.addf %41, %40 : vector<10x324xf32>
    %43 = arith.mulf %20, %42 : vector<10x324xf32>
    %cst_22 = arith.constant 1.00002372 : f32
    %44 = vector.broadcast %cst_22 : f32 to vector<10x324xf32>
    %45 = arith.addf %44, %43 : vector<10x324xf32>
    %46 = arith.mulf %20, %45 : vector<10x324xf32>
    %cst_23 = arith.constant -1.26551223 : f32
    %47 = vector.broadcast %cst_23 : f32 to vector<10x324xf32>
    %48 = arith.addf %47, %46 : vector<10x324xf32>
    %cst_24 = arith.constant 0.000000e+00 : f32
    %49 = vector.broadcast %cst_24 : f32 to vector<10x324xf32>
    %50 = arith.subf %49, %14 : vector<10x324xf32>
    %51 = arith.mulf %50, %14 : vector<10x324xf32>
    %52 = arith.addf %51, %48 : vector<10x324xf32>
    %53 = math.exp %52 : vector<10x324xf32>
    %54 = arith.mulf %20, %53 : vector<10x324xf32>
    %cst_25 = arith.constant 0.000000e+00 : f32
    %55 = vector.broadcast %cst_25 : f32 to vector<10x324xf32>
    %56 = arith.cmpf oge, %13, %55 : vector<10x324xf32>
    %cst_26 = arith.constant 1.000000e+00 : f32
    %57 = vector.broadcast %cst_26 : f32 to vector<10x324xf32>
    %58 = arith.subf %57, %54 : vector<10x324xf32>
    %cst_27 = arith.constant 1.000000e+00 : f32
    %59 = vector.broadcast %cst_27 : f32 to vector<10x324xf32>
    %60 = arith.subf %54, %59 : vector<10x324xf32>
    %61 = arith.select %56, %58, %60 : vector<10x324xi1>, vector<10x324xf32>
    %cst_28 = arith.constant 1.000000e+00 : f32
    %62 = vector.broadcast %cst_28 : f32 to vector<10x324xf32>
    %63 = arith.addf %62, %61 : vector<10x324xf32>
    %64 = arith.mulf %11, %63 : vector<10x324xf32>
    %c0_29 = arith.constant 0 : index
    %c0_30 = arith.constant 0 : index
    %c0_31 = arith.constant 0 : index
    %65 = vector.load %arg6[%c0_29, %c0_30, %c0_31] : memref<1x10x324xf32, #tpu.memory_space<vmem>>, vector<1x10x324xf32>
    %66 = vector.shape_cast %65 : vector<1x10x324xf32> to vector<10x324xf32>
    %67 = vector.shape_cast %64 : vector<10x324xf32> to vector<1x10x324xf32>
    tpu.vector_store %arg6[%c0_29, %c0_30, %c0_31], %67 {strides = array<i32>} : memref<1x10x324xf32, #tpu.memory_space<vmem>>, vector<1x10x324xf32>,
    return
  }
  func.func @transform_0(%arg0: i32, %arg1: i32) -> (i32, i32, i32) {
    %c0_i32 = arith.constant 0 : i32
    %c0_i32_0 = arith.constant 0 : i32
    return %arg0, %c0_i32, %arg1 : i32, i32, i32
  }
  func.func @transform_1(%arg0: i32, %arg1: i32) -> (i32, i32, i32) {
    %c0_i32 = arith.constant 0 : i32
    %c0_i32_0 = arith.constant 0 : i32
    return %arg0, %c0_i32, %arg1 : i32, i32, i32
  }
  func.func @transform_2(%arg0: i32, %arg1: i32) -> (i32, i32) {
    %c0_i32 = arith.constant 0 : i32
    %c0_i32_0 = arith.constant 0 : i32
    %c0_i32_1 = arith.constant 0 : i32
    return %c0_i32, %c0_i32_0 : i32, i32
  }
  func.func @transform_3(%arg0: i32, %arg1: i32) -> (i32, i32) {
    %c0_i32 = arith.constant 0 : i32
    %c0_i32_0 = arith.constant 0 : i32
    %c0_i32_1 = arith.constant 0 : i32
    return %c0_i32, %c0_i32_0 : i32, i32
  }
  func.func @transform_4(%arg0: i32, %arg1: i32) -> (i32, i32, i32) {
    %c0_i32 = arith.constant 0 : i32
    %c0_i32_0 = arith.constant 0 : i32
    return %arg0, %c0_i32, %arg1 : i32, i32, i32
  }
}

module attributes {stable_mosaic.version = 11 : i64} {
  func.func @_conv_res_gelu_kernel(%arg0: i32, %arg1: i32, %arg2: memref<1x10x324xf32, #tpu.memory_space<vmem>>, %arg3: memref<1x10x324xf32, #tpu.memory_space<vmem>>, %arg4: memref<10x10xf32, #tpu.memory_space<vmem>>, %arg5: memref<10x1xf32, #tpu.memory_space<vmem>>, %arg6: memref<1x10x324xf32, #tpu.memory_space<vmem>>) attributes {dimension_semantics = [#tpu.dimension_semantics<parallel>, #tpu.dimension_semantics<parallel>], iteration_bounds = array<i64: 2, 1>, scalar_prefetch = 0 : i64, scratch_operands = 0 : i64, tpu.core_type = #tpu.core_type<tc>, window_params = [{transform_indices = @transform_0, window_bounds = array<i64: 1, 10, 324>}, {transform_indices = @transform_1, window_bounds = array<i64: 1, 10, 324>}, {pipeline_mode = #tpu.pipeline_mode<synchronous>, transform_indices = @transform_2, window_bounds = array<i64: 10, 10>}, {pipeline_mode = #tpu.pipeline_mode<synchronous>, transform_indices = @transform_3, window_bounds = array<i64: 10, 1>}, {transform_indices = @transform_4, window_bounds = array<i64: 1, 10, 324>}]} {
    %c0 = arith.constant 0 : index
    %c0_0 = arith.constant 0 : index
    %c0_1 = arith.constant 0 : index
    %0 = vector.load %arg3[%c0, %c0_0, %c0_1] : memref<1x10x324xf32, #tpu.memory_space<vmem>>, vector<1x10x324xf32>
    %1 = vector.shape_cast %0 : vector<1x10x324xf32> to vector<10x324xf32>
    %c0_2 = arith.constant 0 : index
    %c0_3 = arith.constant 0 : index
    %2 = vector.load %arg4[%c0_2, %c0_3] : memref<10x10xf32, #tpu.memory_space<vmem>>, vector<10x10xf32>
    %cst = arith.constant dense<0.000000e+00> : vector<10x324xf32>
    %3 = tpu.matmul %2, %1, %cst {dimension_numbers = #tpu.dot_dimension_numbers<[1], [0], [0], [1], [0, 0, 1, 1], [], []>} : vector<10x10xf32>, vector<10x324xf32>, vector<10x324xf32> -> vector<10x324xf32>
    %c0_4 = arith.constant 0 : index
    %c0_5 = arith.constant 0 : index
    %4 = vector.load %arg5[%c0_4, %c0_5] : memref<10x1xf32, #tpu.memory_space<vmem>>, vector<10x1xf32>
    %5 = vector.broadcast %4 : vector<10x1xf32> to vector<10x324xf32>
    %6 = arith.addf %3, %5 : vector<10x324xf32>
    %c0_6 = arith.constant 0 : index
    %c0_7 = arith.constant 0 : index
    %c0_8 = arith.constant 0 : index
    %7 = vector.load %arg2[%c0_6, %c0_7, %c0_8] : memref<1x10x324xf32, #tpu.memory_space<vmem>>, vector<1x10x324xf32>
    %8 = vector.shape_cast %7 : vector<1x10x324xf32> to vector<10x324xf32>
    %9 = arith.addf %8, %6 : vector<10x324xf32>
    %c0_9 = arith.constant 0 : index
    %c0_10 = arith.constant 0 : index
    %c0_11 = arith.constant 0 : index
    %10 = vector.load %arg6[%c0_9, %c0_10, %c0_11] : memref<1x10x324xf32, #tpu.memory_space<vmem>>, vector<1x10x324xf32>
    %11 = vector.shape_cast %10 : vector<1x10x324xf32> to vector<10x324xf32>
    %12 = vector.shape_cast %9 : vector<10x324xf32> to vector<1x10x324xf32>
    tpu.vector_store %arg6[%c0_9, %c0_10, %c0_11], %12 {strides = array<i32>} : memref<1x10x324xf32, #tpu.memory_space<vmem>>, vector<1x10x324xf32>,
    return
  }
  func.func @transform_0(%arg0: i32, %arg1: i32) -> (i32, i32, i32) {
    %c0_i32 = arith.constant 0 : i32
    %c0_i32_0 = arith.constant 0 : i32
    return %arg0, %c0_i32, %arg1 : i32, i32, i32
  }
  func.func @transform_1(%arg0: i32, %arg1: i32) -> (i32, i32, i32) {
    %c0_i32 = arith.constant 0 : i32
    %c0_i32_0 = arith.constant 0 : i32
    return %arg0, %c0_i32, %arg1 : i32, i32, i32
  }
  func.func @transform_2(%arg0: i32, %arg1: i32) -> (i32, i32) {
    %c0_i32 = arith.constant 0 : i32
    %c0_i32_0 = arith.constant 0 : i32
    %c0_i32_1 = arith.constant 0 : i32
    return %c0_i32, %c0_i32_0 : i32, i32
  }
  func.func @transform_3(%arg0: i32, %arg1: i32) -> (i32, i32) {
    %c0_i32 = arith.constant 0 : i32
    %c0_i32_0 = arith.constant 0 : i32
    %c0_i32_1 = arith.constant 0 : i32
    return %c0_i32, %c0_i32_0 : i32, i32
  }
  func.func @transform_4(%arg0: i32, %arg1: i32) -> (i32, i32, i32) {
    %c0_i32 = arith.constant 0 : i32
    %c0_i32_0 = arith.constant 0 : i32
    return %arg0, %c0_i32, %arg1 : i32, i32, i32
  }
}

module attributes {stable_mosaic.version = 11 : i64} {
  func.func @_head_kernel(%arg0: i32, %arg1: i32, %arg2: memref<1x10x324xf32, #tpu.memory_space<vmem>>, %arg3: memref<32x10xf32, #tpu.memory_space<vmem>>, %arg4: memref<32x1xf32, #tpu.memory_space<vmem>>, %arg5: memref<2x32xf32, #tpu.memory_space<vmem>>, %arg6: memref<2x1xf32, #tpu.memory_space<vmem>>, %arg7: memref<1x2x324xf32, #tpu.memory_space<vmem>>) attributes {dimension_semantics = [#tpu.dimension_semantics<parallel>, #tpu.dimension_semantics<parallel>], iteration_bounds = array<i64: 2, 1>, scalar_prefetch = 0 : i64, scratch_operands = 0 : i64, tpu.core_type = #tpu.core_type<tc>, window_params = [{transform_indices = @transform_0, window_bounds = array<i64: 1, 10, 324>}, {pipeline_mode = #tpu.pipeline_mode<synchronous>, transform_indices = @transform_1, window_bounds = array<i64: 32, 10>}, {pipeline_mode = #tpu.pipeline_mode<synchronous>, transform_indices = @transform_2, window_bounds = array<i64: 32, 1>}, {pipeline_mode = #tpu.pipeline_mode<synchronous>, transform_indices = @transform_3, window_bounds = array<i64: 2, 32>}, {pipeline_mode = #tpu.pipeline_mode<synchronous>, transform_indices = @transform_4, window_bounds = array<i64: 2, 1>}, {transform_indices = @transform_5, window_bounds = array<i64: 1, 2, 324>}]} {
    %c0 = arith.constant 0 : index
    %c0_0 = arith.constant 0 : index
    %c0_1 = arith.constant 0 : index
    %0 = vector.load %arg2[%c0, %c0_0, %c0_1] : memref<1x10x324xf32, #tpu.memory_space<vmem>>, vector<1x10x324xf32>
    %1 = vector.shape_cast %0 : vector<1x10x324xf32> to vector<10x324xf32>
    %c0_2 = arith.constant 0 : index
    %c0_3 = arith.constant 0 : index
    %2 = vector.load %arg3[%c0_2, %c0_3] : memref<32x10xf32, #tpu.memory_space<vmem>>, vector<32x10xf32>
    %cst = arith.constant dense<0.000000e+00> : vector<32x324xf32>
    %3 = tpu.matmul %2, %1, %cst {dimension_numbers = #tpu.dot_dimension_numbers<[1], [0], [0], [1], [0, 0, 1, 1], [], []>} : vector<32x10xf32>, vector<10x324xf32>, vector<32x324xf32> -> vector<32x324xf32>
    %c0_4 = arith.constant 0 : index
    %c0_5 = arith.constant 0 : index
    %4 = vector.load %arg4[%c0_4, %c0_5] : memref<32x1xf32, #tpu.memory_space<vmem>>, vector<32x1xf32>
    %5 = vector.broadcast %4 : vector<32x1xf32> to vector<32x324xf32>
    %6 = arith.addf %3, %5 : vector<32x324xf32>
    %cst_6 = arith.constant 5.000000e-01 : f32
    %7 = vector.broadcast %cst_6 : f32 to vector<32x324xf32>
    %8 = arith.mulf %7, %6 : vector<32x324xf32>
    %cst_7 = arith.constant 0.707106769 : f32
    %9 = vector.broadcast %cst_7 : f32 to vector<32x324xf32>
    %10 = arith.mulf %6, %9 : vector<32x324xf32>
    %11 = math.absf %10 : vector<32x324xf32>
    %cst_8 = arith.constant 5.000000e-01 : f32
    %12 = vector.broadcast %cst_8 : f32 to vector<32x324xf32>
    %13 = arith.mulf %12, %11 : vector<32x324xf32>
    %cst_9 = arith.constant 1.000000e+00 : f32
    %14 = vector.broadcast %cst_9 : f32 to vector<32x324xf32>
    %15 = arith.addf %14, %13 : vector<32x324xf32>
    %cst_10 = arith.constant 1.000000e+00 : f32
    %16 = vector.broadcast %cst_10 : f32 to vector<32x324xf32>
    %17 = arith.divf %16, %15 : vector<32x324xf32>
    %cst_11 = arith.constant 0.170872763 : f32
    %18 = vector.broadcast %cst_11 : f32 to vector<32x324xf32>
    %19 = arith.mulf %17, %18 : vector<32x324xf32>
    %cst_12 = arith.constant -0.822152256 : f32
    %20 = vector.broadcast %cst_12 : f32 to vector<32x324xf32>
    %21 = arith.addf %20, %19 : vector<32x324xf32>
    %22 = arith.mulf %17, %21 : vector<32x324xf32>
    %cst_13 = arith.constant 1.48851585 : f32
    %23 = vector.broadcast %cst_13 : f32 to vector<32x324xf32>
    %24 = arith.addf %23, %22 : vector<32x324xf32>
    %25 = arith.mulf %17, %24 : vector<32x324xf32>
    %cst_14 = arith.constant -1.13520396 : f32
    %26 = vector.broadcast %cst_14 : f32 to vector<32x324xf32>
    %27 = arith.addf %26, %25 : vector<32x324xf32>
    %28 = arith.mulf %17, %27 : vector<32x324xf32>
    %cst_15 = arith.constant 0.278868079 : f32
    %29 = vector.broadcast %cst_15 : f32 to vector<32x324xf32>
    %30 = arith.addf %29, %28 : vector<32x324xf32>
    %31 = arith.mulf %17, %30 : vector<32x324xf32>
    %cst_16 = arith.constant -0.186288059 : f32
    %32 = vector.broadcast %cst_16 : f32 to vector<32x324xf32>
    %33 = arith.addf %32, %31 : vector<32x324xf32>
    %34 = arith.mulf %17, %33 : vector<32x324xf32>
    %cst_17 = arith.constant 0.0967841818 : f32
    %35 = vector.broadcast %cst_17 : f32 to vector<32x324xf32>
    %36 = arith.addf %35, %34 : vector<32x324xf32>
    %37 = arith.mulf %17, %36 : vector<32x324xf32>
    %cst_18 = arith.constant 0.374091953 : f32
    %38 = vector.broadcast %cst_18 : f32 to vector<32x324xf32>
    %39 = arith.addf %38, %37 : vector<32x324xf32>
    %40 = arith.mulf %17, %39 : vector<32x324xf32>
    %cst_19 = arith.constant 1.00002372 : f32
    %41 = vector.broadcast %cst_19 : f32 to vector<32x324xf32>
    %42 = arith.addf %41, %40 : vector<32x324xf32>
    %43 = arith.mulf %17, %42 : vector<32x324xf32>
    %cst_20 = arith.constant -1.26551223 : f32
    %44 = vector.broadcast %cst_20 : f32 to vector<32x324xf32>
    %45 = arith.addf %44, %43 : vector<32x324xf32>
    %cst_21 = arith.constant 0.000000e+00 : f32
    %46 = vector.broadcast %cst_21 : f32 to vector<32x324xf32>
    %47 = arith.subf %46, %11 : vector<32x324xf32>
    %48 = arith.mulf %47, %11 : vector<32x324xf32>
    %49 = arith.addf %48, %45 : vector<32x324xf32>
    %50 = math.exp %49 : vector<32x324xf32>
    %51 = arith.mulf %17, %50 : vector<32x324xf32>
    %cst_22 = arith.constant 0.000000e+00 : f32
    %52 = vector.broadcast %cst_22 : f32 to vector<32x324xf32>
    %53 = arith.cmpf oge, %10, %52 : vector<32x324xf32>
    %cst_23 = arith.constant 1.000000e+00 : f32
    %54 = vector.broadcast %cst_23 : f32 to vector<32x324xf32>
    %55 = arith.subf %54, %51 : vector<32x324xf32>
    %cst_24 = arith.constant 1.000000e+00 : f32
    %56 = vector.broadcast %cst_24 : f32 to vector<32x324xf32>
    %57 = arith.subf %51, %56 : vector<32x324xf32>
    %58 = arith.select %53, %55, %57 : vector<32x324xi1>, vector<32x324xf32>
    %cst_25 = arith.constant 1.000000e+00 : f32
    %59 = vector.broadcast %cst_25 : f32 to vector<32x324xf32>
    %60 = arith.addf %59, %58 : vector<32x324xf32>
    %61 = arith.mulf %8, %60 : vector<32x324xf32>
    %c0_26 = arith.constant 0 : index
    %c0_27 = arith.constant 0 : index
    %62 = vector.load %arg5[%c0_26, %c0_27] : memref<2x32xf32, #tpu.memory_space<vmem>>, vector<2x32xf32>
    %cst_28 = arith.constant dense<0.000000e+00> : vector<2x324xf32>
    %63 = tpu.matmul %62, %61, %cst_28 {dimension_numbers = #tpu.dot_dimension_numbers<[1], [0], [0], [1], [0, 0, 1, 1], [], []>} : vector<2x32xf32>, vector<32x324xf32>, vector<2x324xf32> -> vector<2x324xf32>
    %c0_29 = arith.constant 0 : index
    %c0_30 = arith.constant 0 : index
    %64 = vector.load %arg6[%c0_29, %c0_30] : memref<2x1xf32, #tpu.memory_space<vmem>>, vector<2x1xf32>
    %65 = vector.broadcast %64 : vector<2x1xf32> to vector<2x324xf32>
    %66 = arith.addf %63, %65 : vector<2x324xf32>
    %c0_31 = arith.constant 0 : index
    %c0_32 = arith.constant 0 : index
    %c0_33 = arith.constant 0 : index
    %67 = vector.load %arg7[%c0_31, %c0_32, %c0_33] : memref<1x2x324xf32, #tpu.memory_space<vmem>>, vector<1x2x324xf32>
    %68 = vector.shape_cast %67 : vector<1x2x324xf32> to vector<2x324xf32>
    %69 = vector.shape_cast %66 : vector<2x324xf32> to vector<1x2x324xf32>
    tpu.vector_store %arg7[%c0_31, %c0_32, %c0_33], %69 {strides = array<i32>} : memref<1x2x324xf32, #tpu.memory_space<vmem>>, vector<1x2x324xf32>,
    return
  }
  func.func @transform_0(%arg0: i32, %arg1: i32) -> (i32, i32, i32) {
    %c0_i32 = arith.constant 0 : i32
    %c0_i32_0 = arith.constant 0 : i32
    return %arg0, %c0_i32, %arg1 : i32, i32, i32
  }
  func.func @transform_1(%arg0: i32, %arg1: i32) -> (i32, i32) {
    %c0_i32 = arith.constant 0 : i32
    %c0_i32_0 = arith.constant 0 : i32
    %c0_i32_1 = arith.constant 0 : i32
    return %c0_i32, %c0_i32_0 : i32, i32
  }
  func.func @transform_2(%arg0: i32, %arg1: i32) -> (i32, i32) {
    %c0_i32 = arith.constant 0 : i32
    %c0_i32_0 = arith.constant 0 : i32
    %c0_i32_1 = arith.constant 0 : i32
    return %c0_i32, %c0_i32_0 : i32, i32
  }
  func.func @transform_3(%arg0: i32, %arg1: i32) -> (i32, i32) {
    %c0_i32 = arith.constant 0 : i32
    %c0_i32_0 = arith.constant 0 : i32
    %c0_i32_1 = arith.constant 0 : i32
    return %c0_i32, %c0_i32_0 : i32, i32
  }
  func.func @transform_4(%arg0: i32, %arg1: i32) -> (i32, i32) {
    %c0_i32 = arith.constant 0 : i32
    %c0_i32_0 = arith.constant 0 : i32
    %c0_i32_1 = arith.constant 0 : i32
    return %c0_i32, %c0_i32_0 : i32, i32
  }
  func.func @transform_5(%arg0: i32, %arg1: i32) -> (i32, i32, i32) {
    %c0_i32 = arith.constant 0 : i32
    %c0_i32_0 = arith.constant 0 : i32
    return %arg0, %c0_i32, %arg1 : i32, i32, i32
  }
}

</mosaic_0001>

<bundles_post_ra>
// kernel: tile.7
= control target key start
LH: loop header
LB: loop body
LE: loop exit
PB: predicated region body
PF: predicated region fallthrough
CT: control target
= control target key end

     0   :  { %vm21_vm0 = vcmask 39936   ;;  %vm27_vm1 = vcmask 80936   ;;  %s67_s0 = inlined_call_operand.vmem [shape: f32[2,5,4], index: 0, kind: input, shape index: {}]   ;;  %s68_s1 = inlined_call_operand.vmem [shape: f32[10,4], index: 1, kind: output, shape index: {}]  }
   0x1   :  { %v37_v0 = vld [vmem:[%s67_s0 + $0x6] sm:$0x3]  ;;  %v38_v1 = vld [vmem:[%s67_s0 + $0x4] sm:$0x3]  ;;  %v39_v2 = vld [vmem:[%s67_s0 + $0x2] sm:$0x3] }
   0x2   :  { %8 = vst [vmem:[#allocation1 + $0x18] sm:$0x3] %v37_v0  ;;  %13 = vst [vmem:[#allocation1 + $0x10] sm:$0x3] %v38_v1  ;;  %v18_v3 = vld [vmem:[%s67_s0] sm:$0x3] }
   0x3   :  { %17 = vst [vmem:[#allocation1 + $0x8] sm:$0x3] %v39_v2  ;;  %19 = vst [vmem:[#allocation1] sm:$0x3] %v18_v3  ;;  %s41_s0 = smov 5  }
   0xa   :  { %v24_v4 = vld [vmem:[#allocation1 + $0x1] ss:$8 sm:$0xf]   ;;  %v20_v5 = vld [vmem:[#allocation1] ss:$8 sm:$0xf]  }
   0xb   :  { %25 = vrot.lane.b32.xlu0 %v24_v4, %s41_s0  ;;  %22 = vst.msk [vmem:[#allocation0] sm:$0xf] %vm21_vm0, %v20_v5  }
  0x7d   :  { %v26_v6 = vpop.permute.xlu0 %25  }
  0x7e   :  { %28 = vst.msk [vmem:[#allocation0] sm:$0xf] %vm27_vm1, %v26_v6  }
  0x85   :  { %v32_v7 = vld [vmem:[#allocation0] sm:$0xf] }
  0x86   :  { %34 = vst [vmem:[%s68_s1] sm:$0xf] %v32_v7 }

// kernel: _lambda_.10
= control target key start
LH: loop header
LB: loop body
LE: loop exit
PB: predicated region body
PF: predicated region fallthrough
CT: control target
= control target key end

     0   :  { %s509_s12 = smov 0   ;;  %s511_s13 = smov 0   ;;  %s558_s0 = inlined_call_operand.vmem [shape: f32[2,22,256], index: 0, kind: input, shape index: {}]   ;;  %s559_s1 = inlined_call_operand.vmem [shape: f32[10,22], index: 1, kind: input, shape index: {}]   ;;  %s560_s2 = inlined_call_operand.vmem [shape: f32[10,1], index: 2, kind: input, shape index: {}]   ;;  %s561_s3 = inlined_call_operand.vmem [shape: f32[2,10,256], index: 3, kind: output, shape index: {}]  }
   0x1   :  { %s513_s14 = smov 0  }
   0x2 LB: > { %s25_s15 = sadd.s32 1, %s481_s13  ;;  %p416_p0 = scmp.ge.s32.totalorder %s485_s14, 1  ;;  %s485_s14 = sphi %s513_s14, %s13_s14   ;;  %s481_s13 = sphi %s511_s13, %s563_s13   ;;  %s477_s12 = sphi %s509_s12, %s562_s12  }
   0x3   : > { %p27_p1 = scmp.ge.s32.totalorder %s25_s15, 2  ;;  %p158_p2 = scmp.lt.s32.totalorder %s485_s14, 3 }
   0x5   : > { %s565_s15 = smov (%p27_p1, %s25_s15), 0  ;;  %p159_p3 = pnand %p416_p0, %p158_p2 }
   0x6   : > { %p191_p4 = scmp.lt.s32.totalorder (!%p159_p3), %s477_s12, 1  ;;  %v487_v0 = vmov (!%p159_p3), 0.0   ;;  %v218_v1 = vld [vmem:[%s560_s2] sm:$0xff] (!%p159_p3)  ;;  %v488_v2 = vmov (!%p159_p3), 0   ;;  %v219_v3 = vld [vmem:[%s560_s2 + $0x8] sm:$0x3] (!%p159_p3) }
   0x7   : > { %162 = sbr.rel (%p159_p3) target bundleno = 243 (0xf3), region = 32  ;;  %308 = vmatprep.mubr.f32.mxu0 (!%p159_p3), %v487_v0  ;;  %314 = vmatprep.mubr.f32.mxu1 (!%p159_p3), %v487_v0  ;;  %vm237_vm0 = vcmask (!%p159_p3), 1045504   ;;  %v216_v12 = vld [vmem:[%s559_s1] sm:$0xff] (!%p159_p3)  ;;  %vm230_vm1 = vcmask (!%p159_p3), 179200   ;;  %v217_v13 = vld [vmem:[%s559_s1 + $0x8] sm:$0x3] (!%p159_p3) }
   0x8   : > { %462 = vset.pattern.permute.xlu0 (!%p159_p3), %v488_v2 }
   0x9   : > { %222 = vperm.xlu0 (!%p159_p3), %462, %v218_v1  }
   0xd   : > { %227 = vperm.xlu0 (!%p159_p3), %462, %v219_v3  }
   0xe   : > { %s567_s12 = smov (!%p191_p4, %s477_s12), 1 }
   0xf   : > { %s435_s18 = smul.u32 48, %s567_s12  ;;  %s426_s28 = sshll.u32 %s567_s12, 5 }
  0x10   : > { %s208_s4 = scalar_lea.vmem %s561_s3, %s426_s28 }
  0x11   : > { %s198_s23 = scalar_lea.vmem %s558_s0, %s435_s18 }
  0x12   : > { %v211_v4 = vld [vmem:[%s198_s23 + $0x8] sm:$0xff]  ;;  %v213_v5 = vld [vmem:[%s198_s23 + $0x18] sm:$0xff]  ;;  %v210_v6 = vld [vmem:[%s198_s23] sm:$0xff] }
  0x13   : > { %v427_v7 = vpack.c.bf16 %v213_v5, %v211_v4  ;;  %v212_v8 = vld [vmem:[%s198_s23 + $0x10] sm:$0xff]  ;;  %v215_v10 = vld [vmem:[%s198_s23 + $0x28] sm:$0x3f]  ;;  %v214_v11 = vld [vmem:[%s198_s23 + $0x20] sm:$0x3f] }
  0x14   : > { %v429_v9 = vpack.c.bf16 %v212_v8, %v210_v6 }
  0x15   : > { %428 = vmatprep.subr.bf16.mxu0 %v427_v7  ;;  %431 = vmatprep.subr.bf16.mxu1 %v427_v7 }
  0x16   : > { %430 = vmatpush1.bf16.msra.mxu0 %v429_v9  ;;  %433 = vmatpush1.bf16.msra.mxu1 %v429_v9 }
  0x17   : > { %420 = vmatprep.subr.msk.mxu0 %vm237_vm0, %v215_v10  ;;  %432 = vmatprep.subr.msk.mxu1 %vm237_vm0, %v215_v10 }
  0x1a   : > { %421 = vmatpush1.msk.msra.mxu0 %vm237_vm0, %v214_v11  ;;  %434 = vmatpush1.msk.msra.mxu1 %vm237_vm0, %v214_v11 }
  0x1b   : > { %422 = vmatmul.mubr.msk.f32.vlgmr.msra.gmra.mrb[0].mxu0 %vm230_vm1, %v216_v12  ;;  %423 = vmatmul.mubr.msk.f32.vlgmr.msra.gmra.mrb[0].mxu1 %vm230_vm1, %v217_v13 }
  0x88   : > { %v223_v14 = vpop.permute.xlu0 %222 }
  0x8c   : > { %v228_v15 = vpop.permute.xlu0 %227 }
  0xee   : > { %v310_v16 = vpop.f32.mrb[0].mxu0  ;;  %v316_v17 = vpop.f32.mrb[0].mxu1 }
  0xef   : > { %v311_v18 = vadd.f32 %v310_v16, %v223_v14  ;;  %v317_v19 = vadd.f32 %v316_v17, %v228_v15  ;;  %v312_v20 = vpop.f32.mrb[1].mxu0  ;;  %v318_v21 = vpop.f32.mrb[1].mxu1 }
  0xf0   : > { %v313_v22 = vadd.f32 %v312_v20, %v223_v14  ;;  %v319_v23 = vadd.f32 %v318_v21, %v228_v15 }
  0xf1   : > { %321 = vst [vmem:[%s208_s4] sm:$0xff] %v311_v18  ;;  %323 = vst [vmem:[%s208_s4 + $0x10] sm:$0x3] %v317_v19 }
  0xf2   : > { %322 = vst [vmem:[%s208_s4 + $0x8] sm:$0xff] %v313_v22  ;;  %324 = vst [vmem:[%s208_s4 + $0x18] sm:$0x3] %v319_v23 }
  0xf3 PF: > { %s13_s14 = sadd.s32 1, %s485_s14   ;;  %s562_s12 = smov %s481_s13 }
  0xf4   : > { %p10_p5 = scmp.ge.s32.totalorder %s13_s14, 4   ;;  %s563_s13 = smov %s565_s15 }
  0xf6   :  { %12 = sbr.rel (!%p10_p5) target bundleno = 2 (0x2), region = 62 }

// kernel: _lambda_.11
= control target key start
LH: loop header
LB: loop body
LE: loop exit
PB: predicated region body
PF: predicated region fallthrough
CT: control target
= control target key end

     0   :  { %s964_s18 = smov 0   ;;  %s966_s19 = smov 0   ;;  %s1397_s0 = inlined_call_operand.vmem [shape: f32[2,10,32], index: 0, kind: input, shape index: {}]   ;;  %s1398_s1 = inlined_call_operand.vmem [shape: f32[2,10,32], index: 1, kind: input, shape index: {}]   ;;  %s1399_s2 = inlined_call_operand.vmem [shape: f32[10,10,32], index: 2, kind: input, shape index: {}]   ;;  %s1400_s3 = inlined_call_operand.vmem [shape: f32[10,10,32], index: 3, kind: input, shape index: {}]   ;;  %s1401_s4 = inlined_call_operand.vmem [shape: f32[2,10,32], index: 4, kind: output, shape index: {0}]   ;;  %s1402_s5 = inlined_call_operand.vmem [shape: f32[2,10,32], index: 5, kind: output, shape index: {1}]  }
   0x1   :  { %s968_s20 = smov 0  }
   0x2 LB: > { %s28_s21 = sadd.s32 1, %s928_s19  ;;  %p835_p0 = scmp.ge.s32.totalorder %s932_s20, 1  ;;  %s932_s20 = sphi %s968_s20, %s16_s20   ;;  %s928_s19 = sphi %s966_s19, %s1404_s19   ;;  %s924_s18 = sphi %s964_s18, %s1403_s18  }
   0x3   : > { %p30_p1 = scmp.ge.s32.totalorder %s28_s21, 2  ;;  %p244_p2 = scmp.lt.s32.totalorder %s932_s20, 3 }
   0x5   : > { %s1406_s21 = smov (%p30_p1, %s28_s21), 0  ;;  %p245_p3 = pnand %p835_p0, %p244_p2 }
   0x6   : > { %p302_p4 = scmp.lt.s32.totalorder (!%p245_p3), %s924_s18, 1  ;;  %v350_v0 = vlaneseq (!%p245_p3)  ;;  %v346_v4 = vld [vmem:[%s1399_s2] sm:$0xff] (!%p245_p3)  ;;  %v347_v9 = vld [vmem:[%s1399_s2 + $0x8] sm:$0x3] (!%p245_p3)  ;;  %v844_v14 = vld [vmem:[%s1399_s2 + $0x10] sm:$0xff] (!%p245_p3)  ;;  %vm644_vm0 = vcmask (!%p245_p3), 261120  }
   0x7   : > { %248 = sbr.rel (%p245_p3) target bundleno = 78 (0x4e), region = 36  ;;  %v348_v7 = vld [vmem:[%s1400_s3] sm:$0xff] (!%p245_p3)  ;;  %v349_v10 = vld [vmem:[%s1400_s3 + $0x8] sm:$0x3] (!%p245_p3)  ;;  %v846_v17 = vld [vmem:[%s1400_s3 + $0x10] sm:$0xff] (!%p245_p3)  ;;  %vm646_vm1 = vcmask (!%p245_p3), 254976  }
   0x8   : > { %v982_v1 = vshrl.u32 (!%p245_p3), %v350_v0, 7  ;;  %v845_v24 = vld [vmem:[%s1399_s2 + $0x18] sm:$0x3] (!%p245_p3)  ;;  %v1050_v26 = vld [vmem:[%s1399_s2 + $0x20] sm:$0xff] (!%p245_p3)  ;;  %v1070_v36 = vld [vmem:[%s1399_s2 + $0x30] sm:$0xff] (!%p245_p3) }
   0x9   : > { %v1055_v28 = vld [vmem:[%s1400_s3 + $0x20] sm:$0xff] (!%p245_p3)  ;;  %v847_v37 = vld [vmem:[%s1400_s3 + $0x18] sm:$0x3] (!%p245_p3)  ;;  %v1080_v42 = vld [vmem:[%s1400_s3 + $0x30] sm:$0xff] (!%p245_p3) }
   0xa   : > { %v987_v2 = vsub.s32 (!%p245_p3), 0, %v982_v1  ;;  %v990_v3 = vsub.s32 (!%p245_p3), 1, %v982_v1  ;;  %v412_v8 = vsub.s32 (!%p245_p3), 2, %v982_v1  ;;  %v442_v18 = vsub.s32 (!%p245_p3), 3, %v982_v1  ;;  %v849_v44 = vld [vmem:[%s1399_s2 + $0x28] sm:$0x3] (!%p245_p3) }
   0xb   : > { %v472_v32 = vsub.s32 (!%p245_p3), 4, %v982_v1  ;;  %v502_v43 = vsub.s32 (!%p245_p3), 5, %v982_v1  ;;  %v1097_v53 = vld [vmem:[%s1399_s2 + $0x40] sm:$0xff] (!%p245_p3)  ;;  %v532_v56 = vsub.s32 (!%p245_p3), 6, %v982_v1  ;;  %v1105_v57 = vld [vmem:[%s1400_s3 + $0x28] sm:$0x3] (!%p245_p3) }
   0xc   : > { %v1111_v61 = vld [vmem:[%s1400_s3 + $0x40] sm:$0xff] (!%p245_p3)  ;;  %v562_v62 = vsub.s32 (!%p245_p3), 7, %v982_v1  ;;  %v1130_v1 = vld [vmem:[%s1399_s2 + $0x50] sm:$0xff] (!%p245_p3) }
   0xe   : > { %s1408_s18 = smov (!%p302_p4, %s924_s18), 1 }
   0xf   : > { %s984_s22 = sshll.u32 %s1408_s18, 4 }
  0x10   : > { %s996_s25 = scalar_lea.vmem %s1397_s0, %s984_s22  ;;  %s1002_s28 = scalar_lea.vmem %s1398_s1, %s984_s22 }
  0x11   : > { %v1008_v5 = vld [vmem:[%s996_s25] sm:$0xff]  ;;  %s1344_s29 = scalar_lea.vmem %s1401_s4, %s984_s22  ;;  %s341_s9 = scalar_lea.vmem %s1402_s5, %s984_s22 }
  0x12   : > { %v1011_v6 = vld [vmem:[%s1002_s28] sm:$0xff]  ;;  %v353_v11 = vrot.slane %v1008_v5, %v987_v2  ;;  %v1029_v13 = vrot.slane %v1008_v5, %v990_v3  ;;  %v1041_v22 = vrot.slane %v1008_v5, %v412_v8  ;;  %v1061_v31 = vrot.slane %v1008_v5, %v442_v18 }
  0x13   : > { %v361_v12 = vrot.slane %v1011_v6, %v987_v2  ;;  %v391_v21 = vrot.slane %v1011_v6, %v990_v3  ;;  %v1058_v30 = vrot.slane %v1011_v6, %v412_v8  ;;  %v1089_v47 = vrot.slane %v1011_v6, %v442_v18  ;;  %v1125_v8 = vld [vmem:[%s1399_s2 + $0x38] sm:$0x3] }
  0x14   : > { %v354_v15 = vmul.f32 %v353_v11, %v346_v4  ;;  %v355_v19 = vmul.f32 %v353_v11, %v347_v9  ;;  %v384_v25 = vmul.f32 %v844_v14, %v1029_v13  ;;  %v385_v34 = vmul.f32 %v845_v24, %v1029_v13  ;;  %v1140_v18 = vld [vmem:[%s1400_s3 + $0x38] sm:$0x3] }
  0x15   : > { %v362_v16 = vmul.f32 %v361_v12, %v348_v7  ;;  %v363_v20 = vmul.f32 %v361_v12, %v349_v10  ;;  %v392_v27 = vmul.f32 %v846_v17, %v391_v21  ;;  %v414_v35 = vmul.f32 %v1050_v26, %v1041_v22 }
  0x16   : > { %v422_v39 = vmul.f32 %v1055_v28, %v1058_v30  ;;  %v366_v40 = vmul.f32 %v361_v12, %v346_v4  ;;  %v370_v41 = vmul.f32 %v353_v11, %v348_v7  ;;  %v444_v46 = vmul.f32 %v1070_v36, %v1061_v31 }
  0x17   : > { %v364_v23 = vsub.f32 %v354_v15, %v362_v16  ;;  %v365_v33 = vsub.f32 %v355_v19, %v363_v20  ;;  %v1092_v48 = vrot.slane %v1008_v5, %v472_v32  ;;  %v367_v49 = vmul.f32 %v361_v12, %v347_v9  ;;  %v1146_v20 = vld [vmem:[%s1400_s3 + $0x50] sm:$0xff] }
  0x18   : > { %v371_v50 = vmul.f32 %v353_v11, %v349_v10  ;;  %v393_v52 = vmul.f32 %v847_v37, %v391_v21  ;;  %v452_v55 = vmul.f32 %v1080_v42, %v1089_v47  ;;  %v372_v58 = vadd.f32 %v370_v41, %v366_v40 }
  0x19   : > { %v386_v29 = vadd.f32 %v384_v25, %v364_v23  ;;  %v387_v51 = vadd.f32 %v385_v34, %v365_v33  ;;  %v396_v59 = vmul.f32 %v844_v14, %v391_v21  ;;  %v415_v60 = vmul.f32 %v849_v44, %v1041_v22  ;;  %v1171_v34 = vld [vmem:[%s1400_s3 + $0x60] sm:$0xff] }
  0x1a   : > { %v474_v0 = vmul.f32 %v1097_v53, %v1092_v48  ;;  %v1117_v4 = vrot.slane %v1011_v6, %v472_v32  ;;  %v1120_v7 = vrot.slane %v1008_v5, %v502_v43  ;;  %v373_v9 = vadd.f32 %v371_v50, %v367_v49  ;;  %v1166_v32 = vld [vmem:[%s1399_s2 + $0x48] sm:$0x3] }
  0x1b   : > { %v394_v38 = vsub.f32 %v386_v29, %v392_v27  ;;  %v397_v10 = vmul.f32 %v845_v24, %v391_v21  ;;  %v395_v11 = vsub.f32 %v387_v51, %v393_v52  ;;  %v423_v12 = vmul.f32 %v1105_v57, %v1058_v30  ;;  %v1161_v29 = vld [vmem:[%s1399_s2 + $0x60] sm:$0xff]  ;;  %v345_v52 = vld [vmem:[%s1002_s28 + $0x8] sm:$0x3] }
  0x1c   : > { %v400_v14 = vmul.f32 %v846_v17, %v1029_v13  ;;  %v482_v16 = vmul.f32 %v1111_v61, %v1117_v4  ;;  %v401_v19 = vmul.f32 %v847_v37, %v1029_v13  ;;  %v1149_v21 = vrot.slane %v1008_v5, %v532_v56 }
  0x1d   : > { %v416_v45 = vadd.f32 %v414_v35, %v394_v38  ;;  %v417_v17 = vadd.f32 %v415_v60, %v395_v11  ;;  %v445_v23 = vmul.f32 %v1125_v8, %v1061_v31  ;;  %v398_v24 = vadd.f32 %v396_v59, %v372_v58  ;;  %v1234_v11 = vld [vmem:[%s1400_s3 + $0x58] sm:$0x3] }
  0x1e   : > { %v504_v27 = vmul.f32 %v1130_v1, %v1120_v7  ;;  %v1156_v13 = vrot.slane %v1011_v6, %v502_v43  ;;  %v399_v33 = vadd.f32 %v397_v10, %v373_v9  ;;  %v1174_v35 = vrot.slane %v1008_v5, %v562_v62  ;;  %v1189_v5 = vld [vmem:[%s1399_s2 + $0x70] sm:$0xff] }
  0x1f   : > { %v424_v54 = vsub.f32 %v416_v45, %v422_v39  ;;  %v425_v37 = vsub.f32 %v417_v17, %v423_v12  ;;  %v453_v38 = vmul.f32 %v1140_v18, %v1089_v47  ;;  %v343_v39 = vld [vmem:[%s996_s25 + $0x8] sm:$0x3]  ;;  %v426_v40 = vmul.f32 %v1050_v26, %v1058_v30  ;;  %v1221_v9 = vld [vmem:[%s1400_s3 + $0x70] sm:$0xff] }
  0x20   : > { %v512_v43 = vmul.f32 %v1146_v20, %v1156_v13  ;;  %v1184_v45 = vrot.slane %v1011_v6, %v532_v56  ;;  %v427_v49 = vmul.f32 %v849_v44, %v1058_v30  ;;  %v534_v26 = vmul.f32 %v1161_v29, %v1149_v21  ;;  %v1207_v56 = vld [vmem:[%s1399_s2 + $0x58] sm:$0x3] }
  0x21   : > { %v446_v63 = vadd.f32 %v444_v46, %v424_v54  ;;  %v1194_v46 = vld [vmem:[%s1400_s3 + $0x48] sm:$0x3]  ;;  %v447_v50 = vadd.f32 %v445_v23, %v425_v37  ;;  %v475_v51 = vmul.f32 %v1166_v32, %v1092_v48  ;;  %v402_v58 = vadd.f32 %v400_v14, %v398_v24 }
  0x22   : > { %v430_v30 = vmul.f32 %v1055_v28, %v1041_v22  ;;  %v564_v44 = vmul.f32 %v1189_v5, %v1174_v35  ;;  %v1214_v59 = vrot.slane %v343_v39, %v987_v2  ;;  %v1224_v10 = vrot.slane %v1011_v6, %v562_v62  ;;  %v1229_v28 = vld [vmem:[%s1399_s2 + $0x80] sm:$0xff]  ;;  %v1252_v24 = vld [vmem:[%s1399_s2 + $0x68] sm:$0x3] }
  0x23   : > { %v454_v15 = vsub.f32 %v446_v63, %v452_v55  ;;  %v542_v55 = vmul.f32 %v1171_v34, %v1184_v45  ;;  %v455_v60 = vsub.f32 %v447_v50, %v453_v38  ;;  %v483_v63 = vmul.f32 %v1194_v46, %v1117_v4 }
  0x24   : > { %v428_v12 = vadd.f32 %v426_v40, %v402_v58  ;;  %v456_v14 = vmul.f32 %v1070_v36, %v1089_v47  ;;  %v1242_v6 = vrot.slane %v343_v39, %v990_v3  ;;  %v1247_v23 = vrot.slane %v345_v52, %v990_v3  ;;  %v1265_v39 = vld [vmem:[%s1400_s3 + $0x80] sm:$0xff] }
  0x25   : > { %v476_v25 = vadd.f32 %v474_v0, %v454_v15  ;;  %v1239_v15 = vrot.slane %v345_v52, %v987_v2  ;;  %v477_v62 = vadd.f32 %v475_v51, %v455_v60  ;;  %v460_v2 = vmul.f32 %v1080_v42, %v1061_v31  ;;  %v1270_v42 = vld [vmem:[%s1400_s3 + $0x68] sm:$0x3]  ;;  %v1301_v60 = vld [vmem:[%s1400_s3 + $0x90] sm:$0xff] }
  0x26   : > { %v432_v36 = vadd.f32 %v430_v30, %v428_v12  ;;  %v513_v3 = vmul.f32 %v1234_v11, %v1156_v13  ;;  %v535_v50 = vmul.f32 %v1252_v24, %v1149_v21  ;;  %v490_v51 = vmul.f32 %v1111_v61, %v1092_v48 }
  0x27   : > { %v484_v41 = vsub.f32 %v476_v25, %v482_v16  ;;  %v505_v16 = vmul.f32 %v1207_v56, %v1120_v7  ;;  %v572_v25 = vmul.f32 %v1221_v9, %v1224_v10  ;;  %v485_v37 = vsub.f32 %v477_v62, %v483_v63 }
  0x28   : > { %v458_v40 = vadd.f32 %v456_v14, %v432_v36  ;;  %v431_v52 = vmul.f32 %v1105_v57, %v1041_v22  ;;  %v457_v58 = vmul.f32 %v1125_v8, %v1089_v47  ;;  %v602_v61 = vmul.f32 %v1265_v39, %v1239_v15  ;;  %v1306_v47 = vld [vmem:[%s1400_s3 + $0x78] sm:$0x3] }
  0x29   : > { %v506_v54 = vadd.f32 %v504_v27, %v484_v41  ;;  %v594_v27 = vmul.f32 %v1229_v28, %v1214_v59  ;;  %v486_v41 = vmul.f32 %v1097_v53, %v1117_v4  ;;  %v1288_v53 = vld [vmem:[%s1399_s2 + $0x78] sm:$0x3]  ;;  %v543_v57 = vmul.f32 %v1270_v42, %v1184_v45 }
  0x2a   : > { %v516_v30 = vmul.f32 %v1130_v1, %v1156_v13  ;;  %v461_v63 = vmul.f32 %v1140_v18, %v1061_v31  ;;  %v565_v12 = vmul.f32 %v1288_v53, %v1174_v35  ;;  %v520_v14 = vmul.f32 %v1146_v20, %v1120_v7 }
  0x2b   : > { %v514_v0 = vsub.f32 %v506_v54, %v512_v43  ;;  %v403_v43 = vadd.f32 %v401_v19, %v399_v33  ;;  %v462_v19 = vadd.f32 %v460_v2, %v458_v40  ;;  %v487_v31 = vmul.f32 %v1166_v32, %v1117_v4 }
  0x2c   : > { %v632_v18 = vmul.f32 %v1301_v60, %v1247_v23  ;;  %v546_v20 = vmul.f32 %v1161_v29, %v1184_v45  ;;  %v491_v4 = vmul.f32 %v1194_v46, %v1092_v48  ;;  %v877_v29 = vld [vmem:[%s1399_s2 + $0x98] sm:$0x3]  ;;  %v576_v46 = vmul.f32 %v1189_v5, %v1224_v10 }
  0x2d   : > { %v536_v17 = vadd.f32 %v534_v26, %v514_v0  ;;  %v507_v26 = vadd.f32 %v505_v16, %v485_v37  ;;  %v429_v33 = vadd.f32 %v427_v49, %v403_v43  ;;  %v488_v8 = vadd.f32 %v486_v41, %v462_v19  ;;  %v873_v16 = vld [vmem:[%s1399_s2 + $0x88] sm:$0x3] }
  0x2e   : > { %v875_v37 = vld [vmem:[%s1400_s3 + $0x88] sm:$0x3]  ;;  %v595_v40 = vmul.f32 %v873_v16, %v1214_v59  ;;  %v550_v41 = vmul.f32 %v1171_v34, %v1149_v21 }
  0x2f   : > { %v544_v38 = vsub.f32 %v536_v17, %v542_v55  ;;  %v1283_v55 = vld [vmem:[%s1399_s2 + $0x90] sm:$0xff]  ;;  %v515_v22 = vsub.f32 %v507_v26, %v513_v3  ;;  %v433_v49 = vadd.f32 %v431_v52, %v429_v33  ;;  %v492_v17 = vadd.f32 %v490_v51, %v488_v8 }
  0x30   : > { %v624_v0 = vmul.f32 %v1283_v55, %v1242_v6  ;;  %v517_v51 = vmul.f32 %v1207_v56, %v1156_v13  ;;  %v603_v34 = vmul.f32 %v875_v37, %v1239_v15  ;;  %v521_v56 = vmul.f32 %v1234_v11, %v1120_v7 }
  0x31   : > { %v566_v54 = vadd.f32 %v564_v44, %v544_v38  ;;  %v537_v1 = vadd.f32 %v535_v50, %v515_v22  ;;  %v459_v36 = vadd.f32 %v457_v58, %v433_v49  ;;  %v518_v3 = vadd.f32 %v516_v30, %v492_v17 }
  0x32   : > { %v625_v58 = vmul.f32 %v877_v29, %v1242_v6  ;;  %v580_v22 = vmul.f32 %v1221_v9, %v1174_v35  ;;  %v606_v7 = vmul.f32 %v1229_v28, %v1239_v15  ;;  %v551_v49 = vmul.f32 %v1270_v42, %v1149_v21 }
  0x33   : > { %v574_v44 = vsub.f32 %v566_v54, %v572_v25  ;;  %v545_v2 = vsub.f32 %v537_v1, %v543_v57  ;;  %v573_v25 = vmul.f32 %v1306_v47, %v1224_v10  ;;  %v463_v38 = vadd.f32 %v461_v63, %v459_v36  ;;  %v879_v54 = vld [vmem:[%s1400_s3 + $0x98] sm:$0x3] }
  0x34   : > { %v522_v26 = vadd.f32 %v520_v14, %v518_v3  ;;  %v547_v57 = vmul.f32 %v1252_v24, %v1184_v45  ;;  %v610_v9 = vmul.f32 %v1265_v39, %v1214_v59  ;;  %v577_v24 = vmul.f32 %v1288_v53, %v1224_v10 }
  0x35   : > { %v596_v62 = vadd.f32 %v594_v27, %v574_v44  ;;  %v567_v32 = vadd.f32 %v565_v12, %v545_v2  ;;  %v489_v50 = vadd.f32 %v487_v31, %v463_v38  ;;  %v633_v44 = vmul.f32 %v879_v54, %v1247_v23 }
  0x36   : > { %v548_v19 = vadd.f32 %v546_v20, %v522_v26  ;;  %v636_v28 = vmul.f32 %v1283_v55, %v1247_v23  ;;  %v581_v21 = vmul.f32 %v1306_v47, %v1174_v35  ;;  %v640_v39 = vmul.f32 %v1301_v60, %v1242_v6 }
  0x37   : > { %v604_v27 = vsub.f32 %v596_v62, %v602_v61  ;;  %v575_v48 = vsub.f32 %v567_v32, %v573_v25  ;;  %v493_v13 = vadd.f32 %v491_v4, %v489_v50  ;;  %v607_v17 = vmul.f32 %v873_v16, %v1239_v15 }
  0x38   : > { %v552_v61 = vadd.f32 %v550_v41, %v548_v19  ;;  %v611_v53 = vmul.f32 %v875_v37, %v1214_v59  ;;  %v637_v35 = vmul.f32 %v877_v29, %v1247_v23  ;;  %v641_v60 = vmul.f32 %v879_v54, %v1242_v6 }
  0x39   : > { %v626_v43 = vadd.f32 %v624_v0, %v604_v27  ;;  %v597_v33 = vadd.f32 %v595_v40, %v575_v48  ;;  %v519_v5 = vadd.f32 %v517_v51, %v493_v13 }
  0x3a   : > { %v578_v8 = vadd.f32 %v576_v46, %v552_v61 }
  0x3b   : > { %v634_v52 = vsub.f32 %v626_v43, %v632_v18  ;;  %v605_v30 = vsub.f32 %v597_v33, %v603_v34  ;;  %v523_v11 = vadd.f32 %v521_v56, %v519_v5 }
  0x3c   : > { %v582_v0 = vadd.f32 %v580_v22, %v578_v8 }
  0x3d   : > { %645 = vst.msk [vmem:[%s1344_s29] sm:$0xff] %vm644_vm0, %v634_v52  ;;  %v627_v63 = vadd.f32 %v625_v58, %v605_v30  ;;  %v549_v45 = vadd.f32 %v547_v57, %v523_v11 }
  0x3e   : > { %v608_v12 = vadd.f32 %v606_v7, %v582_v0 }
  0x3f   : > { %v635_v1 = vsub.f32 %v627_v63, %v633_v44  ;;  %v553_v14 = vadd.f32 %v551_v49, %v549_v45 }
  0x40   : > { %v612_v42 = vadd.f32 %v610_v9, %v608_v12 }
  0x41   : > { %647 = vst.msk [vmem:[%s1344_s29 + $0x8] sm:$0x3] %vm646_vm1, %v635_v1  ;;  %v579_v62 = vadd.f32 %v577_v24, %v553_v14 }
  0x42   : > { %v638_v36 = vadd.f32 %v636_v28, %v612_v42 }
  0x43   : > { %v583_v10 = vadd.f32 %v581_v21, %v579_v62 }
  0x44   : > { %v642_v55 = vadd.f32 %v640_v39, %v638_v36 }
  0x45   : > { %v609_v31 = vadd.f32 %v607_v17, %v583_v10 }
  0x46   : > { %648 = vst.msk [vmem:[%s341_s9] sm:$0xff] %vm644_vm0, %v642_v55 }
  0x47   : > { %v613_v47 = vadd.f32 %v611_v53, %v609_v31 }
  0x49   : > { %v639_v18 = vadd.f32 %v637_v35, %v613_v47 }
  0x4b   : > { %v643_v2 = vadd.f32 %v641_v60, %v639_v18 }
  0x4d   : > { %649 = vst.msk [vmem:[%s341_s9 + $0x8] sm:$0x3] %vm646_vm1, %v643_v2 }
  0x4e PF: > { %s16_s20 = sadd.s32 1, %s932_s20   ;;  %s1403_s18 = smov %s928_s19 }
  0x4f   : > { %p13_p5 = scmp.ge.s32.totalorder %s16_s20, 4   ;;  %s1404_s19 = smov %s1406_s21 }
  0x51   :  { %15 = sbr.rel (!%p13_p5) target bundleno = 2 (0x2), region = 105 }

// kernel: reverse.8
= control target key start
LH: loop header
LB: loop body
LE: loop exit
PB: predicated region body
PF: predicated region fallthrough
CT: control target
= control target key end

     0   :  { %s473_s0 = inlined_call_operand.vmem [shape: f32[2,10,18,8], index: 0, kind: input, shape index: {}]   ;;  %s474_s1 = inlined_call_operand.vmem [shape: f32[2,10,18,8], index: 1, kind: output, shape index: {}]  }
   0x1   :  { %v67_v0 = vld [vmem:[%s473_s0] sm:$0xff]  ;;  %v69_v1 = vld [vmem:[%s473_s0 + $0x8] sm:$0xff]  ;;  %v71_v2 = vld [vmem:[%s473_s0 + $0x10] sm:$0xff] }
   0x2   :  { %68 = vst [vmem:[#allocation0] sm:$0xff] %v67_v0  ;;  %70 = vst [vmem:[#allocation0 + $0x8] sm:$0xff] %v69_v1  ;;  %v73_v3 = vld [vmem:[%s473_s0 + $0x18] sm:$0xff]  ;;  %v75_v4 = vld [vmem:[%s473_s0 + $0x20] sm:$0xff] }
   0x3   :  { %72 = vst [vmem:[#allocation0 + $0x10] sm:$0xff] %v71_v2  ;;  %v77_v5 = vld [vmem:[%s473_s0 + $0x28] sm:$0xff]  ;;  %74 = vst [vmem:[#allocation0 + $0x18] sm:$0xff] %v73_v3  ;;  %v79_v6 = vld [vmem:[%s473_s0 + $0x30] sm:$0xff] }
   0x4   :  { %76 = vst [vmem:[#allocation0 + $0x20] sm:$0xff] %v75_v4  ;;  %78 = vst [vmem:[#allocation0 + $0x28] sm:$0xff] %v77_v5  ;;  %v81_v7 = vld [vmem:[%s473_s0 + $0x38] sm:$0xff]  ;;  %v83_v8 = vld [vmem:[%s473_s0 + $0x40] sm:$0xff] }
   0x5   :  { %80 = vst [vmem:[#allocation0 + $0x30] sm:$0xff] %v79_v6  ;;  %82 = vst [vmem:[#allocation0 + $0x38] sm:$0xff] %v81_v7  ;;  %v85_v9 = vld [vmem:[%s473_s0 + $0x48] sm:$0xff]  ;;  %v87_v10 = vld [vmem:[%s473_s0 + $0x50] sm:$0xff] }
   0x6   :  { %84 = vst [vmem:[#allocation0 + $0x40] sm:$0xff] %v83_v8  ;;  %v89_v11 = vld [vmem:[%s473_s0 + $0x58] sm:$0xff]  ;;  %86 = vst [vmem:[#allocation0 + $0x48] sm:$0xff] %v85_v9  ;;  %v91_v12 = vld [vmem:[%s473_s0 + $0x60] sm:$0xff] }
   0x7   :  { %88 = vst [vmem:[#allocation0 + $0x50] sm:$0xff] %v87_v10  ;;  %90 = vst [vmem:[#allocation0 + $0x58] sm:$0xff] %v89_v11  ;;  %v93_v13 = vld [vmem:[%s473_s0 + $0x68] sm:$0xff]  ;;  %v95_v14 = vld [vmem:[%s473_s0 + $0x70] sm:$0xff] }
   0x8   :  { %92 = vst [vmem:[#allocation0 + $0x60] sm:$0xff] %v91_v12  ;;  %94 = vst [vmem:[#allocation0 + $0x68] sm:$0xff] %v93_v13  ;;  %v97_v15 = vld [vmem:[%s473_s0 + $0x78] sm:$0xff]  ;;  %v99_v16 = vld [vmem:[%s473_s0 + $0x80] sm:$0xff] }
   0x9   :  { %96 = vst [vmem:[#allocation0 + $0x70] sm:$0xff] %v95_v14  ;;  %v101_v17 = vld [vmem:[%s473_s0 + $0x88] sm:$0xff]  ;;  %98 = vst [vmem:[#allocation0 + $0x78] sm:$0xff] %v97_v15  ;;  %v103_v18 = vld [vmem:[%s473_s0 + $0x90] sm:$0xff] }
   0xa   :  { %100 = vst [vmem:[#allocation0 + $0x80] sm:$0xff] %v99_v16  ;;  %102 = vst [vmem:[#allocation0 + $0x88] sm:$0xff] %v101_v17  ;;  %v105_v19 = vld [vmem:[%s473_s0 + $0x98] sm:$0xff]  ;;  %v111_v20 = vld [vmem:[#allocation0 + $0x7] ss:$-1 sm:$0xff] }
   0xb   :  { %104 = vst [vmem:[#allocation0 + $0x90] sm:$0xff] %v103_v18  ;;  %106 = vst [vmem:[#allocation0 + $0x98] sm:$0xff] %v105_v19  ;;  %v116_v21 = vld [vmem:[#allocation0 + $0xf] ss:$-1 sm:$0xff]  ;;  %v121_v22 = vld [vmem:[#allocation0 + $0x17] ss:$-1 sm:$0xff] }
   0xc   :  { %v126_v23 = vld [vmem:[#allocation0 + $0x1f] ss:$-1 sm:$0xff]  ;;  %v131_v24 = vld [vmem:[#allocation0 + $0x27] ss:$-1 sm:$0xff]  ;;  %v136_v25 = vld [vmem:[#allocation0 + $0x2f] ss:$-1 sm:$0xff]  ;;  %274 = vst [vmem:[%s474_s1] sm:$0xff] %v111_v20 }
   0xd   :  { %276 = vst [vmem:[%s474_s1 + $0x8] sm:$0xff] %v116_v21  ;;  %278 = vst [vmem:[%s474_s1 + $0x10] sm:$0xff] %v121_v22  ;;  %v141_v26 = vld [vmem:[#allocation0 + $0x37] ss:$-1 sm:$0xff]  ;;  %v146_v27 = vld [vmem:[#allocation0 + $0x3f] ss:$-1 sm:$0xff] }
   0xe   :  { %v151_v28 = vld [vmem:[#allocation0 + $0x47] ss:$-1 sm:$0xff]  ;;  %280 = vst [vmem:[%s474_s1 + $0x18] sm:$0xff] %v126_v23  ;;  %282 = vst [vmem:[%s474_s1 + $0x20] sm:$0xff] %v131_v24  ;;  %v156_v29 = vld [vmem:[#allocation0 + $0x4f] ss:$-1 sm:$0xff] }
   0xf   :  { %284 = vst [vmem:[%s474_s1 + $0x28] sm:$0xff] %v136_v25  ;;  %v161_v30 = vld [vmem:[#allocation0 + $0x57] ss:$-1 sm:$0xff]  ;;  %v166_v31 = vld [vmem:[#allocation0 + $0x5f] ss:$-1 sm:$0xff]  ;;  %286 = vst [vmem:[%s474_s1 + $0x30] sm:$0xff] %v141_v26 }
  0x10   :  { %288 = vst [vmem:[%s474_s1 + $0x38] sm:$0xff] %v146_v27  ;;  %290 = vst [vmem:[%s474_s1 + $0x40] sm:$0xff] %v151_v28  ;;  %v171_v32 = vld [vmem:[#allocation0 + $0x67] ss:$-1 sm:$0xff]  ;;  %v176_v33 = vld [vmem:[#allocation0 + $0x6f] ss:$-1 sm:$0xff] }
  0x11   :  { %v181_v34 = vld [vmem:[#allocation0 + $0x77] ss:$-1 sm:$0xff]  ;;  %292 = vst [vmem:[%s474_s1 + $0x48] sm:$0xff] %v156_v29  ;;  %294 = vst [vmem:[%s474_s1 + $0x50] sm:$0xff] %v161_v30  ;;  %v186_v35 = vld [vmem:[#allocation0 + $0x7f] ss:$-1 sm:$0xff] }
  0x12   :  { %296 = vst [vmem:[%s474_s1 + $0x58] sm:$0xff] %v166_v31  ;;  %v191_v36 = vld [vmem:[#allocation0 + $0x87] ss:$-1 sm:$0xff]  ;;  %v196_v37 = vld [vmem:[#allocation0 + $0x8f] ss:$-1 sm:$0xff]  ;;  %298 = vst [vmem:[%s474_s1 + $0x60] sm:$0xff] %v171_v32 }
  0x13   :  { %300 = vst [vmem:[%s474_s1 + $0x68] sm:$0xff] %v176_v33  ;;  %302 = vst [vmem:[%s474_s1 + $0x70] sm:$0xff] %v181_v34  ;;  %v201_v38 = vld [vmem:[#allocation0 + $0x97] ss:$-1 sm:$0xff]  ;;  %v206_v39 = vld [vmem:[#allocation0 + $0x9f] ss:$-1 sm:$0xff] }
  0x14   :  { %304 = vst [vmem:[%s474_s1 + $0x78] sm:$0xff] %v186_v35  ;;  %306 = vst [vmem:[%s474_s1 + $0x80] sm:$0xff] %v191_v36 }
  0x15   :  { %308 = vst [vmem:[%s474_s1 + $0x88] sm:$0xff] %v196_v37  ;;  %310 = vst [vmem:[%s474_s1 + $0x90] sm:$0xff] %v201_v38 }
  0x16   :  { %312 = vst [vmem:[%s474_s1 + $0x98] sm:$0xff] %v206_v39 }

// kernel: _lambda_.12
= control target key start
LH: loop header
LB: loop body
LE: loop exit
PB: predicated region body
PF: predicated region fallthrough
CT: control target
= control target key end

     0   :  { %s960_s15 = smov 0   ;;  %s962_s16 = smov 0   ;;  %s1184_s0 = inlined_call_operand.vmem [shape: f32[2,10,324], index: 0, kind: input, shape index: {}]   ;;  %s1185_s1 = inlined_call_operand.vmem [shape: f32[2,10,324], index: 1, kind: input, shape index: {}]   ;;  %s1186_s2 = inlined_call_operand.vmem [shape: f32[10,10], index: 2, kind: input, shape index: {}]   ;;  %s1187_s3 = inlined_call_operand.vmem [shape: f32[10,1], index: 3, kind: input, shape index: {}]   ;;  %s1188_s4 = inlined_call_operand.vmem [shape: f32[2,10,324], index: 4, kind: output, shape index: {}]  }
   0x1   :  { %s964_s17 = smov 0  }
   0x2 LB: > { %s26_s18 = sadd.s32 1, %s926_s16  ;;  %p813_p0 = scmp.ge.s32.totalorder %s930_s17, 1  ;;  %s930_s17 = sphi %s964_s17, %s14_s17   ;;  %s926_s16 = sphi %s962_s16, %s1190_s16   ;;  %s922_s15 = sphi %s960_s15, %s1189_s15  }
   0x3   : > { %p28_p1 = scmp.ge.s32.totalorder %s26_s18, 2  ;;  %p200_p2 = scmp.lt.s32.totalorder %s930_s17, 3 }
   0x5   : > { %s1192_s18 = smov (%p28_p1, %s26_s18), 0  ;;  %p201_p3 = pnand %p813_p0, %p200_p2 }
   0x6   : > { %p244_p4 = scmp.lt.s32.totalorder (!%p201_p3), %s922_s15, 1  ;;  %v279_v0 = vld [vmem:[%s1186_s2] sm:$0xff] (!%p201_p3)  ;;  %vm293_vm0 = vcmask (!%p201_p3), 80896   ;;  %v932_v1 = vmov (!%p201_p3), 0.0   ;;  %v933_v3 = vmov (!%p201_p3), 0   ;;  %vm300_vm1 = vcmask (!%p201_p3), 1041408  }
   0x7   : > { %204 = sbr.rel (%p201_p3) target bundleno = 328 (0x148), region = 36  ;;  %374 = vmatprep.mubr.f32.mxu0 (!%p201_p3), %v932_v1  ;;  %840 = vmatprep.mubr.msk.f32.mxu1 (!%p201_p3), %vm293_vm0, %v279_v0  ;;  %v281_v2 = vld [vmem:[%s1187_s3] sm:$0xff] (!%p201_p3)  ;;  %v282_v4 = vld [vmem:[%s1187_s3 + $0x8] sm:$0x3] (!%p201_p3)  ;;  %vm934_vm2 = vmmov (!%p201_p3), 1   ;;  %vm702_vm5 = vcmask (!%p201_p3), 549888  }
   0x8   : > { %883 = vset.pattern.permute.xlu0 (!%p201_p3), %v933_v3  ;;  %vm844_vm3 = vmpackc.low (!%p201_p3), %vm300_vm1, %vm934_vm2  ;;  %v280_v14 = vld [vmem:[%s1186_s2 + $0x8] sm:$0x3] (!%p201_p3)  ;;  %vm698_vm9 = vcmask (!%p201_p3), 556032  }
   0x9   : > { %285 = vperm.xlu0 (!%p201_p3), %883, %v281_v2  }
   0xd   : > { %290 = vperm.xlu0 (!%p201_p3), %883, %v282_v4  }
   0xe   : > { %s1194_s15 = smov (!%p244_p4, %s922_s15), 1 }
   0xf   : > { %s985_s23 = smul.u32 48, %s1194_s15 }
  0x11   : > { %s261_s28 = scalar_lea.vmem %s1185_s1, %s985_s23  ;;  %s1004_s7 = scalar_lea.vmem %s1184_s0, %s985_s23 }
  0x12   : > { %v274_v5 = vld [vmem:[%s261_s28 + $0x8] sm:$0xff]  ;;  %v277_v6 = vld [vmem:[%s261_s28 + $0x20] sm:$0x3]  ;;  %v275_v7 = vld [vmem:[%s261_s28 + $0x10] sm:$0xff]  ;;  %s1156_s10 = scalar_lea.vmem %s1188_s4, %s985_s23 }
  0x13   : > { %v843_v8 = vpack.c.bf16 %v277_v6, %v274_v5  ;;  %v278_v9 = vld [vmem:[%s261_s28 + $0x28] sm:$0x3]  ;;  %v273_v10 = vld [vmem:[%s261_s28] sm:$0xff]  ;;  %v276_v11 = vld [vmem:[%s261_s28 + $0x18] sm:$0x3] }
  0x14   : > { %v849_v12 = vpack.c.bf16 %v278_v9, %v275_v7  ;;  %v846_v13 = vpack.c.bf16 %v276_v11, %v273_v10  ;;  %v462_v18 = vld [vmem:[%s1004_s7] sm:$0xff]  ;;  %v467_v21 = vld [vmem:[%s1004_s7 + $0x28] sm:$0x3]  ;;  %v464_v27 = vld [vmem:[%s1004_s7 + $0x10] sm:$0xff] }
  0x15   : > { %845 = vmatprep.subr.msk.bf16.mxu0 %vm844_vm3, %v843_v8  ;;  %v463_v23 = vld [vmem:[%s1004_s7 + $0x8] sm:$0xff]  ;;  %v465_v47 = vld [vmem:[%s1004_s7 + $0x18] sm:$0x3]  ;;  %v466_v54 = vld [vmem:[%s1004_s7 + $0x20] sm:$0x3] }
  0x16   : > { %851 = vmatprep.subr.msk.bf16.mxu1 %vm844_vm3, %v849_v12  ;;  %848 = vmatpush1.bf16.msk.msra.mxu0 %vm844_vm3, %v846_v13 }
  0x17   : > { %854 = vmatpush3.bf16.msk.msra.mxu1 %vm844_vm3, %v849_v12 }
  0x19   : > { %819 = vmatmul.mubr.msk.f32.vlgmr.msra.gmra.mrb[0].mxu0 %vm293_vm0, %v279_v0 }
  0x1a   : > { %841 = vmatmul.mubr.msk.f32.vlgmr.msra.gmra.mrb[0].mxu1 %vm293_vm0, %v280_v14  ;;  %380 = vmatprep.mubr.f32.mxu0 %v932_v1 }
  0x1d   : > { %820 = vmatmul.mubr.msk.f32.gmra.mrb[2].mxu0 %vm293_vm0, %v280_v14 }
  0x88   : > { %v286_v15 = vpop.permute.xlu0 %285 }
  0x8c   : > { %v291_v16 = vpop.permute.xlu0 %290 }
  0xec   : > { %v376_v17 = vpop.f32.mrb[0].mxu0 }
  0xed   : > { %v377_v19 = vadd.f32 %v376_v17, %v286_v15  ;;  %v842_v20 = vpop.f32.mrb[0].mxu1  ;;  %v378_v22 = vpop.f32.mrb[1].mxu0 }
  0xee   : > { %v459_v24 = vadd.f32 %v842_v20, %v291_v16  ;;  %v379_v25 = vadd.f32 %v378_v22, %v286_v15  ;;  %v453_v26 = vpop.f32.mrb[1].mxu1 }
  0xef   : > { %v1010_v28 = vadd.f32 %v462_v18, %v377_v19  ;;  %v454_v29 = vadd.f32 %v453_v26, %v286_v15 }
  0xf0   : > { %v1012_v30 = vadd.f32 %v467_v21, %v459_v24  ;;  %v1014_v31 = vadd.f32 %v463_v23, %v379_v25  ;;  %v382_v32 = vpop.f32.mrb[2].mxu0 }
  0xf1   : > { %v1017_v33 = vmul.f32 0.70710677, %v1010_v28  ;;  %v1019_v34 = vadd.f32 %v464_v27, %v454_v29  ;;  %v384_v35 = vpop.f32.mrb[3].mxu0  ;;  %v383_v44 = vadd.f32 %v382_v32, %v291_v16 }
  0xf2   : > { %v1022_v36 = vmul.f32 0.70710677, %v1012_v30  ;;  %v1025_v37 = vmul.f32 0.70710677, %v1014_v31  ;;  %v385_v55 = vadd.f32 %v384_v35, %v291_v16 }
  0xf3   : > { %v1028_v38 = vand.u32 2147483647, %v1017_v33  ;;  %v1031_v39 = vmul.f32 0.70710677, %v1019_v34  ;;  %v1047_v53 = vadd.f32 %v465_v47, %v383_v44  ;;  %vm660_vm4 = vcmp.ge.f32.partialorder %v1017_v33, 0.0 }
  0xf4   : > { %v1034_v40 = vand.u32 2147483647, %v1022_v36  ;;  %v1037_v41 = vand.u32 2147483647, %v1025_v37  ;;  %v1053_v57 = vadd.f32 %v466_v54, %v385_v55  ;;  %vm665_vm6 = vcmp.ge.f32.partialorder %v1022_v36, 0.0 }
  0xf5   : > { %v492_v42 = vmul.f32 0.5, %v1028_v38  ;;  %v1041_v43 = vand.u32 2147483647, %v1031_v39  ;;  %v1051_v56 = vmul.f32 0.70710677, %v1047_v53  ;;  %vm661_vm7 = vcmp.ge.f32.partialorder %v1025_v37, 0.0 }
  0xf6   : > { %v497_v45 = vmul.f32 0.5, %v1034_v40  ;;  %v493_v46 = vmul.f32 0.5, %v1037_v41  ;;  %v1059_v59 = vmul.f32 0.70710677, %v1053_v57  ;;  %v479_v36 = vmul.f32 0.5, %v1012_v30 }
  0xf7   : > { %v498_v48 = vadd.f32 1.0, %v492_v42  ;;  %v494_v49 = vmul.f32 0.5, %v1041_v43  ;;  %v1056_v58 = vand.u32 2147483647, %v1051_v56  ;;  %vm662_vm8 = vcmp.ge.f32.partialorder %v1031_v39, 0.0 }
  0xf8   : > { %v503_v50 = vadd.f32 1.0, %v497_v45  ;;  %v499_v51 = vadd.f32 1.0, %v493_v46  ;;  %v1063_v61 = vand.u32 2147483647, %v1059_v59  ;;  %vm663_vm10 = vcmp.ge.f32.partialorder %v1051_v56, 0.0 }
  0xf9   : > { %884 = vrcp.f32 %v498_v48  ;;  %v500_v52 = vadd.f32 1.0, %v494_v49  ;;  %v495_v60 = vmul.f32 0.5, %v1056_v58  ;;  %vm664_vm11 = vcmp.ge.f32.partialorder %v1059_v59, 0.0 }
  0xfa   : > { %886 = vrcp.f32 %v503_v50  ;;  %v496_v63 = vmul.f32 0.5, %v1063_v61 }
  0xfb   : > { %888 = vrcp.f32 %v499_v51  ;;  %v501_v62 = vadd.f32 1.0, %v495_v60 }
  0xfc   : > { %890 = vrcp.f32 %v500_v52  ;;  %v502_v3 = vadd.f32 1.0, %v496_v63 }
  0xfd   : > { %892 = vrcp.f32 %v501_v62 }
  0xfe   : > { %894 = vrcp.f32 %v502_v3 }
 0x103   : > { %v1066_v0 = vpop.eup %884 }
 0x104   : > { %v1068_v1 = vpop.eup %886  ;;  %v516_v2 = vmul.f32 0.17087276, %v1066_v0 }
 0x105   : > { %v1071_v4 = vpop.eup %888  ;;  %v521_v5 = vmul.f32 0.17087276, %v1068_v1 }
 0x106   : > { %v1074_v6 = vpop.eup %890  ;;  %v522_v7 = vadd.f32 -0.82215226, %v516_v2  ;;  %v517_v8 = vmul.f32 0.17087276, %v1071_v4 }
 0x107   : > { %v527_v9 = vadd.f32 -0.82215226, %v521_v5  ;;  %v518_v10 = vmul.f32 0.17087276, %v1074_v6  ;;  %v1083_v21 = vpop.eup %892 }
 0x108   : > { %v528_v11 = vmul.f32 %v1066_v0, %v522_v7  ;;  %v523_v12 = vadd.f32 -0.82215226, %v517_v8  ;;  %v519_v26 = vmul.f32 0.17087276, %v1083_v21  ;;  %v1089_v32 = vpop.eup %894 }
 0x109   : > { %v533_v13 = vmul.f32 %v1068_v1, %v527_v9  ;;  %v524_v14 = vadd.f32 -0.82215226, %v518_v10  ;;  %v520_v47 = vmul.f32 0.17087276, %v1089_v32 }
 0x10a   : > { %v534_v15 = vadd.f32 1.4885159, %v528_v11  ;;  %v529_v16 = vmul.f32 %v1071_v4, %v523_v12  ;;  %v525_v44 = vadd.f32 -0.82215226, %v519_v26 }
 0x10b   : > { %v539_v17 = vadd.f32 1.4885159, %v533_v13  ;;  %v530_v18 = vmul.f32 %v1074_v6, %v524_v14  ;;  %v526_v54 = vadd.f32 -0.82215226, %v520_v47 }
 0x10c   : > { %v540_v19 = vmul.f32 %v1066_v0, %v534_v15  ;;  %v535_v20 = vadd.f32 1.4885159, %v529_v16  ;;  %v531_v50 = vmul.f32 %v1083_v21, %v525_v44 }
 0x10d   : > { %v545_v22 = vmul.f32 %v1068_v1, %v539_v17  ;;  %v536_v23 = vadd.f32 1.4885159, %v530_v18  ;;  %v532_v3 = vmul.f32 %v1089_v32, %v526_v54 }
 0x10e   : > { %v546_v24 = vadd.f32 -1.135204, %v540_v19  ;;  %v541_v25 = vmul.f32 %v1071_v4, %v535_v20  ;;  %v537_v62 = vadd.f32 1.4885159, %v531_v50 }
 0x10f   : > { %v551_v27 = vadd.f32 -1.135204, %v545_v22  ;;  %v542_v29 = vmul.f32 %v1074_v6, %v536_v23  ;;  %v538_v11 = vadd.f32 1.4885159, %v532_v3 }
 0x110   : > { %v552_v35 = vmul.f32 %v1066_v0, %v546_v24  ;;  %v547_v42 = vadd.f32 -1.135204, %v541_v25  ;;  %v543_v8 = vmul.f32 %v1083_v21, %v537_v62 }
 0x111   : > { %v557_v45 = vmul.f32 %v1068_v1, %v551_v27  ;;  %v548_v46 = vadd.f32 -1.135204, %v542_v29  ;;  %v544_v17 = vmul.f32 %v1089_v32, %v538_v11 }
 0x112   : > { %v558_v48 = vadd.f32 0.27886808, %v552_v35  ;;  %v553_v49 = vmul.f32 %v1071_v4, %v547_v42  ;;  %v549_v14 = vadd.f32 -1.135204, %v543_v8 }
 0x113   : > { %v563_v51 = vadd.f32 0.27886808, %v557_v45  ;;  %v554_v52 = vmul.f32 %v1074_v6, %v548_v46  ;;  %v550_v24 = vadd.f32 -1.135204, %v544_v17 }
 0x114   : > { %v564_v55 = vmul.f32 %v1066_v0, %v558_v48  ;;  %v559_v60 = vadd.f32 0.27886808, %v553_v49  ;;  %v555_v20 = vmul.f32 %v1083_v21, %v549_v14 }
 0x115   : > { %v569_v63 = vmul.f32 %v1068_v1, %v563_v51  ;;  %v560_v2 = vadd.f32 0.27886808, %v554_v52  ;;  %v556_v42 = vmul.f32 %v1089_v32, %v550_v24 }
 0x116   : > { %v570_v5 = vadd.f32 -0.18628806, %v564_v55  ;;  %v565_v7 = vmul.f32 %v1071_v4, %v559_v60  ;;  %v561_v27 = vadd.f32 0.27886808, %v555_v20 }
 0x117   : > { %v575_v9 = vadd.f32 -0.18628806, %v569_v63  ;;  %v566_v10 = vmul.f32 %v1074_v6, %v560_v2  ;;  %v562_v49 = vadd.f32 0.27886808, %v556_v42  ;;  %v624_v63 = vsub.f32 0.0, %v1028_v38 }
 0x118   : > { %v576_v12 = vmul.f32 %v1066_v0, %v570_v5  ;;  %v571_v13 = vadd.f32 -0.18628806, %v565_v7  ;;  %v567_v46 = vmul.f32 %v1083_v21, %v561_v27  ;;  %v629_v7 = vsub.f32 0.0, %v1034_v40 }
 0x119   : > { %v581_v15 = vmul.f32 %v1068_v1, %v575_v9  ;;  %v572_v16 = vadd.f32 -0.18628806, %v566_v10  ;;  %v568_v60 = vmul.f32 %v1089_v32, %v562_v49 }
 0x11a   : > { %v582_v18 = vadd.f32 0.09678418, %v576_v12  ;;  %v577_v19 = vmul.f32 %v1071_v4, %v571_v13  ;;  %v573_v52 = vadd.f32 -0.18628806, %v567_v46  ;;  %v625_v12 = vsub.f32 0.0, %v1037_v41 }
 0x11b   : > { %v587_v22 = vadd.f32 0.09678418, %v581_v15  ;;  %v578_v23 = vmul.f32 %v1074_v6, %v572_v16  ;;  %v574_v9 = vadd.f32 -0.18628806, %v568_v60  ;;  %v626_v16 = vsub.f32 0.0, %v1041_v43 }
 0x11c   : > { %v588_v25 = vmul.f32 %v1066_v0, %v582_v18  ;;  %v583_v26 = vadd.f32 0.09678418, %v577_v19  ;;  %v579_v3 = vmul.f32 %v1083_v21, %v573_v52  ;;  %v630_v19 = vmul.f32 %v624_v63, %v1028_v38 }
 0x11d   : > { %v593_v29 = vmul.f32 %v1068_v1, %v587_v22  ;;  %v584_v35 = vadd.f32 0.09678418, %v578_v23  ;;  %v580_v17 = vmul.f32 %v1089_v32, %v574_v9  ;;  %v635_v24 = vmul.f32 %v629_v7, %v1034_v40 }
 0x11e   : > { %v594_v44 = vadd.f32 0.37409195, %v588_v25  ;;  %v589_v45 = vmul.f32 %v1071_v4, %v583_v26  ;;  %v585_v13 = vadd.f32 0.09678418, %v579_v3  ;;  %v632_v46 = vmul.f32 %v626_v16, %v1041_v43 }
 0x11f   : > { %v599_v47 = vadd.f32 0.37409195, %v593_v29  ;;  %v590_v48 = vmul.f32 %v1074_v6, %v584_v35  ;;  %v586_v26 = vadd.f32 0.09678418, %v580_v17  ;;  %v631_v35 = vmul.f32 %v625_v12, %v1037_v41 }
 0x120   : > { %v600_v50 = vmul.f32 %v1066_v0, %v594_v44  ;;  %v595_v51 = vadd.f32 0.37409195, %v589_v45  ;;  %v591_v22 = vmul.f32 %v1083_v21, %v585_v13  ;;  %v628_v63 = vsub.f32 0.0, %v1063_v61 }
 0x121   : > { %v605_v54 = vmul.f32 %v1068_v1, %v599_v47  ;;  %v596_v55 = vadd.f32 0.37409195, %v590_v48  ;;  %v592_v38 = vmul.f32 %v1089_v32, %v586_v26  ;;  %v474_v17 = vmul.f32 0.5, %v1010_v28 }
 0x122   : > { %v606_v62 = vadd.f32 1.0000237, %v600_v50  ;;  %v601_v2 = vmul.f32 %v1071_v4, %v595_v51  ;;  %v597_v42 = vadd.f32 0.37409195, %v591_v22  ;;  %v634_v9 = vmul.f32 %v628_v63, %v1063_v61 }
 0x123   : > { %v611_v5 = vadd.f32 1.0000237, %v605_v54  ;;  %v602_v8 = vmul.f32 %v1074_v6, %v596_v55  ;;  %v598_v51 = vadd.f32 0.37409195, %v592_v38  ;;  %v627_v55 = vsub.f32 0.0, %v1056_v58 }
 0x124   : > { %v612_v10 = vmul.f32 %v1066_v0, %v606_v62  ;;  %v607_v11 = vadd.f32 1.0000237, %v601_v2  ;;  %v603_v49 = vmul.f32 %v1083_v21, %v597_v42 }
 0x125   : > { %v617_v14 = vmul.f32 %v1068_v1, %v611_v5  ;;  %v608_v15 = vadd.f32 1.0000237, %v602_v8  ;;  %v604_v60 = vmul.f32 %v1089_v32, %v598_v51  ;;  %v633_v3 = vmul.f32 %v627_v55, %v1056_v58 }
 0x126   : > { %v618_v18 = vadd.f32 -1.2655122, %v612_v10  ;;  %v613_v20 = vmul.f32 %v1071_v4, %v607_v11  ;;  %v609_v54 = vadd.f32 1.0000237, %v603_v49 }
 0x127   : > { %v623_v23 = vadd.f32 -1.2655122, %v617_v14  ;;  %v614_v25 = vmul.f32 %v1074_v6, %v608_v15  ;;  %v610_v62 = vadd.f32 1.0000237, %v604_v60 }
 0x128   : > { %v636_v27 = vadd.f32 %v630_v19, %v618_v18  ;;  %v619_v29 = vadd.f32 -1.2655122, %v613_v20  ;;  %v615_v43 = vmul.f32 %v1083_v21, %v609_v54 }
 0x129   : > { %v641_v44 = vadd.f32 %v635_v24, %v623_v23  ;;  %v620_v45 = vadd.f32 -1.2655122, %v614_v25  ;;  %v616_v5 = vmul.f32 %v1089_v32, %v610_v62 }
 0x12a   : > { %v642_v47 = vmul.f32 1.442695, %v636_v27  ;;  %v637_v48 = vadd.f32 %v631_v35, %v619_v29  ;;  %v621_v2 = vadd.f32 -1.2655122, %v615_v43  ;;  %v475_v29 = vmul.f32 0.5, %v1014_v31 }
 0x12b   : > { %v652_v50 = vmul.f32 1.442695, %v641_v44  ;;  %v638_v40 = vadd.f32 %v632_v46, %v620_v45  ;;  %v622_v8 = vadd.f32 -1.2655122, %v616_v5  ;;  %v476_v45 = vmul.f32 0.5, %v1019_v34 }
 0x12c   : > { %896 = vpow2.f32 %v642_v47  ;;  %v644_v52 = vmul.f32 1.442695, %v637_v48  ;;  %v639_v7 = vadd.f32 %v633_v3, %v621_v2 }
 0x12d   : > { %898 = vpow2.f32 %v652_v50  ;;  %v646_v41 = vmul.f32 1.442695, %v638_v40  ;;  %v640_v11 = vadd.f32 %v634_v9, %v622_v8  ;;  %v477_v40 = vmul.f32 0.5, %v1047_v53 }
 0x12e   : > { %900 = vpow2.f32 %v644_v52  ;;  %v648_v10 = vmul.f32 1.442695, %v639_v7 }
 0x12f   : > { %902 = vpow2.f32 %v646_v41  ;;  %v650_v15 = vmul.f32 1.442695, %v640_v11  ;;  %v478_v41 = vmul.f32 0.5, %v1053_v57 }
 0x130   : > { %904 = vpow2.f32 %v648_v10 }
 0x131   : > { %906 = vpow2.f32 %v650_v15 }
 0x136   : > { %v897_v12 = vpop.eup %896 }
 0x137   : > { %v899_v13 = vpop.eup %898  ;;  %v654_v14 = vmul.f32 %v897_v12, %v1066_v0 }
 0x138   : > { %v901_v16 = vpop.eup %900  ;;  %v659_v58 = vmul.f32 %v899_v13, %v1068_v1 }
 0x139   : > { %v903_v18 = vpop.eup %902  ;;  %v666_v19 = vsub.f32 1.0, %v654_v14  ;;  %v824_v61 = vadd.f32 -1.0, %v654_v14  ;;  %v655_v20 = vmul.f32 %v901_v16, %v1071_v4 }
 0x13a   : > { %v671_v22 = vsub.f32 1.0, %v659_v58  ;;  %v829_v0 = vadd.f32 -1.0, %v659_v58  ;;  %v656_v23 = vmul.f32 %v903_v18, %v1074_v6  ;;  %v905_v38 = vpop.eup %904 }
 0x13b   : > { %v678_v24 = vsel %vm660_vm4, %v666_v19, %v824_v61  ;;  %v667_v28 = vsub.f32 1.0, %v655_v20  ;;  %v825_v33 = vadd.f32 -1.0, %v655_v20  ;;  %v657_v48 = vmul.f32 %v905_v38, %v1083_v21  ;;  %v907_v39 = vpop.eup %906 }
 0x13c   : > { %v684_v1 = vadd.f32 1.0, %v678_v24  ;;  %v683_v25 = vsel %vm665_vm6, %v671_v22, %v829_v0  ;;  %v668_v26 = vsub.f32 1.0, %v656_v23  ;;  %v826_v27 = vadd.f32 -1.0, %v656_v23 }
 0x13d   : > { %v689_v4 = vadd.f32 1.0, %v683_v25  ;;  %v679_v6 = vsel %vm661_vm7, %v667_v28, %v825_v33  ;;  %v669_v31 = vsub.f32 1.0, %v657_v48  ;;  %v827_v49 = vadd.f32 -1.0, %v657_v48 }
 0x13e   : > { %v690_v37 = vmul.f32 %v684_v1, %v474_v17  ;;  %v685_v35 = vadd.f32 1.0, %v679_v6  ;;  %v680_v42 = vsel %vm662_vm8, %v668_v26, %v826_v27  ;;  %v658_v34 = vmul.f32 %v907_v39, %v1089_v32 }
 0x13f   : > { %v695_v44 = vmul.f32 %v689_v4, %v479_v36  ;;  %v686_v46 = vadd.f32 1.0, %v680_v42  ;;  %v681_v50 = vsel %vm663_vm10, %v669_v31, %v827_v49 }
 0x140   : > { %696 = vst [vmem:[%s1156_s10] sm:$0xff] %v690_v37  ;;  %v691_v47 = vmul.f32 %v685_v35, %v475_v29  ;;  %v687_v51 = vadd.f32 1.0, %v681_v50  ;;  %v670_v52 = vsub.f32 1.0, %v658_v34  ;;  %v828_v54 = vadd.f32 -1.0, %v658_v34 }
 0x141   : > { %703 = vst.msk [vmem:[%s1156_s10 + $0x28] sm:$0x3] %vm702_vm5, %v695_v44  ;;  %v692_v30 = vmul.f32 %v686_v46, %v476_v45 }
 0x142   : > { %697 = vst [vmem:[%s1156_s10 + $0x8] sm:$0xff] %v691_v47  ;;  %v693_v21 = vmul.f32 %v687_v51, %v477_v40  ;;  %v682_v55 = vsel %vm664_vm11, %v670_v52, %v828_v54 }
 0x143   : > { %699 = vst.msk [vmem:[%s1156_s10 + $0x10] sm:$0xff] %vm698_vm9, %v692_v30  ;;  %v688_v60 = vadd.f32 1.0, %v682_v55 }
 0x144   : > { %700 = vst [vmem:[%s1156_s10 + $0x18] sm:$0x3] %v693_v21 }
 0x145   : > { %v694_v43 = vmul.f32 %v688_v60, %v478_v41 }
 0x147   : > { %701 = vst [vmem:[%s1156_s10 + $0x20] sm:$0x3] %v694_v43 }
 0x148 PF: > { %s14_s17 = sadd.s32 1, %s930_s17   ;;  %s1189_s15 = smov %s926_s16 }
 0x149   : > { %p11_p5 = scmp.ge.s32.totalorder %s14_s17, 4   ;;  %s1190_s16 = smov %s1192_s18 }
 0x14b   :  { %13 = sbr.rel (!%p11_p5) target bundleno = 2 (0x2), region = 69 }

// kernel: _lambda_.18
= control target key start
LH: loop header
LB: loop body
LE: loop exit
PB: predicated region body
PF: predicated region fallthrough
CT: control target
= control target key end

     0   :  { %s708_s15 = smov 0   ;;  %s710_s16 = smov 0   ;;  %s765_s0 = inlined_call_operand.vmem [shape: f32[2,10,324], index: 0, kind: input, shape index: {}]   ;;  %s766_s1 = inlined_call_operand.vmem [shape: f32[2,10,324], index: 1, kind: input, shape index: {}]   ;;  %s767_s2 = inlined_call_operand.vmem [shape: f32[10,10], index: 2, kind: input, shape index: {}]   ;;  %s768_s3 = inlined_call_operand.vmem [shape: f32[10,1], index: 3, kind: input, shape index: {}]   ;;  %s769_s4 = inlined_call_operand.vmem [shape: f32[2,10,324], index: 4, kind: output, shape index: {}]  }
   0x1   :  { %s712_s17 = smov 0  }
   0x2 LB: > { %s26_s18 = sadd.s32 1, %s674_s16  ;;  %p591_p0 = scmp.ge.s32.totalorder %s678_s17, 1  ;;  %s678_s17 = sphi %s712_s17, %s14_s17   ;;  %s674_s16 = sphi %s710_s16, %s771_s16   ;;  %s670_s15 = sphi %s708_s15, %s770_s15  }
   0x3   : > { %p28_p1 = scmp.ge.s32.totalorder %s26_s18, 2  ;;  %p200_p2 = scmp.lt.s32.totalorder %s678_s17, 3 }
   0x5   : > { %s773_s18 = smov (%p28_p1, %s26_s18), 0  ;;  %p201_p3 = pnand %p591_p0, %p200_p2 }
   0x6   : > { %p244_p4 = scmp.lt.s32.totalorder (!%p201_p3), %s670_s15, 1  ;;  %v279_v0 = vld [vmem:[%s767_s2] sm:$0xff] (!%p201_p3)  ;;  %vm293_vm0 = vcmask (!%p201_p3), 80896   ;;  %v680_v1 = vmov (!%p201_p3), 0.0   ;;  %v681_v3 = vmov (!%p201_p3), 0   ;;  %vm300_vm1 = vcmask (!%p201_p3), 1041408  }
   0x7   : > { %204 = sbr.rel (%p201_p3) target bundleno = 247 (0xf7), region = 36  ;;  %374 = vmatprep.mubr.f32.mxu0 (!%p201_p3), %v680_v1  ;;  %612 = vmatprep.mubr.msk.f32.mxu1 (!%p201_p3), %vm293_vm0, %v279_v0  ;;  %v281_v2 = vld [vmem:[%s768_s3] sm:$0xff] (!%p201_p3)  ;;  %v282_v4 = vld [vmem:[%s768_s3 + $0x8] sm:$0x3] (!%p201_p3)  ;;  %vm682_vm2 = vmmov (!%p201_p3), 1   ;;  %vm480_vm4 = vcmask (!%p201_p3), 549888  }
   0x8   : > { %655 = vset.pattern.permute.xlu0 (!%p201_p3), %v681_v3  ;;  %vm616_vm3 = vmpackc.low (!%p201_p3), %vm300_vm1, %vm682_vm2  ;;  %v280_v14 = vld [vmem:[%s767_s2 + $0x8] sm:$0x3] (!%p201_p3)  ;;  %vm476_vm5 = vcmask (!%p201_p3), 556032  }
   0x9   : > { %285 = vperm.xlu0 (!%p201_p3), %655, %v281_v2  }
   0xd   : > { %290 = vperm.xlu0 (!%p201_p3), %655, %v282_v4  }
   0xe   : > { %s775_s15 = smov (!%p244_p4, %s670_s15), 1 }
   0xf   : > { %s733_s23 = smul.u32 48, %s775_s15 }
  0x11   : > { %s261_s28 = scalar_lea.vmem %s766_s1, %s733_s23  ;;  %s251_s7 = scalar_lea.vmem %s765_s0, %s733_s23 }
  0x12   : > { %v274_v5 = vld [vmem:[%s261_s28 + $0x8] sm:$0xff]  ;;  %v277_v6 = vld [vmem:[%s261_s28 + $0x20] sm:$0x3]  ;;  %v275_v7 = vld [vmem:[%s261_s28 + $0x10] sm:$0xff]  ;;  %s271_s10 = scalar_lea.vmem %s769_s4, %s733_s23 }
  0x13   : > { %v615_v8 = vpack.c.bf16 %v277_v6, %v274_v5  ;;  %v278_v9 = vld [vmem:[%s261_s28 + $0x28] sm:$0x3]  ;;  %v273_v10 = vld [vmem:[%s261_s28] sm:$0xff]  ;;  %v276_v11 = vld [vmem:[%s261_s28 + $0x18] sm:$0x3] }
  0x14   : > { %v621_v12 = vpack.c.bf16 %v278_v9, %v275_v7  ;;  %v618_v13 = vpack.c.bf16 %v276_v11, %v273_v10  ;;  %v462_v18 = vld [vmem:[%s251_s7] sm:$0xff]  ;;  %v467_v21 = vld [vmem:[%s251_s7 + $0x28] sm:$0x3]  ;;  %v464_v27 = vld [vmem:[%s251_s7 + $0x10] sm:$0xff] }
  0x15   : > { %617 = vmatprep.subr.msk.bf16.mxu0 %vm616_vm3, %v615_v8  ;;  %v463_v23 = vld [vmem:[%s251_s7 + $0x8] sm:$0xff]  ;;  %v465_v33 = vld [vmem:[%s251_s7 + $0x18] sm:$0x3]  ;;  %v466_v37 = vld [vmem:[%s251_s7 + $0x20] sm:$0x3] }
  0x16   : > { %623 = vmatprep.subr.msk.bf16.mxu1 %vm616_vm3, %v621_v12  ;;  %620 = vmatpush1.bf16.msk.msra.mxu0 %vm616_vm3, %v618_v13 }
  0x17   : > { %626 = vmatpush3.bf16.msk.msra.mxu1 %vm616_vm3, %v621_v12 }
  0x19   : > { %597 = vmatmul.mubr.msk.f32.vlgmr.msra.gmra.mrb[0].mxu0 %vm293_vm0, %v279_v0 }
  0x1a   : > { %613 = vmatmul.mubr.msk.f32.vlgmr.msra.gmra.mrb[0].mxu1 %vm293_vm0, %v280_v14  ;;  %380 = vmatprep.mubr.f32.mxu0 %v680_v1 }
  0x1d   : > { %598 = vmatmul.mubr.msk.f32.gmra.mrb[2].mxu0 %vm293_vm0, %v280_v14 }
  0x88   : > { %v286_v15 = vpop.permute.xlu0 %285 }
  0x8c   : > { %v291_v16 = vpop.permute.xlu0 %290 }
  0xec   : > { %v376_v17 = vpop.f32.mrb[0].mxu0 }
  0xed   : > { %v377_v19 = vadd.f32 %v376_v17, %v286_v15  ;;  %v614_v20 = vpop.f32.mrb[0].mxu1  ;;  %v378_v22 = vpop.f32.mrb[1].mxu0 }
  0xee   : > { %v459_v24 = vadd.f32 %v614_v20, %v291_v16  ;;  %v379_v25 = vadd.f32 %v378_v22, %v286_v15  ;;  %v453_v26 = vpop.f32.mrb[1].mxu1 }
  0xef   : > { %v468_v28 = vadd.f32 %v462_v18, %v377_v19  ;;  %v454_v29 = vadd.f32 %v453_v26, %v286_v15 }
  0xf0   : > { %v473_v30 = vadd.f32 %v467_v21, %v459_v24  ;;  %v469_v31 = vadd.f32 %v463_v23, %v379_v25  ;;  %v382_v32 = vpop.f32.mrb[2].mxu0 }
  0xf1   : > { %474 = vst [vmem:[%s271_s10] sm:$0xff] %v468_v28  ;;  %v470_v34 = vadd.f32 %v464_v27, %v454_v29  ;;  %v383_v35 = vadd.f32 %v382_v32, %v291_v16  ;;  %v384_v36 = vpop.f32.mrb[3].mxu0 }
  0xf2   : > { %481 = vst.msk [vmem:[%s271_s10 + $0x28] sm:$0x3] %vm480_vm4, %v473_v30  ;;  %475 = vst [vmem:[%s271_s10 + $0x8] sm:$0xff] %v469_v31  ;;  %v385_v38 = vadd.f32 %v384_v36, %v291_v16 }
  0xf3   : > { %477 = vst.msk [vmem:[%s271_s10 + $0x10] sm:$0xff] %vm476_vm5, %v470_v34  ;;  %v471_v39 = vadd.f32 %v465_v33, %v383_v35 }
  0xf4   : > { %v472_v40 = vadd.f32 %v466_v37, %v385_v38 }
  0xf5   : > { %478 = vst [vmem:[%s271_s10 + $0x18] sm:$0x3] %v471_v39 }
  0xf6   : > { %479 = vst [vmem:[%s271_s10 + $0x20] sm:$0x3] %v472_v40 }
  0xf7 PF: > { %s14_s17 = sadd.s32 1, %s678_s17   ;;  %s770_s15 = smov %s674_s16 }
  0xf8   : > { %p11_p5 = scmp.ge.s32.totalorder %s14_s17, 4   ;;  %s771_s16 = smov %s773_s18 }
  0xfa   :  { %13 = sbr.rel (!%p11_p5) target bundleno = 2 (0x2), region = 69 }

// kernel: _lambda_.19
= control target key start
LH: loop header
LB: loop body
LE: loop exit
PB: predicated region body
PF: predicated region fallthrough
CT: control target
= control target key end

     0   :  { %s1439_s18 = smov 0   ;;  %s1441_s19 = smov 0   ;;  %s1871_s0 = inlined_call_operand.vmem [shape: f32[2,10,324], index: 0, kind: input, shape index: {}]   ;;  %s1872_s1 = inlined_call_operand.vmem [shape: f32[32,10], index: 1, kind: input, shape index: {}]   ;;  %s1873_s2 = inlined_call_operand.vmem [shape: f32[32,1], index: 2, kind: input, shape index: {}]   ;;  %s1874_s3 = inlined_call_operand.vmem [shape: f32[2,32], index: 3, kind: input, shape index: {}]   ;;  %s1875_s4 = inlined_call_operand.vmem [shape: f32[2,1], index: 4, kind: input, shape index: {}]   ;;  %s1876_s5 = inlined_call_operand.vmem [shape: f32[2,2,324], index: 5, kind: output, shape index: {}]  }
   0x1   :  { %s1443_s20 = smov 0  }
   0x2 LB: > { %s27_s21 = sadd.s32 1, %s1397_s19  ;;  %p1207_p0 = scmp.ge.s32.totalorder %s1401_s20, 1  ;;  %s1401_s20 = sphi %s1443_s20, %s15_s20   ;;  %s1397_s19 = sphi %s1441_s19, %s1893_s19   ;;  %s1393_s18 = sphi %s1439_s18, %s1892_s18  }
   0x3   : > { %p29_p1 = scmp.ge.s32.totalorder %s27_s21, 2  ;;  %p208_p2 = scmp.lt.s32.totalorder %s1401_s20, 3 }
   0x5   : > { %s1895_s21 = smov (%p29_p1, %s27_s21), 0  ;;  %p209_p3 = pnand %p1207_p0, %p208_p2 }
   0x7   : > { %212 = sbr.rel (%p209_p3) target bundleno = 625 (0x271), region = 40 }
   0xe   : > { %p245_p4 = scmp.lt.s32.totalorder %s1393_s18, 1  ;;  %v1877_v0 = vmov 0.0   ;;  %v274_v1 = vld [vmem:[%s1873_s2] sm:$0xff]  ;;  %vm311_vm0 = vcmask 1041408   ;;  %v1404_v2 = vmov 0   ;;  %v276_v3 = vld [vmem:[%s1873_s2 + $0x10] sm:$0xff] }
   0xf   : > { %385 = vmatprep.mubr.f32.mxu0 %v1877_v0  ;;  %403 = vmatprep.mubr.f32.mxu1 %v1877_v0  ;;  %v275_v4 = vld [vmem:[%s1873_s2 + $0x8] sm:$0xff]  ;;  %v277_v5 = vld [vmem:[%s1873_s2 + $0x18] sm:$0xff]  ;;  %vm1405_vm1 = vmmov 1   ;;  %v940_v16 = vld [vmem:[%s1875_s4] sm:$0x3]  ;;  %vm298_vm3 = vcmask 80896  }
  0x10   : > { %s1897_s18 = smov (!%p245_p4, %s1393_s18), 1  ;;  %1329 = vset.pattern.permute.xlu0 %v1404_v2  ;;  %1330 = vset.pattern.permute.xlu1 %v1404_v2  ;;  %vm1478_vm2 = vmpackc.low %vm311_vm0, %vm1405_vm1  ;;  %v270_v17 = vld [vmem:[%s1872_s1] sm:$0xff]  ;;  %v273_v18 = vld [vmem:[%s1872_s1 + $0x18] sm:$0xff]  ;;  %vm1407_vm12 = vmmov 0   ;;  %vm946_vm1 = vcmask 261120  }
  0x11   : > { %s1297_s26 = smul.u32 48, %s1897_s18  ;;  %280 = vperm.xlu0 %1329, %v274_v1   ;;  %290 = vperm.xlu1 %1330, %v276_v3   ;;  %v271_v19 = vld [vmem:[%s1872_s1 + $0x8] sm:$0xff]  ;;  %v272_v20 = vld [vmem:[%s1872_s1 + $0x10] sm:$0xff] }
  0x12   : > { %s1298_s25 = smul.u32 6, %s1897_s18 }
  0x13   : > { %s252_s8 = scalar_lea.vmem %s1871_s0, %s1297_s26 }
  0x14   : > { %v265_v7 = vld [vmem:[%s252_s8 + $0x8] sm:$0xff]  ;;  %v268_v8 = vld [vmem:[%s252_s8 + $0x20] sm:$0x3]  ;;  %v267_v11 = vld [vmem:[%s252_s8 + $0x18] sm:$0x3]  ;;  %s262_s28 = scalar_lea.vmem %s1876_s5, %s1298_s25 }
  0x15   : > { %v264_v9 = vld [vmem:[%s252_s8] sm:$0xff]  ;;  %v1269_v10 = vpack.c.bf16 %v268_v8, %v265_v7  ;;  %v266_v12 = vld [vmem:[%s252_s8 + $0x10] sm:$0xff]  ;;  %v269_v13 = vld [vmem:[%s252_s8 + $0x28] sm:$0x3]  ;;  %285 = vperm.xlu0 %1329, %v275_v4   ;;  %295 = vperm.xlu1 %1330, %v277_v5  }
  0x16   : > { %v1272_v14 = vpack.c.bf16 %v267_v11, %v264_v9  ;;  %v1275_v15 = vpack.c.bf16 %v269_v13, %v266_v12 }
  0x17   : > { %1271 = vmatprep.subr.msk.bf16.mxu0 %vm1478_vm2, %v1269_v10  ;;  %1295 = vmatprep.subr.msk.bf16.mxu1 %vm1478_vm2, %v1269_v10 }
  0x18   : > { %1274 = vmatpush1.bf16.msk.msra.mxu0 %vm1478_vm2, %v1272_v14  ;;  %1296 = vmatpush1.bf16.msk.msra.mxu1 %vm1478_vm2, %v1272_v14 }
  0x19   : > { %1277 = vmatprep.subr.msk.bf16.mxu1 %vm1478_vm2, %v1275_v15  ;;  %943 = vperm.xlu0 %1329, %v940_v16  }
  0x1b   : > { %1212 = vmatmul.mubr.msk.f32.vlgmr.msra.gmra.mrb[0].mxu0 %vm298_vm3, %v270_v17  ;;  %1215 = vmatmul.mubr.msk.f32.vlgmr.msra.gmra.mrb[0].mxu1 %vm298_vm3, %v273_v18 }
  0x1c   : > { %1280 = vmatpush3.bf16.msk.msra.mxu1 %vm1478_vm2, %v1275_v15  ;;  %391 = vmatprep.mubr.f32.mxu0 %v1877_v0 }
  0x1d   : > { %1252 = vmatprep.mubr.msk.f32.mxu1 %vm298_vm3, %v270_v17 }
  0x1f   : > { %1213 = vmatmul.mubr.msk.f32.gmra.mrb[2].mxu0 %vm298_vm3, %v271_v19  ;;  %1253 = vmatmul.mubr.msk.f32.vlgmr.msra.gmra.mrb[2].mxu1 %vm298_vm3, %v271_v19 }
  0x20   : > { %397 = vmatprep.mubr.f32.mxu0 %v1877_v0  ;;  %1255 = vmatprep.mubr.msk.f32.mxu1 %vm298_vm3, %v272_v20 }
  0x23   : > { %1214 = vmatmul.mubr.msk.f32.gmra.mrb[4].mxu0 %vm298_vm3, %v272_v20  ;;  %1256 = vmatmul.mubr.msk.f32.gmra.mrb[4].mxu1 %vm298_vm3, %v273_v18  ;;  %vm1111_vm3 = vcmask 1043458  }
  0x24   : > { %1014 = vmatprep.mubr.f32.mxu1 %v1877_v0 }
  0x90   : > { %v1520_v21 = vpop.permute.xlu1 %290  ;;  %v281_v23 = vpop.permute.xlu0 %280 }
  0x94   : > { %v1522_v22 = vpop.permute.xlu1 %295  ;;  %v286_v38 = vpop.permute.xlu0 %285 }
  0xee   : > { %v387_v24 = vpop.f32.mrb[0].mxu0  ;;  %v405_v25 = vpop.f32.mrb[0].mxu1 }
  0xef   : > { %v388_v26 = vadd.f32 %v387_v24, %v281_v23  ;;  %v406_v27 = vadd.f32 %v405_v25, %v1522_v22  ;;  %v389_v28 = vpop.f32.mrb[1].mxu0  ;;  %v407_v29 = vpop.f32.mrb[1].mxu1 }
  0xf0   : > { %v390_v30 = vadd.f32 %v389_v28, %v281_v23  ;;  %v408_v31 = vadd.f32 %v407_v29, %v1522_v22 }
  0xf1   : > { %v1526_v32 = vmul.f32 0.70710677, %v388_v26  ;;  %v1528_v33 = vmul.f32 0.70710677, %v406_v27  ;;  %v1553_v1 = vmul.f32 0.5, %v388_v26  ;;  %v1555_v2 = vmul.f32 0.5, %v406_v27 }
  0xf2   : > { %v1530_v34 = vmul.f32 0.70710677, %v390_v30  ;;  %v1532_v35 = vmul.f32 0.70710677, %v408_v31  ;;  %v393_v43 = vpop.f32.mrb[2].mxu0  ;;  %v1254_v44 = vpop.f32.mrb[2].mxu1 }
  0xf3   : > { %v519_v36 = vand.u32 2147483647, %v1526_v32  ;;  %v528_v37 = vand.u32 2147483647, %v1528_v33  ;;  %v395_v47 = vpop.f32.mrb[3].mxu0  ;;  %v476_v48 = vpop.f32.mrb[3].mxu1  ;;  %v394_v57 = vadd.f32 %v393_v43, %v286_v38  ;;  %v482_v58 = vadd.f32 %v1254_v44, %v286_v38 }
  0xf4   : > { %v520_v39 = vand.u32 2147483647, %v1530_v34  ;;  %v529_v40 = vand.u32 2147483647, %v1532_v35  ;;  %v1542_v59 = vadd.f32 %v395_v47, %v286_v38  ;;  %v1544_v60 = vadd.f32 %v476_v48, %v281_v23 }
  0xf5   : > { %v531_v41 = vmul.f32 0.5, %v519_v36  ;;  %v540_v42 = vmul.f32 0.5, %v528_v37  ;;  %v1546_v61 = vmul.f32 0.70710677, %v394_v57  ;;  %v1548_v62 = vmul.f32 0.70710677, %v482_v58 }
  0xf6   : > { %v532_v45 = vmul.f32 0.5, %v520_v39  ;;  %v541_v46 = vmul.f32 0.5, %v529_v40  ;;  %v399_v51 = vpop.f32.mrb[4].mxu0  ;;  %v1257_v52 = vpop.f32.mrb[4].mxu1  ;;  %v1551_v63 = vmul.f32 0.70710677, %v1542_v59 }
  0xf7   : > { %v543_v49 = vadd.f32 1.0, %v531_v41  ;;  %v552_v50 = vadd.f32 1.0, %v540_v42  ;;  %v1538_v55 = vpop.f32.mrb[5].mxu0  ;;  %v1540_v56 = vpop.f32.mrb[5].mxu1  ;;  %v522_v3 = vand.u32 2147483647, %v1546_v61  ;;  %v1572_v16 = vadd.f32 %v399_v51, %v1520_v21 }
  0xf8   : > { %v544_v53 = vadd.f32 1.0, %v532_v45  ;;  %v553_v54 = vadd.f32 1.0, %v541_v46  ;;  %v1559_v4 = vmul.f32 0.70710677, %v1544_v60  ;;  %v795_v5 = vsub.f32 0.0, %v519_v36 }
  0xf9   : > { %1331 = vrcp.f32 %v543_v49  ;;  %v804_v6 = vsub.f32 0.0, %v528_v37  ;;  %v524_v7 = vand.u32 2147483647, %v1548_v62  ;;  %v1563_v8 = vand.u32 2147483647, %v1551_v63 }
  0xfa   : > { %1333 = vrcp.f32 %v552_v50  ;;  %v796_v9 = vsub.f32 0.0, %v520_v39  ;;  %v805_v10 = vsub.f32 0.0, %v529_v40  ;;  %v534_v11 = vmul.f32 0.5, %v522_v3 }
  0xfb   : > { %1335 = vrcp.f32 %v544_v53  ;;  %v1566_v12 = vand.u32 2147483647, %v1559_v4  ;;  %v1568_v13 = vmul.f32 0.5, %v390_v30  ;;  %v536_v14 = vmul.f32 0.5, %v524_v7 }
  0xfc   : > { %1337 = vrcp.f32 %v553_v54  ;;  %v535_v15 = vmul.f32 0.5, %v1563_v8  ;;  %v1574_v17 = vmul.f32 0.5, %v408_v31  ;;  %v546_v18 = vadd.f32 1.0, %v534_v11 }
  0xfd   : > { %v533_v19 = vmul.f32 0.5, %v1566_v12  ;;  %v1578_v20 = vadd.f32 %v1257_v52, %v1522_v22  ;;  %v1580_v23 = vmul.f32 %v795_v5, %v519_v36  ;;  %v1582_v24 = vmul.f32 %v804_v6, %v528_v37 }
  0xfe   : > { %v548_v25 = vadd.f32 1.0, %v536_v14  ;;  %v547_v26 = vadd.f32 1.0, %v535_v15  ;;  %v1586_v28 = vmul.f32 %v796_v9, %v520_v39  ;;  %v1588_v29 = vmul.f32 %v805_v10, %v529_v40 }
  0xff   : > { %1883 = vst [vmem:[#allocation2_spill] sm:$0xff] %v1578_v20  ;;  %1339 = vrcp.f32 %v546_v18  ;;  %v545_v30 = vadd.f32 1.0, %v533_v19  ;;  %v1593_v22 = vmul.f32 0.5, %v394_v57  ;;  %v1596_v36 = vmul.f32 0.70710677, %v1572_v16 }
 0x100   : > { %1341 = vrcp.f32 %v548_v25  ;;  %v798_v39 = vsub.f32 0.0, %v522_v3  ;;  %v1602_v40 = vmul.f32 0.70710677, %v1578_v20  ;;  %v1611_v48 = vmul.f32 0.5, %v482_v58 }
 0x101   : > { %1343 = vrcp.f32 %v547_v26  ;;  %v1608_v45 = vand.u32 2147483647, %v1596_v36  ;;  %v800_v49 = vsub.f32 0.0, %v524_v7  ;;  %v1617_v53 = vadd.f32 %v1538_v55, %v1520_v21 }
 0x102   : > { %1345 = vrcp.f32 %v545_v30  ;;  %v1622_v6 = vand.u32 2147483647, %v1602_v40  ;;  %v1625_v10 = vmul.f32 %v798_v39, %v522_v3  ;;  %vm867_vm4 = vcmp.ge.f32.partialorder %v1526_v32, 0.0 }
 0x103   : > { %v1584_v27 = vpop.eup %1331  ;;  %v537_v52 = vmul.f32 0.5, %v1608_v45  ;;  %1884 = vst [vmem:[#allocation3_spill] sm:$0xff] %v1617_v53  ;;  %v1631_v26 = vmul.f32 %v800_v49, %v524_v7  ;;  %v1634_v30 = vmul.f32 0.70710677, %v1617_v53  ;;  %vm876_vm5 = vcmp.ge.f32.partialorder %v1528_v33, 0.0 }
 0x104   : > { %v1590_v31 = vpop.eup %1333  ;;  %v579_v38 = vmul.f32 0.17087276, %v1584_v27  ;;  %v542_v18 = vmul.f32 0.5, %v1622_v6  ;;  %vm868_vm6 = vcmp.ge.f32.partialorder %v1530_v34, 0.0  ;;  %vm877_vm7 = vcmp.ge.f32.partialorder %v1532_v35, 0.0 }
 0x105   : > { %v1598_v37 = vpop.eup %1335  ;;  %v588_v41 = vmul.f32 0.17087276, %v1590_v31  ;;  %v549_v11 = vadd.f32 1.0, %v537_v52  ;;  %1885 = vst [vmem:[#allocation4_spill] sm:$0xff] %v1634_v30  ;;  %v1644_v7 = vand.u32 2147483647, %v1634_v30 }
 0x106   : > { %v1604_v42 = vpop.eup %1337  ;;  %v591_v43 = vadd.f32 -0.82215226, %v579_v38  ;;  %v580_v44 = vmul.f32 0.17087276, %v1598_v37  ;;  %v554_v39 = vadd.f32 1.0, %v542_v18  ;;  %vm870_vm8 = vcmp.ge.f32.partialorder %v1546_v61, 0.0 }
 0x107   : > { %v600_v46 = vadd.f32 -0.82215226, %v588_v41  ;;  %v589_v47 = vmul.f32 0.17087276, %v1604_v42  ;;  %1347 = vrcp.f32 %v549_v11  ;;  %vm872_vm9 = vcmp.ge.f32.partialorder %v1548_v62, 0.0 }
 0x108   : > { %v603_v50 = vmul.f32 %v1584_v27, %v591_v43  ;;  %v592_v51 = vadd.f32 -0.82215226, %v580_v44  ;;  %1349 = vrcp.f32 %v554_v39  ;;  %vm871_vm10 = vcmp.ge.f32.partialorder %v1551_v63, 0.0 }
 0x109   : > { %v612_v54 = vmul.f32 %v1590_v31, %v600_v46  ;;  %v601_v57 = vadd.f32 -0.82215226, %v589_v47  ;;  %v1636_v38 = vpop.eup %1339  ;;  %vm869_vm11 = vcmp.ge.f32.partialorder %v1559_v4, 0.0  ;;  %v801_v4 = vsub.f32 0.0, %v1608_v45 }
 0x10a   : > { %v615_v58 = vadd.f32 1.4885159, %v603_v50  ;;  %v604_v9 = vmul.f32 %v1598_v37, %v592_v51  ;;  %v1639_v43 = vpop.eup %1341  ;;  %v582_v47 = vmul.f32 0.17087276, %v1636_v38  ;;  %vm873_vm13 = vcmp.ge.f32.partialorder %v1596_v36, 0.0 }
 0x10b   : > { %v624_v14 = vadd.f32 1.4885159, %v612_v54  ;;  %v613_v15 = vmul.f32 %v1604_v42, %v601_v57  ;;  %v1646_v49 = vpop.eup %1343  ;;  %v584_v52 = vmul.f32 0.17087276, %v1639_v43  ;;  %vm878_vm14 = vcmp.ge.f32.partialorder %v1602_v40, 0.0 }
 0x10c   : > { %v627_v19 = vmul.f32 %v1584_v27, %v615_v58  ;;  %v616_v25 = vadd.f32 1.4885159, %v604_v9  ;;  %v1650_v54 = vpop.eup %1345  ;;  %v594_v9 = vadd.f32 -0.82215226, %v582_v47  ;;  %v583_v11 = vmul.f32 0.17087276, %v1646_v49 }
 0x10d   : > { %v636_v3 = vmul.f32 %v1590_v31, %v624_v14  ;;  %v625_v41 = vadd.f32 1.4885159, %v613_v15  ;;  %v596_v18 = vadd.f32 -0.82215226, %v584_v52 }
 0x10e   : > { %v639_v44 = vadd.f32 -1.135204, %v627_v19  ;;  %v628_v46 = vmul.f32 %v1598_v37, %v616_v25  ;;  %v581_v19 = vmul.f32 0.17087276, %v1650_v54  ;;  %v595_v39 = vadd.f32 -0.82215226, %v583_v11 }
 0x10f   : > { %v648_v50 = vadd.f32 -1.135204, %v636_v3  ;;  %v637_v51 = vmul.f32 %v1604_v42, %v625_v41  ;;  %v606_v41 = vmul.f32 %v1636_v38, %v594_v9 }
 0x110   : > { %v651_v57 = vmul.f32 %v1584_v27, %v639_v44  ;;  %v640_v58 = vadd.f32 -1.135204, %v628_v46  ;;  %v608_v44 = vmul.f32 %v1639_v43, %v596_v18  ;;  %v593_v46 = vadd.f32 -0.82215226, %v581_v19 }
 0x111   : > { %v660_v14 = vmul.f32 %v1590_v31, %v648_v50  ;;  %v649_v15 = vadd.f32 -1.135204, %v637_v51  ;;  %v618_v50 = vadd.f32 1.4885159, %v606_v41  ;;  %v607_v51 = vmul.f32 %v1646_v49, %v595_v39  ;;  %v1666_v18 = vpop.eup %1347 }
 0x112   : > { %v663_v25 = vadd.f32 0.27886808, %v651_v57  ;;  %v652_v3 = vmul.f32 %v1598_v37, %v640_v58  ;;  %v620_v53 = vadd.f32 1.4885159, %v608_v44  ;;  %v605_v58 = vmul.f32 %v1650_v54, %v593_v46  ;;  %v1672_v46 = vpop.eup %1349 }
 0x113   : > { %v672_v0 = vadd.f32 0.27886808, %v660_v14  ;;  %v661_v55 = vmul.f32 %v1604_v42, %v649_v15  ;;  %v630_v14 = vmul.f32 %v1636_v38, %v618_v50  ;;  %v619_v15 = vadd.f32 1.4885159, %v607_v51 }
 0x114   : > { %v675_v47 = vmul.f32 %v1584_v27, %v663_v25  ;;  %v664_v5 = vadd.f32 0.27886808, %v652_v3  ;;  %v632_v3 = vmul.f32 %v1639_v43, %v620_v53  ;;  %v617_v41 = vadd.f32 1.4885159, %v605_v58 }
 0x115   : > { %v684_v52 = vmul.f32 %v1590_v31, %v672_v0  ;;  %v673_v57 = vadd.f32 0.27886808, %v661_v55  ;;  %v642_v39 = vadd.f32 -1.135204, %v630_v14  ;;  %v631_v44 = vmul.f32 %v1646_v49, %v619_v15 }
 0x116   : > { %v687_v9 = vadd.f32 -0.18628806, %v675_v47  ;;  %v676_v11 = vmul.f32 %v1598_v37, %v664_v5  ;;  %v644_v50 = vadd.f32 -1.135204, %v632_v3  ;;  %v629_v51 = vmul.f32 %v1650_v54, %v617_v41 }
 0x117   : > { %v696_v19 = vadd.f32 -0.18628806, %v684_v52  ;;  %v685_v25 = vmul.f32 %v1604_v42, %v673_v57  ;;  %v654_v53 = vmul.f32 %v1636_v38, %v642_v39  ;;  %v643_v58 = vadd.f32 -1.135204, %v631_v44 }
 0x118   : > { %v699_v0 = vmul.f32 %v1584_v27, %v687_v9  ;;  %v688_v55 = vadd.f32 -0.18628806, %v676_v11  ;;  %v656_v11 = vmul.f32 %v1639_v43, %v644_v50  ;;  %v641_v14 = vadd.f32 -1.135204, %v629_v51 }
 0x119   : > { %v708_v5 = vmul.f32 %v1590_v31, %v696_v19  ;;  %v697_v47 = vadd.f32 -0.18628806, %v685_v25  ;;  %v666_v19 = vadd.f32 0.27886808, %v654_v53  ;;  %v655_v25 = vmul.f32 %v1646_v49, %v643_v58 }
 0x11a   : > { %v711_v52 = vadd.f32 0.09678418, %v699_v0  ;;  %v700_v57 = vmul.f32 %v1598_v37, %v688_v55  ;;  %v668_v0 = vadd.f32 0.27886808, %v656_v11  ;;  %v653_v55 = vmul.f32 %v1650_v54, %v641_v14 }
 0x11b   : > { %v720_v30 = vadd.f32 0.09678418, %v708_v5  ;;  %v709_v9 = vmul.f32 %v1604_v42, %v697_v47  ;;  %v678_v5 = vmul.f32 %v1636_v38, %v666_v19  ;;  %v667_v47 = vadd.f32 0.27886808, %v655_v25 }
 0x11c   : > { %v723_v15 = vmul.f32 %v1584_v27, %v711_v52  ;;  %v712_v20 = vadd.f32 0.09678418, %v700_v57  ;;  %v680_v52 = vmul.f32 %v1639_v43, %v668_v0  ;;  %v665_v57 = vadd.f32 0.27886808, %v653_v55 }
 0x11d   : > { %v732_v3 = vmul.f32 %v1590_v31, %v720_v30  ;;  %v721_v41 = vadd.f32 0.09678418, %v709_v9  ;;  %v690_v30 = vadd.f32 -0.18628806, %v678_v5  ;;  %v679_v9 = vmul.f32 %v1646_v49, %v667_v47 }
 0x11e   : > { %v735_v39 = vadd.f32 0.37409195, %v723_v15  ;;  %v724_v44 = vmul.f32 %v1598_v37, %v712_v20  ;;  %v692_v15 = vadd.f32 -0.18628806, %v680_v52  ;;  %v677_v20 = vmul.f32 %v1650_v54, %v665_v57 }
 0x11f   : > { %v744_v50 = vadd.f32 0.37409195, %v732_v3  ;;  %v733_v51 = vmul.f32 %v1604_v42, %v721_v41  ;;  %v702_v3 = vmul.f32 %v1636_v38, %v690_v30  ;;  %v691_v41 = vadd.f32 -0.18628806, %v679_v9 }
 0x120   : > { %v747_v53 = vmul.f32 %v1584_v27, %v735_v39  ;;  %v736_v58 = vadd.f32 0.37409195, %v724_v44  ;;  %v704_v39 = vmul.f32 %v1639_v43, %v692_v15  ;;  %v689_v44 = vadd.f32 -0.18628806, %v677_v20 }
 0x121   : > { %v756_v11 = vmul.f32 %v1590_v31, %v744_v50  ;;  %v745_v14 = vadd.f32 0.37409195, %v733_v51  ;;  %v714_v50 = vadd.f32 0.09678418, %v702_v3  ;;  %v703_v51 = vmul.f32 %v1646_v49, %v691_v41 }
 0x122   : > { %v759_v19 = vadd.f32 1.0000237, %v747_v53  ;;  %v748_v25 = vmul.f32 %v1598_v37, %v736_v58  ;;  %v716_v53 = vadd.f32 0.09678418, %v704_v39  ;;  %v701_v58 = vmul.f32 %v1650_v54, %v689_v44 }
 0x123   : > { %v768_v0 = vadd.f32 1.0000237, %v756_v11  ;;  %v757_v55 = vmul.f32 %v1604_v42, %v745_v14  ;;  %v726_v11 = vmul.f32 %v1636_v38, %v714_v50  ;;  %v715_v14 = vadd.f32 0.09678418, %v703_v51 }
 0x124   : > { %v771_v5 = vmul.f32 %v1584_v27, %v759_v19  ;;  %v760_v47 = vadd.f32 1.0000237, %v748_v25  ;;  %v728_v19 = vmul.f32 %v1639_v43, %v716_v53  ;;  %v713_v25 = vadd.f32 0.09678418, %v701_v58 }
 0x125   : > { %v780_v52 = vmul.f32 %v1590_v31, %v768_v0  ;;  %v769_v57 = vadd.f32 1.0000237, %v757_v55  ;;  %v738_v0 = vadd.f32 0.37409195, %v726_v11  ;;  %v727_v55 = vmul.f32 %v1646_v49, %v715_v14 }
 0x126   : > { %v783_v30 = vadd.f32 -1.2655122, %v771_v5  ;;  %v772_v9 = vmul.f32 %v1598_v37, %v760_v47  ;;  %v740_v5 = vadd.f32 0.37409195, %v728_v19  ;;  %v725_v47 = vmul.f32 %v1650_v54, %v713_v25 }
 0x127   : > { %v792_v15 = vadd.f32 -1.2655122, %v780_v52  ;;  %v781_v20 = vmul.f32 %v1604_v42, %v769_v57  ;;  %v750_v52 = vmul.f32 %v1636_v38, %v738_v0  ;;  %v739_v57 = vadd.f32 0.37409195, %v727_v55 }
 0x128   : > { %v819_v3 = vadd.f32 %v1580_v23, %v783_v30  ;;  %v784_v41 = vadd.f32 -1.2655122, %v772_v9  ;;  %v752_v23 = vmul.f32 %v1639_v43, %v740_v5  ;;  %v737_v30 = vadd.f32 0.37409195, %v725_v47 }
 0x129   : > { %v828_v39 = vadd.f32 %v1582_v24, %v792_v15  ;;  %v793_v44 = vadd.f32 -1.2655122, %v781_v20  ;;  %v762_v11 = vadd.f32 1.0000237, %v750_v52  ;;  %v751_v24 = vmul.f32 %v1646_v49, %v739_v57 }
 0x12a   : > { %v831_v50 = vmul.f32 1.442695, %v819_v3  ;;  %v820_v51 = vadd.f32 %v1586_v28, %v784_v41  ;;  %v764_v15 = vadd.f32 1.0000237, %v752_v23  ;;  %v749_v20 = vmul.f32 %v1650_v54, %v737_v30 }
 0x12b   : > { %v849_v53 = vmul.f32 1.442695, %v828_v39  ;;  %v829_v58 = vadd.f32 %v1588_v29, %v793_v44  ;;  %v774_v28 = vmul.f32 %v1636_v38, %v762_v11  ;;  %v763_v19 = vadd.f32 1.0000237, %v751_v24 }
 0x12c   : > { %1351 = vpow2.f32 %v831_v50  ;;  %v833_v9 = vmul.f32 1.442695, %v820_v51  ;;  %v585_v25 = vmul.f32 0.17087276, %v1666_v18  ;;  %v776_v29 = vmul.f32 %v1639_v43, %v764_v15 }
 0x12d   : > { %1353 = vpow2.f32 %v849_v53  ;;  %v851_v14 = vmul.f32 1.442695, %v829_v58  ;;  %v761_v3 = vadd.f32 1.0000237, %v749_v20  ;;  %v590_v41 = vmul.f32 0.17087276, %v1672_v46 }
 0x12e   : > { %1355 = vpow2.f32 %v833_v9  ;;  %v786_v0 = vadd.f32 -1.2655122, %v774_v28  ;;  %v775_v55 = vmul.f32 %v1646_v49, %v763_v19  ;;  %v597_v39 = vadd.f32 -0.82215226, %v585_v25 }
 0x12f   : > { %1357 = vpow2.f32 %v851_v14  ;;  %v538_v44 = vmul.f32 0.5, %v1644_v7  ;;  %v788_v5 = vadd.f32 -1.2655122, %v776_v29  ;;  %v1886_v47 = vsub.f32 0.0, %v1563_v8 }
 0x130   : > { %v773_v51 = vmul.f32 %v1650_v54, %v761_v3  ;;  %v602_v52 = vadd.f32 -0.82215226, %v590_v41  ;;  %v822_v57 = vadd.f32 %v1625_v10, %v786_v0  ;;  %v787_v53 = vadd.f32 -1.2655122, %v775_v55 }
 0x131   : > { %v811_v50 = vmul.f32 %v1886_v47, %v1563_v8  ;;  %v609_v58 = vmul.f32 %v1666_v18, %v597_v39  ;;  %v550_v23 = vadd.f32 1.0, %v538_v44  ;;  %v824_v30 = vadd.f32 %v1631_v26, %v788_v5 }
 0x132   : > { %v785_v9 = vadd.f32 -1.2655122, %v773_v51  ;;  %v1887_v11 = vsub.f32 0.0, %v1566_v12  ;;  %v614_v24 = vmul.f32 %v1672_v46, %v602_v52  ;;  %v837_v14 = vmul.f32 1.442695, %v822_v57 }
 0x133   : > { %v823_v15 = vadd.f32 %v811_v50, %v787_v53  ;;  %v621_v10 = vadd.f32 1.4885159, %v609_v58  ;;  %1359 = vrcp.f32 %v550_v23  ;;  %v841_v20 = vmul.f32 1.442695, %v824_v30 }
 0x134   : > { %v809_v8 = vmul.f32 %v1887_v11, %v1566_v12  ;;  %v1736_v28 = vmul.f32 0.5, %v1542_v59  ;;  %v626_v19 = vadd.f32 1.4885159, %v614_v24  ;;  %1361 = vpow2.f32 %v837_v14 }
 0x135   : > { %v839_v29 = vmul.f32 1.442695, %v823_v15  ;;  %v1739_v12 = vmul.f32 0.5, %v1544_v60  ;;  %v633_v3 = vmul.f32 %v1666_v18, %v621_v10  ;;  %1363 = vpow2.f32 %v841_v20 }
 0x136   : > { %v821_v26 = vadd.f32 %v809_v8, %v785_v9  ;;  %v1352_v25 = vpop.eup %1351  ;;  %v638_v39 = vmul.f32 %v1672_v46, %v626_v19  ;;  %v1747_v47 = vadd.f32 %v1540_v56, %v1520_v21 }
 0x137   : > { %v1354_v41 = vpop.eup %1353  ;;  %v855_v0 = vmul.f32 %v1352_v25, %v1584_v27  ;;  %1365 = vpow2.f32 %v839_v29  ;;  %v645_v5 = vadd.f32 -1.135204, %v633_v3 }
 0x138   : > { %v835_v55 = vmul.f32 1.442695, %v821_v26  ;;  %v1356_v44 = vpop.eup %1355  ;;  %v864_v59 = vmul.f32 %v1354_v41, %v1590_v31  ;;  %v650_v9 = vadd.f32 -1.135204, %v638_v39  ;;  %v1769_v20 = vmul.f32 0.70710677, %v1747_v47 }
 0x139   : > { %v1358_v60 = vpop.eup %1357  ;;  %v879_v50 = vsub.f32 1.0, %v855_v0  ;;  %v1221_v51 = vadd.f32 -1.0, %v855_v0  ;;  %v856_v52 = vmul.f32 %v1356_v44, %v1598_v37  ;;  %v657_v58 = vmul.f32 %v1666_v18, %v645_v5 }
 0x13a   : > { %1367 = vpow2.f32 %v835_v55  ;;  %v888_v27 = vsub.f32 1.0, %v864_v59  ;;  %v1230_v57 = vadd.f32 -1.0, %v864_v59  ;;  %v865_v53 = vmul.f32 %v1358_v60, %v1604_v42 }
 0x13b   : > { %v903_v31 = vsel %vm867_vm4, %v879_v50, %v1221_v51  ;;  %v880_v23 = vsub.f32 1.0, %v856_v52  ;;  %v1222_v30 = vadd.f32 -1.0, %v856_v52  ;;  %v669_v24 = vadd.f32 0.27886808, %v657_v58  ;;  %vm1112_vm4 = vmor %vm1111_vm3, %vm311_vm0 }
 0x13c   : > { %v915_v21 = vadd.f32 1.0, %v903_v31  ;;  %v912_v56 = vsel %vm876_vm5, %v888_v27, %v1230_v57  ;;  %v889_v11 = vsub.f32 1.0, %v865_v53  ;;  %v1231_v8 = vadd.f32 -1.0, %v865_v53 }
 0x13d   : > { %v924_v37 = vadd.f32 1.0, %v912_v56  ;;  %v904_v42 = vsel %vm868_vm6, %v880_v23, %v1222_v30  ;;  %v662_v32 = vmul.f32 %v1672_v46, %v650_v9  ;;  %v1761_v14 = vpop.eup %1359  ;;  %v681_v19 = vmul.f32 %v1666_v18, %v669_v24 }
 0x13e   : > { %v1764_v15 = vmul.f32 %v915_v21, %v1553_v1  ;;  %v916_v33 = vadd.f32 1.0, %v904_v42  ;;  %v913_v10 = vsel %vm877_vm7, %v889_v11, %v1231_v8  ;;  %v1362_v29 = vpop.eup %1361  ;;  %v586_v1 = vmul.f32 0.17087276, %v1761_v14 }
 0x13f   : > { %v1772_v34 = vmul.f32 %v924_v37, %v1555_v2  ;;  %v925_v26 = vadd.f32 1.0, %v913_v10  ;;  %v674_v25 = vadd.f32 0.27886808, %v662_v32  ;;  %v1779_v35 = vand.u32 2147483647, %v1769_v20  ;;  %v1364_v41 = vpop.eup %1363 }
 0x140   : > { %v928_v3 = vmul.f32 %v916_v33, %v1568_v13  ;;  %v858_v2 = vmul.f32 %v1362_v29, %v1636_v38  ;;  %v693_v55 = vadd.f32 -0.18628806, %v681_v19  ;;  %v860_v59 = vmul.f32 %v1364_v41, %v1639_v43 }
 0x141   : > { %v1782_v0 = vmul.f32 %v925_v26, %v1574_v17  ;;  %v686_v39 = vmul.f32 %v1672_v46, %v674_v25  ;;  %v1366_v44 = vpop.eup %1365  ;;  %v598_v13 = vadd.f32 -0.82215226, %v586_v1  ;;  %v539_v5 = vmul.f32 0.5, %v1779_v35 }
 0x142   : > { %v882_v50 = vsub.f32 1.0, %v858_v2  ;;  %v1224_v51 = vadd.f32 -1.0, %v858_v2  ;;  %v859_v52 = vmul.f32 %v1366_v44, %v1646_v49  ;;  %v705_v17 = vmul.f32 %v1666_v18, %v693_v55 }
 0x143   : > { %v884_v27 = vsub.f32 1.0, %v860_v59  ;;  %v1226_v38 = vadd.f32 -1.0, %v860_v59  ;;  %v698_v53 = vadd.f32 -0.18628806, %v686_v39  ;;  %v610_v24 = vmul.f32 %v1761_v14, %v598_v13 }
 0x144   : > { %v1368_v60 = vpop.eup %1367  ;;  %v906_v43 = vsel %vm870_vm8, %v882_v50, %v1224_v51  ;;  %v883_v58 = vsub.f32 1.0, %v859_v52  ;;  %v1225_v31 = vadd.f32 -1.0, %v859_v52  ;;  %v717_v23 = vadd.f32 0.09678418, %v705_v17 }
 0x145   : > { %v857_v57 = vmul.f32 %v1368_v60, %v1650_v54  ;;  %v918_v30 = vadd.f32 1.0, %v906_v43  ;;  %v908_v9 = vsel %vm872_vm9, %v884_v27, %v1226_v38  ;;  %v710_v54 = vmul.f32 %v1672_v46, %v698_v53 }
 0x146   : > { %v920_v49 = vadd.f32 1.0, %v908_v9  ;;  %v907_v11 = vsel %vm871_vm10, %v883_v58, %v1225_v31  ;;  %v729_v8 = vmul.f32 %v1666_v18, %v717_v23  ;;  %v622_v19 = vadd.f32 1.4885159, %v610_v24 }
 0x147   : > { %v881_v21 = vsub.f32 1.0, %v857_v57  ;;  %v1223_v56 = vadd.f32 -1.0, %v857_v57  ;;  %v930_v61 = vmul.f32 %v918_v30, %v1593_v22  ;;  %v919_v37 = vadd.f32 1.0, %v907_v11 }
 0x148   : > { %v932_v62 = vmul.f32 %v920_v49, %v1611_v48  ;;  %v741_v33 = vadd.f32 0.37409195, %v729_v8  ;;  %v722_v10 = vadd.f32 0.09678418, %v710_v54  ;;  %v551_v25 = vadd.f32 1.0, %v539_v5 }
 0x149   : > { %v905_v42 = vsel %vm869_vm11, %v881_v21, %v1223_v56  ;;  %v1283_v63 = vpack.c.bf16 %v930_v61, %v1764_v15  ;;  %v931_v26 = vmul.f32 %v919_v37, %v1736_v28  ;;  %v634_v41 = vmul.f32 %v1761_v14, %v622_v19 }
 0x14a   : > { %v917_v32 = vadd.f32 1.0, %v905_v42  ;;  %v753_v22 = vmul.f32 %v1666_v18, %v741_v33  ;;  %v734_v1 = vmul.f32 %v1672_v46, %v722_v10  ;;  %1369 = vrcp.f32 %v551_v25 }
 0x14b   : > { %v1281_v48 = vpack.c.bf16 %v931_v26, %v928_v3  ;;  %v1406_v15 = vmov 0.0|0.0   ;;  %v646_v28 = vadd.f32 -1.135204, %v634_v41  ;;  %v1888_v44 = vmov 0.0  }
 0x14c   : > { %v929_v29 = vmul.f32 %v917_v32, %v1739_v12  ;;  %v765_v55 = vadd.f32 1.0000237, %v753_v22  ;;  %v746_v39 = vadd.f32 0.37409195, %v734_v1  ;;  %1289 = vmatprep.subr.bf16.mxu0 %v1406_v15  ;;  %1266 = vmatprep.mubr.msk.f32.mxu0 %vm1407_vm12, %v1888_v44  ;;  %v813_v5 = vmul.f32 %v801_v4, %v1608_v45 }
 0x14d   : > { %1282 = vmatprep.subr.bf16.mxu1 %v1281_v48  ;;  %v658_v13 = vmul.f32 %v1761_v14, %v646_v28  ;;  %v806_v50 = vsub.f32 0.0, %v1622_v6  ;;  %v803_v40 = vsub.f32 0.0, %v1779_v35  ;;  %vm875_vm2 = vcmp.ge.f32.partialorder %v1769_v20, 0.0 }
 0x14e   : > { %v1290_v2 = vpack.c.bf16 %v932_v62, %v929_v29  ;;  %v777_v12 = vmul.f32 %v1666_v18, %v765_v55  ;;  %v758_v59 = vmul.f32 %v1672_v46, %v746_v39  ;;  %1284 = vmatpush1.bf16.msra.mxu1 %v1283_v63  ;;  %v802_v62 = vsub.f32 0.0, %v1644_v7 }
 0x14f   : > { %v670_v51 = vadd.f32 0.27886808, %v658_v13  ;;  %v818_v53 = vmul.f32 %v806_v50, %v1622_v6  ;;  %vm1113_vm5 = vcmask 553988  }
 0x150   : > { %1291 = vmatpush3.bf16.msra.mxu0 %v1290_v2  ;;  %v789_v3 = vadd.f32 -1.2655122, %v777_v12  ;;  %v770_v60 = vadd.f32 1.0000237, %v758_v59  ;;  %v814_v4 = vmul.f32 %v802_v62, %v1644_v7  ;;  %vm1114_vm6 = vmor %vm1113_vm5, %vm1112_vm4 }
 0x151   : > { %1292 = vmatprep.subr.bf16.mxu0 %v1406_v15  ;;  %v682_v27 = vmul.f32 %v1761_v14, %v670_v51 }
 0x152   : > { %v825_v52 = vadd.f32 %v813_v5, %v789_v3  ;;  %v782_v17 = vmul.f32 %v1672_v46, %v770_v60 }
 0x153   : > { %v694_v58 = vadd.f32 -0.18628806, %v682_v27 }
 0x154   : > { %v843_v38 = vmul.f32 1.442695, %v825_v52  ;;  %v794_v57 = vadd.f32 -1.2655122, %v782_v17  ;;  %v1821_v43 = vpop.eup %1369 }
 0x155   : > { %v587_v45 = vmul.f32 0.17087276, %v1821_v43  ;;  %v706_v23 = vmul.f32 %v1761_v14, %v694_v58 }
 0x156   : > { %1371 = vpow2.f32 %v843_v38  ;;  %v830_v31 = vadd.f32 %v818_v53, %v794_v57  ;;  %v815_v57 = vmul.f32 %v803_v40, %v1779_v35  ;;  %v1890_v53 = vld [vmem:[#allocation4_spill] sm:$0xff] }
 0x157   : > { %v599_v9 = vadd.f32 -0.82215226, %v587_v45  ;;  %v718_v21 = vadd.f32 0.09678418, %v706_v23  ;;  %vm874_vm15 = vcmp.ge.f32.partialorder %v1890_v53, 0.0  ;;  %v1891_v45 = vld [vmem:[#allocation3_spill] sm:$0xff] }
 0x158   : > { %v853_v30 = vmul.f32 1.442695, %v830_v31  ;;  %v502_v23 = vmul.f32 0.5, %v1891_v45 }
 0x159   : > { %v611_v56 = vmul.f32 %v1821_v43, %v599_v9  ;;  %v730_v49 = vmul.f32 %v1761_v14, %v718_v21 }
 0x15a   : > { %1373 = vpow2.f32 %v853_v30 }
 0x15b   : > { %v623_v11 = vadd.f32 1.4885159, %v611_v56  ;;  %v742_v8 = vadd.f32 0.37409195, %v730_v49 }
 0x15d   : > { %v635_v6 = vmul.f32 %v1821_v43, %v623_v11  ;;  %v754_v54 = vmul.f32 %v1761_v14, %v742_v8 }
 0x15f   : > { %v647_v37 = vadd.f32 -1.135204, %v635_v6  ;;  %v766_v24 = vadd.f32 1.0000237, %v754_v54  ;;  %v503_v54 = vmul.f32 0.5, %v1747_v47 }
 0x160   : > { %v1372_v61 = vpop.eup %1371 }
 0x161   : > { %v861_v42 = vmul.f32 %v1372_v61, %v1666_v18  ;;  %v659_v32 = vmul.f32 %v1821_v43, %v647_v37  ;;  %v778_v63 = vmul.f32 %v1761_v14, %v766_v24  ;;  %v501_v18 = vmul.f32 0.5, %v1572_v16 }
 0x163   : > { %v885_v33 = vsub.f32 1.0, %v861_v42  ;;  %v1227_v10 = vadd.f32 -1.0, %v861_v42  ;;  %v671_v19 = vadd.f32 0.27886808, %v659_v32  ;;  %v790_v22 = vadd.f32 -1.2655122, %v778_v63  ;;  %v944_v42 = vpop.permute.xlu0 %943 }
 0x164   : > { %v1374_v26 = vpop.eup %1373 }
 0x165   : > { %v909_v25 = vsel %vm873_vm13, %v885_v33, %v1227_v10  ;;  %v866_v29 = vmul.f32 %v1374_v26, %v1672_v46  ;;  %v683_v41 = vmul.f32 %v1821_v43, %v671_v19  ;;  %v826_v55 = vadd.f32 %v814_v4, %v790_v22  ;;  %v1889_v46 = vld [vmem:[#allocation2_spill] sm:$0xff] }
 0x166   : > { %v921_v1 = vadd.f32 1.0, %v909_v25  ;;  %v506_v12 = vmul.f32 0.5, %v1889_v46  ;;  %v1098_v26 = vlaneseq }
 0x167   : > { %v890_v48 = vsub.f32 1.0, %v866_v29  ;;  %v1232_v2 = vadd.f32 -1.0, %v866_v29  ;;  %v695_v15 = vadd.f32 -0.18628806, %v683_v41  ;;  %v845_v28 = vmul.f32 1.442695, %v826_v55 }
 0x168   : > { %v933_v39 = vmul.f32 %v921_v1, %v501_v18  ;;  %v1099_v20 = vshrl.u32 %v1098_v26, 7 }
 0x169   : > { %v914_v36 = vsel %vm878_vm14, %v890_v48, %v1232_v2  ;;  %v707_v7 = vmul.f32 %v1821_v43, %v695_v15  ;;  %1375 = vpow2.f32 %v845_v28 }
 0x16a   : > { %v1287_v44 = vpack.c.bf16 %v1772_v34, %v933_v39  ;;  %v926_v59 = vadd.f32 1.0, %v914_v36 }
 0x16b   : > { %v719_v13 = vadd.f32 0.09678418, %v707_v7 }
 0x16c   : > { %v938_v16 = vmul.f32 %v926_v59, %v506_v12 }
 0x16d   : > { %v731_v3 = vmul.f32 %v1821_v43, %v719_v13 }
 0x16f   : > { %v743_v5 = vadd.f32 0.37409195, %v731_v3 }
 0x171   : > { %v755_v60 = vmul.f32 %v1821_v43, %v743_v5 }
 0x173   : > { %v767_v50 = vadd.f32 1.0000237, %v755_v60  ;;  %v1376_v51 = vpop.eup %1375 }
 0x174   : > { %v862_v52 = vmul.f32 %v1376_v51, %v1761_v14  ;;  %v939_v14 = vld [vmem:[%s1874_s3] sm:$0x3] }
 0x175   : > { %v779_v34 = vmul.f32 %v1821_v43, %v767_v50 }
 0x176   : > { %v886_v17 = vsub.f32 1.0, %v862_v52  ;;  %v1228_v27 = vadd.f32 -1.0, %v862_v52 }
 0x177   : > { %v791_v38 = vadd.f32 -1.2655122, %v779_v34 }
 0x178   : > { %v910_v58 = vsel %vm874_vm15, %v886_v17, %v1228_v27 }
 0x179   : > { %v827_v31 = vadd.f32 %v815_v57, %v791_v38  ;;  %v922_v30 = vadd.f32 1.0, %v910_v58 }
 0x17b   : > { %v847_v9 = vmul.f32 1.442695, %v827_v31  ;;  %v934_v21 = vmul.f32 %v922_v30, %v502_v23 }
 0x17d   : > { %1377 = vpow2.f32 %v847_v9  ;;  %v1285_v56 = vpack.c.bf16 %v1782_v0, %v934_v21 }
 0x17f   : > { %1286 = vmatprep.subr.bf16.mxu1 %v1285_v56 }
 0x180   : > { %1288 = vmatpush1.bf16.msra.mxu1 %v1287_v44 }
 0x183   : > { %1233 = vmatmul.mubr.msk.f32.vlgmr.msra.gmra.mrb[6].mxu1 %vm946_vm1, %v939_v14 }
 0x187   : > { %v1378_v35 = vpop.eup %1377 }
 0x188   : > { %v863_v49 = vmul.f32 %v1378_v35, %v1821_v43  ;;  %v1408_v43 = vmov 1983009808  }
 0x189   : > { %v1096_v63 = vunpack.c.l.s4 %v1408_v43 }
 0x18a   : > { %v887_v11 = vsub.f32 1.0, %v863_v49  ;;  %v1229_v8 = vadd.f32 -1.0, %v863_v49 }
 0x18b   : > { %v1097_v19 = vunpack.c.0.s8 %v1096_v63 }
 0x18c   : > { %v911_v6 = vsel %vm875_vm2, %v887_v11, %v1229_v8 }
 0x18d   : > { %v923_v61 = vadd.f32 1.0, %v911_v6  ;;  %v1100_v25 = vsub.s32 %v1097_v19, %v1099_v20 }
 0x18f   : > { %v935_v0 = vmul.f32 %v923_v61, %v503_v54 }
 0x191   : > { %v1293_v37 = vpack.c.bf16 %v938_v16, %v935_v0 }
 0x193   : > { %1294 = vmatpush3.bf16.msra.mxu0 %v1293_v37 }
 0x196   : > { %1267 = vmatmul.mubr.msk.f32.vlgmr.msra.gmra.mrb[6].mxu0 %vm946_vm1, %v939_v14 }
 0x256   : > { %v1016_v24 = vpop.f32.mrb[6].mxu1 }
 0x257   : > { %v1017_v62 = vadd.f32 %v1016_v24, %v944_v42  ;;  %v1018_v32 = vpop.f32.mrb[7].mxu1 }
 0x258   : > { %v1019_v33 = vadd.f32 %v1018_v32, %v944_v42 }
 0x25a   : > { %v1094_v10 = vcombine.low %v1017_v62, %v1019_v33 }
 0x25c   : > { %v1101_v22 = vrot.slane %v1094_v10, %v1100_v25 }
 0x269   : > { %v1087_v47 = vpop.f32.mrb[6].mxu0 }
 0x26a   : > { %v1088_v29 = vadd.f32 %v1087_v47, %v944_v42  ;;  %v1268_v4 = vpop.f32.mrb[7].mxu0 }
 0x26c   : > { %v1108_v18 = vrot.slane %v1088_v29, %v1100_v25 }
 0x26e   : > { %v1109_v1 = vcombine.low %v1101_v22, %v1108_v18 }
 0x270   : > { %1115 = vst.msk [vmem:[%s262_s28] sm:$0x3f] %vm1114_vm6, %v1109_v1 }
 0x271 PF: > { %s15_s20 = sadd.s32 1, %s1401_s20   ;;  %s1892_s18 = smov %s1397_s19 }
 0x272   : > { %p12_p5 = scmp.ge.s32.totalorder %s15_s20, 4   ;;  %s1893_s19 = smov %s1895_s21 }
 0x274   :  { %14 = sbr.rel (!%p12_p5) target bundleno = 2 (0x2), region = 70 }

</bundles_post_ra>
